<compile_context>
chip_gen: v5e
topology: v5e:2x2
jax: 0.10.0
libtpu: 0.0.40
codegen_flags: <defaults>
</compile_context>

<pallas_src>
import functools

import jax
import jax.numpy as jnp
from jax import lax
from jax.experimental import pallas as pl
from jax.experimental.pallas import tpu as pltpu

netG_params = {"base_dim": 8, "enc_dim_num": 3}

LRELU_SLOPE = 0.2
IN_EPS = 1e-5        # nn.InstanceNorm2d default eps (biased variance)
STYLE_EPS = 1e-8     # Generator.eps (unbiased torch.var)


# --------------------------------------------------------------------------
# Pallas kernels (one grid step per batch element; lane dim = spatial)
# --------------------------------------------------------------------------
def _lrelu(y):
    return jnp.where(y >= 0, y, LRELU_SLOPE * y)


def _conv_kernel(w_ref, c_ref, b_ref, o_ref):
    o_ref[...] = (jnp.dot(w_ref[...], c_ref[...],
                          preferred_element_type=jnp.float32) + b_ref[...])


def _conv_in_lrelu_kernel(w_ref, c_ref, b_ref, o_ref):
    y = jnp.dot(w_ref[...], c_ref[...],
                preferred_element_type=jnp.float32) + b_ref[...]
    n = y.shape[1]
    m = jnp.sum(y, axis=1, keepdims=True) / n
    yc = y - m
    v = jnp.sum(yc * yc, axis=1, keepdims=True) / n
    o_ref[...] = _lrelu(yc * lax.rsqrt(v + IN_EPS))


def _conv_spade_lrelu_kernel(w_ref, c_ref, b_ref, g_ref, be_ref, o_ref):
    y = jnp.dot(w_ref[...], c_ref[...],
                preferred_element_type=jnp.float32) + b_ref[...]
    n = y.shape[1]
    m = jnp.sum(y, axis=1, keepdims=True) / n
    yc = y - m
    v = jnp.sum(yc * yc, axis=1, keepdims=True) / n
    y = yc * lax.rsqrt(v + IN_EPS) * (1.0 + g_ref[...]) + be_ref[...]
    o_ref[...] = _lrelu(y)


def _conv_tanh_kernel(w_ref, c_ref, b_ref, o_ref):
    o_ref[...] = jnp.tanh(jnp.dot(w_ref[...], c_ref[...],
                                  preferred_element_type=jnp.float32) + b_ref[...])


def _conv2_skip_kernel(w2_ref, c2_ref, b2_ref, ws_ref, hs_ref, bs_ref, o_ref):
    o_ref[...] = (
        jnp.dot(w2_ref[...], c2_ref[...],
                preferred_element_type=jnp.float32) + b2_ref[...]
        + jnp.dot(ws_ref[...], hs_ref[...],
                  preferred_element_type=jnp.float32) + bs_ref[...])


def _gb_spade_kernel(wgb_ref, r_ref, bgb_ref, h_ref, x_ref, gb2_ref, *, in_dim):
    # one matmul for the 4 concatenated 1x1 SPADE convs, fused with the first
    # modulated InstanceNorm + LeakyReLU of the decoder block.
    gb = jnp.dot(wgb_ref[...], r_ref[...],
                 preferred_element_type=jnp.float32) + bgb_ref[...]
    g1 = gb[0:in_dim, :]
    b1 = gb[in_dim:2 * in_dim, :]
    h = h_ref[...]
    n = h.shape[1]
    m = jnp.sum(h, axis=1, keepdims=True) / n
    hc = h - m
    v = jnp.sum(hc * hc, axis=1, keepdims=True) / n
    y = hc * lax.rsqrt(v + IN_EPS) * (1.0 + g1) + b1
    x_ref[...] = _lrelu(y)
    gb2_ref[...] = gb[2 * in_dim:, :]


def _style_mix_kernel(y_ref, rho_ref, o_ref):
    # per-batch: IN (unbiased) per channel, LN (unbiased) over (C,HW), rho mix
    y = y_ref[...]                      # (C, HW)
    c, hw = y.shape
    m_in = jnp.sum(y, axis=1, keepdims=True) / hw
    d_in = y - m_in
    v_in = jnp.sum(d_in * d_in, axis=1, keepdims=True) / (hw - 1)
    y_in = d_in / jnp.sqrt(v_in + STYLE_EPS)
    m_ln = jnp.sum(m_in, axis=0, keepdims=True) / c
    d_ln = y - m_ln
    v_ln = jnp.sum(jnp.sum(d_ln * d_ln, axis=1, keepdims=True),
                   axis=0, keepdims=True) / (c * hw - 1)
    y_ln = d_ln / jnp.sqrt(v_ln + STYLE_EPS)
    r = rho_ref[...]                    # (1, 2)
    o_ref[...] = r[:, 0:1] * y_in + r[:, 1:2] * y_ln


# --------------------------------------------------------------------------
# JAX glue: im2col, K padding, pooling, bilinear resize
# --------------------------------------------------------------------------
def _im2col(x, kh, kw, stride, pad):
    # NCHW -> (B, C*kh*kw, Ho*Wo), no transposes (stack + contiguous reshape)
    B, C, H, W = x.shape
    Ho = (H + 2 * pad - kh) // stride + 1
    Wo = (W + 2 * pad - kw) // stride + 1
    xp = jnp.pad(x, ((0, 0), (0, 0), (pad, pad), (pad, pad)))
    cols = []
    for i in range(kh):
        for j in range(kw):
            cols.append(
                xp[:, :,
                   i:i + (Ho - 1) * stride + 1:stride,
                   j:j + (Wo - 1) * stride + 1:stride])
    patches = jnp.stack(cols, axis=2)            # (B, C, kh*kw, Ho, Wo)
    return patches.reshape(B, C * kh * kw, Ho * Wo), Ho, Wo


def _pad_k(w2d, cols):
    # zero-pad the contraction dim to a multiple of 8 (unmasked loads)
    K = w2d.shape[1]
    Kp = -(-K // 8) * 8
    if Kp != K:
        w2d = jnp.pad(w2d, ((0, 0), (0, Kp - K)))
        cols = jnp.pad(cols, ((0, 0), (0, Kp - K), (0, 0)))
    return w2d, cols


def _call_conv(kernel, w2d, cols, bias, B, Cout, HW, extras=()):
    Kp = w2d.shape[1]
    in_specs = [
        pl.BlockSpec((Cout, Kp), lambda b: (0, 0)),
        pl.BlockSpec((None, Kp, HW), lambda b: (b, 0, 0)),
        pl.BlockSpec((Cout, 1), lambda b: (0, 0)),
    ]
    args = [w2d, cols, bias]
    for e in extras:
        in_specs.append(pl.BlockSpec((None,) + e.shape[1:],
                                     lambda b: (b, 0, 0)))
        args.append(e)
    return pl.pallas_call(
        kernel,
        out_shape=jax.ShapeDtypeStruct((B, Cout, HW), jnp.float32),
        grid=(B,),
        in_specs=in_specs,
        out_specs=pl.BlockSpec((None, Cout, HW), lambda b: (b, 0, 0)),
        compiler_params=pltpu.CompilerParams(dimension_semantics=("parallel",)),
    )(*args)


def _conv2d_base(x, p, stride, pad, kernel, extras=()):
    w, b = p["w"], p["b"]
    Cout, Cin, kh, kw = w.shape
    B, _, H, W = x.shape
    if kh == 1 and kw == 1 and stride == 1 and pad == 0:
        cols, Ho, Wo = x.reshape(B, Cin, H * W), H, W
    else:
        cols, Ho, Wo = _im2col(x, kh, kw, stride, pad)
    w2d = w.reshape(Cout, Cin * kh * kw)
    w2d, cols = _pad_k(w2d, cols)
    HW = Ho * Wo
    out = _call_conv(kernel,
                     w2d.astype(jnp.bfloat16), cols.astype(jnp.bfloat16),
                     b.reshape(Cout, 1).astype(jnp.float32),
                     B, Cout, HW, extras)
    return out.reshape(B, Cout, Ho, Wo)


def conv2d_plain(x, p, stride, pad):
    return _conv2d_base(x, p, stride, pad, _conv_kernel)


def conv2d_in_lrelu(x, p, stride, pad):
    return _conv2d_base(x, p, stride, pad, _conv_in_lrelu_kernel)


def conv2d_tanh(x, p, stride, pad):
    return _conv2d_base(x, p, stride, pad, _conv_tanh_kernel)


def conv2d_spade_lrelu(x, p, g, bm):
    # g, bm: (B, Cout, HW) f32, already spatially matched (3x3, stride 1, pad 1)
    return _conv2d_base(x, p, 1, 1, _conv_spade_lrelu_kernel,
                        extras=(g.astype(jnp.float32), bm.astype(jnp.float32)))


def conv2d_plus_skip(x, p2, h, ps):
    # conv2 (3x3, pad 1) on x  +  1x1 skip conv on h, fused in one kernel
    B, _, H, W = x.shape
    Cout = p2["w"].shape[0]
    cols2, Ho, Wo = _im2col(x, 3, 3, 1, 1)
    w2 = p2["w"].reshape(Cout, -1)
    w2, cols2 = _pad_k(w2, cols2)
    Csk = h.shape[1]
    hcols = h.reshape(B, Csk, H * W)
    ws = ps["w"].reshape(Cout, Csk)
    ws, hcols = _pad_k(ws, hcols)
    HW = Ho * Wo
    K2, Ks = w2.shape[1], ws.shape[1]
    out = pl.pallas_call(
        _conv2_skip_kernel,
        out_shape=jax.ShapeDtypeStruct((B, Cout, HW), jnp.float32),
        grid=(B,),
        in_specs=[
            pl.BlockSpec((Cout, K2), lambda b: (0, 0)),
            pl.BlockSpec((None, K2, HW), lambda b: (b, 0, 0)),
            pl.BlockSpec((Cout, 1), lambda b: (0, 0)),
            pl.BlockSpec((Cout, Ks), lambda b: (0, 0)),
            pl.BlockSpec((None, Ks, HW), lambda b: (b, 0, 0)),
            pl.BlockSpec((Cout, 1), lambda b: (0, 0)),
        ],
        out_specs=pl.BlockSpec((None, Cout, HW), lambda b: (b, 0, 0)),
        compiler_params=pltpu.CompilerParams(dimension_semantics=("parallel",)),
    )(w2.astype(jnp.bfloat16), cols2.astype(jnp.bfloat16),
      p2["b"].reshape(Cout, 1).astype(jnp.float32),
      ws.astype(jnp.bfloat16), hcols.astype(jnp.bfloat16),
      ps["b"].reshape(Cout, 1).astype(jnp.float32))
    return out.reshape(B, Cout, Ho, Wo)


def gb_and_spade(r, p, h, in_dim, out_dim):
    # batched gamma1/beta1/gamma2/beta2 1x1 convs on r + first SPADE norm on h
    B, Cr, H, W = r.shape
    HW = H * W
    wcat = jnp.concatenate(
        [p["gamma1"]["w"].reshape(in_dim, Cr),
         p["beta1"]["w"].reshape(in_dim, Cr),
         p["gamma2"]["w"].reshape(out_dim, Cr),
         p["beta2"]["w"].reshape(out_dim, Cr)], axis=0)
    bcat = jnp.concatenate(
        [p["gamma1"]["b"], p["beta1"]["b"],
         p["gamma2"]["b"], p["beta2"]["b"]], axis=0).reshape(-1, 1)
    rcols = r.reshape(B, Cr, HW)
    wcat, rcols = _pad_k(wcat, rcols)
    Ctot = 2 * in_dim + 2 * out_dim
    Kp = wcat.shape[1]
    hmat = h.reshape(B, in_dim, HW).astype(jnp.float32)
    kern = functools.partial(_gb_spade_kernel, in_dim=in_dim)
    x_out, gb2 = pl.pallas_call(
        kern,
        out_shape=(jax.ShapeDtypeStruct((B, in_dim, HW), jnp.float32),
                   jax.ShapeDtypeStruct((B, 2 * out_dim, HW), jnp.float32)),
        grid=(B,),
        in_specs=[
            pl.BlockSpec((Ctot, Kp), lambda b: (0, 0)),
            pl.BlockSpec((None, Kp, HW), lambda b: (b, 0, 0)),
            pl.BlockSpec((Ctot, 1), lambda b: (0, 0)),
            pl.BlockSpec((None, in_dim, HW), lambda b: (b, 0, 0)),
        ],
        out_specs=(pl.BlockSpec((None, in_dim, HW), lambda b: (b, 0, 0)),
                   pl.BlockSpec((None, 2 * out_dim, HW), lambda b: (b, 0, 0))),
        compiler_params=pltpu.CompilerParams(dimension_semantics=("parallel",)),
    )(wcat.astype(jnp.bfloat16), rcols.astype(jnp.bfloat16),
      bcat.astype(jnp.float32), hmat)
    g2 = gb2[:, :out_dim, :]
    b2 = gb2[:, out_dim:, :]
    return x_out.reshape(B, in_dim, H, W), g2, b2


def avg_pool(x, k):
    s = lax.reduce_window(x, 0.0, lax.add, (1, 1, k, k), (1, 1, k, k), "VALID")
    return s / float(k * k)


def bilinear_resize(x, oh, ow):
    # F.interpolate(mode='bilinear', align_corners=True)
    B, C, H, W = x.shape
    if oh == 1:
        ys = jnp.zeros((oh,), jnp.float32)
    else:
        ys = jnp.arange(oh, dtype=jnp.float32) * (H - 1) / (oh - 1)
    if ow == 1:
        xs = jnp.zeros((ow,), jnp.float32)
    else:
        xs = jnp.arange(ow, dtype=jnp.float32) * (W - 1) / (ow - 1)
    y0 = jnp.floor(ys).astype(jnp.int32)
    x0 = jnp.floor(xs).astype(jnp.int32)
    y1 = jnp.minimum(y0 + 1, H - 1)
    x1 = jnp.minimum(x0 + 1, W - 1)
    wy = (ys - y0.astype(jnp.float32))[None, None, :, None]
    wx = (xs - x0.astype(jnp.float32))[None, None, None, :]
    Ia = x[:, :, y0][:, :, :, x0]
    Ib = x[:, :, y0][:, :, :, x1]
    Ic = x[:, :, y1][:, :, :, x0]
    Id = x[:, :, y1][:, :, :, x1]
    top = Ia * (1 - wx) + Ib * wx
    bot = Ic * (1 - wx) + Id * wx
    return top * (1 - wy) + bot * wy


# --------------------------------------------------------------------------
# Generator: parameters + forward
# --------------------------------------------------------------------------
def init_generator(key, img_size=(16, 16), input_ch=3):
    base_dim = netG_params["base_dim"]
    max_dim = base_dim * 8
    enc_dec_num = netG_params["enc_dim_num"]

    keys = list(jax.random.split(key, 256))
    kit = iter(keys)

    def conv_p(cout, cin, k):
        w = jax.random.normal(next(kit), (cout, cin, k, k), jnp.float32) * 0.05
        b = jax.random.normal(next(kit), (cout,), jnp.float32) * 0.05
        return {"w": w, "b": b}

    params = {}
    cfg = {}

    params["input_conv"] = conv_p(base_dim, input_ch, 7)

    enc, enc_strides = [], []
    enc_dim_list = [base_dim]
    crr = base_dim
    h_resize, w_resize = img_size
    for _ in range(1, enc_dec_num):
        out_dim = min(crr * 2, max_dim)
        stride = 2 if crr != out_dim else 1
        enc.append(conv_p(out_dim, crr, 3))
        enc_strides.append(stride)
        if stride == 2:
            h_resize //= 2
            w_resize //= 2
        enc_dim_list.append(out_dim)
        crr = out_dim
    params["enc"] = enc
    cfg["enc_strides"] = enc_strides
    cfg["h_resize"] = h_resize
    cfg["w_resize"] = w_resize

    params["style_rho"] = {
        "w": jax.random.normal(next(kit), (2, 3 * 3), jnp.float32) * 0.05,
        "b": jax.random.normal(next(kit), (2,), jnp.float32) * 0.05,
    }

    ref_ch = 3 * input_ch  # style map channels (3 pools * input_ch)
    dec, dec_up = [], []
    dec_dim_list = list(reversed(enc_dim_list))
    for i in range(len(dec_dim_list) - 1):
        in_dim, out_dim = dec_dim_list[i], dec_dim_list[i + 1]
        dec.append({
            "gamma1": conv_p(in_dim, ref_ch, 1),
            "beta1": conv_p(in_dim, ref_ch, 1),
            "conv1": conv_p(out_dim, in_dim, 3),
            "gamma2": conv_p(out_dim, ref_ch, 1),
            "beta2": conv_p(out_dim, ref_ch, 1),
            "conv2": conv_p(out_dim, out_dim, 3),
            "skip": conv_p(out_dim, in_dim, 1),
        })
        # TODO(synk): mirrors the torch code, where `crr_dim` stays at the
        # bottleneck dim when deciding upsampling.
        dec_up.append(crr != out_dim)
    params["dec"] = dec
    cfg["dec_upsample"] = dec_up

    params["out_conv"] = conv_p(3, base_dim, 7)
    return params, cfg


def style_pool(params, cfg, y):
    feats = []
    for k in (3, 5, 7):
        z = avg_pool(y, k)
        z = bilinear_resize(z, cfg["h_resize"], cfg["w_resize"])
        feats.append(z)
    yc = jnp.concatenate(feats, axis=1)                       # (B, 9, hr, wr)
    B, C, Hr, Wr = yc.shape
    HW = Hr * Wr

    # tiny (B,9)@(9,2) + softmax: plain jnp (fused by XLA under jit)
    c = jnp.mean(yc, axis=(2, 3))
    logits = c @ params["style_rho"]["w"].T + params["style_rho"]["b"]
    rho = jax.nn.softmax(logits, axis=1)                      # (B, 2)

    out = pl.pallas_call(
        _style_mix_kernel,
        out_shape=jax.ShapeDtypeStruct((B, C, HW), jnp.float32),
        grid=(B,),
        in_specs=[pl.BlockSpec((None, C, HW), lambda b: (b, 0, 0)),
                  pl.BlockSpec((None, 1, 2), lambda b: (b, 0, 0))],
        out_specs=pl.BlockSpec((None, C, HW), lambda b: (b, 0, 0)),
        compiler_params=pltpu.CompilerParams(dimension_semantics=("parallel",)),
    )(yc.reshape(B, C, HW).astype(jnp.float32),
      rho.reshape(B, 1, 2).astype(jnp.float32))
    return out.reshape(B, C, Hr, Wr)


def up_res_block(h, s, p, upsample):
    B, Cin, H, W = h.shape
    Cout = p["conv1"]["w"].shape[0]
    r = bilinear_resize(s, H, W)                              # (B, 9, H, W)
    # fused: 4x 1x1 SPADE convs on r + SPADE-IN+LReLU of h
    x, g2, b2 = gb_and_spade(r, p, h, Cin, Cout)
    # fused: conv1 + SPADE-IN(gamma2/beta2) + LReLU
    x = conv2d_spade_lrelu(x, p["conv1"], g2, b2)
    # fused: conv2 + 1x1 skip conv on h
    out = conv2d_plus_skip(x, p["conv2"], h, p["skip"])
    if upsample:
        out = jnp.repeat(jnp.repeat(out, 2, axis=2), 2, axis=3)  # nearest x2
    return out


def generator_forward(params, cfg, x, y):
    h = conv2d_plain(x, params["input_conv"], stride=1, pad=3)   # DownBlock(act=None,norm=None)
    s = style_pool(params, cfg, y)
    for p, stride in zip(params["enc"], cfg["enc_strides"]):     # conv+IN+LReLU fused
        h = conv2d_in_lrelu(h, p, stride=stride, pad=1)
    for p, up in zip(params["dec"], cfg["dec_upsample"]):        # UpResBlock(h, ref=s)
        h = up_res_block(h, s, p, up)
    return conv2d_tanh(h, params["out_conv"], stride=1, pad=3)   # Conv2dBlock + tanh fused


if __name__ == "__main__":
    key = jax.random.PRNGKey(0)
    kx, ky, kp = jax.random.split(key, 3)
    img_size = (16, 16)
    x = jax.random.normal(kx, (2, 3, img_size[0], img_size[1]), jnp.float32)
    y = jax.random.normal(ky, (2, 3, img_size[0], img_size[1]), jnp.float32)

    params, cfg = init_generator(kp, img_size=img_size, input_ch=3)
    fwd = jax.jit(lambda a, b: generator_forward(params, cfg, a, b))
    out = jax.block_until_ready(fwd(x, y))
    assert out.shape == (2, 3, img_size[0], img_size[1]), out.shape
    assert bool(jnp.all(jnp.isfinite(out)))
    print("KERNEL_OK")
</pallas_src>

<mosaic_0001>
module attributes {stable_mosaic.version = 11 : i64} {
  func.func @_style_mix_kernel(%arg0: i32, %arg1: memref<1x9x16xf32, #tpu.memory_space<vmem>>, %arg2: memref<1x1x2xf32, #tpu.memory_space<vmem>>, %arg3: memref<1x9x16xf32, #tpu.memory_space<vmem>>) attributes {dimension_semantics = [#tpu.dimension_semantics<parallel>], iteration_bounds = array<i64: 2>, scalar_prefetch = 0 : i64, scratch_operands = 0 : i64, tpu.core_type = #tpu.core_type<tc>, window_params = [{transform_indices = @transform_0, window_bounds = array<i64: 1, 9, 16>}, {transform_indices = @transform_1, window_bounds = array<i64: 1, 1, 2>}, {transform_indices = @transform_2, window_bounds = array<i64: 1, 9, 16>}]} {
    %c0 = arith.constant 0 : index
    %c0_0 = arith.constant 0 : index
    %c0_1 = arith.constant 0 : index
    %0 = vector.load %arg1[%c0, %c0_0, %c0_1] : memref<1x9x16xf32, #tpu.memory_space<vmem>>, vector<1x9x16xf32>
    %1 = vector.shape_cast %0 : vector<1x9x16xf32> to vector<9x16xf32>
    %cst = arith.constant dense<0.000000e+00> : vector<9xf32>
    %2 = vector.multi_reduction <add>, %1, %cst [1] : vector<9x16xf32> to vector<9xf32>
    %3 = vector.shape_cast %2 : vector<9xf32> to vector<9x1xf32>
    %cst_2 = arith.constant 1.600000e+01 : f32
    %4 = vector.broadcast %cst_2 : f32 to vector<9x1xf32>
    %5 = arith.divf %3, %4 : vector<9x1xf32>
    %6 = vector.broadcast %5 : vector<9x1xf32> to vector<9x16xf32>
    %7 = arith.subf %1, %6 : vector<9x16xf32>
    %8 = arith.mulf %7, %7 : vector<9x16xf32>
    %cst_3 = arith.constant dense<0.000000e+00> : vector<9xf32>
    %9 = vector.multi_reduction <add>, %8, %cst_3 [1] : vector<9x16xf32> to vector<9xf32>
    %10 = vector.shape_cast %9 : vector<9xf32> to vector<9x1xf32>
    %cst_4 = arith.constant 1.500000e+01 : f32
    %11 = vector.broadcast %cst_4 : f32 to vector<9x1xf32>
    %12 = arith.divf %10, %11 : vector<9x1xf32>
    %cst_5 = arith.constant 9.99999993E-9 : f32
    %13 = vector.broadcast %cst_5 : f32 to vector<9x1xf32>
    %14 = arith.addf %12, %13 : vector<9x1xf32>
    %15 = math.sqrt %14 : vector<9x1xf32>
    %16 = vector.broadcast %15 : vector<9x1xf32> to vector<9x16xf32>
    %17 = arith.divf %7, %16 : vector<9x16xf32>
    %cst_6 = arith.constant dense<0.000000e+00> : vector<1xf32>
    %18 = vector.multi_reduction <add>, %5, %cst_6 [0] : vector<9x1xf32> to vector<1xf32>
    %19 = vector.shape_cast %18 : vector<1xf32> to vector<1x1xf32>
    %cst_7 = arith.constant 9.000000e+00 : f32
    %20 = vector.broadcast %cst_7 : f32 to vector<1x1xf32>
    %21 = arith.divf %19, %20 : vector<1x1xf32>
    %22 = vector.broadcast %21 : vector<1x1xf32> to vector<9x16xf32>
    %23 = arith.subf %1, %22 : vector<9x16xf32>
    %24 = arith.mulf %23, %23 : vector<9x16xf32>
    %cst_8 = arith.constant dense<0.000000e+00> : vector<9xf32>
    %25 = vector.multi_reduction <add>, %24, %cst_8 [1] : vector<9x16xf32> to vector<9xf32>
    %26 = vector.shape_cast %25 : vector<9xf32> to vector<9x1xf32>
    %cst_9 = arith.constant dense<0.000000e+00> : vector<1xf32>
    %27 = vector.multi_reduction <add>, %26, %cst_9 [0] : vector<9x1xf32> to vector<1xf32>
    %28 = vector.shape_cast %27 : vector<1xf32> to vector<1x1xf32>
    %cst_10 = arith.constant 1.430000e+02 : f32
    %29 = vector.broadcast %cst_10 : f32 to vector<1x1xf32>
    %30 = arith.divf %28, %29 : vector<1x1xf32>
    %cst_11 = arith.constant 9.99999993E-9 : f32
    %31 = vector.broadcast %cst_11 : f32 to vector<1x1xf32>
    %32 = arith.addf %30, %31 : vector<1x1xf32>
    %33 = math.sqrt %32 : vector<1x1xf32>
    %34 = vector.broadcast %33 : vector<1x1xf32> to vector<9x16xf32>
    %35 = arith.divf %23, %34 : vector<9x16xf32>
    %c0_12 = arith.constant 0 : index
    %c0_13 = arith.constant 0 : index
    %c0_14 = arith.constant 0 : index
    %36 = vector.load %arg2[%c0_12, %c0_13, %c0_14] : memref<1x1x2xf32, #tpu.memory_space<vmem>>, vector<1x1x2xf32>
    %37 = vector.shape_cast %36 : vector<1x1x2xf32> to vector<1x2xf32>
    %38 = vector.extract_strided_slice %37 {offsets = [0, 0], sizes = [1, 1], strides = [1, 1]} : vector<1x2xf32> to vector<1x1xf32>
    %39 = vector.broadcast %38 : vector<1x1xf32> to vector<9x16xf32>
    %40 = arith.mulf %39, %17 : vector<9x16xf32>
    %41 = vector.extract_strided_slice %37 {offsets = [0, 1], sizes = [1, 1], strides = [1, 1]} : vector<1x2xf32> to vector<1x1xf32>
    %42 = vector.broadcast %41 : vector<1x1xf32> to vector<9x16xf32>
    %43 = arith.mulf %42, %35 : vector<9x16xf32>
    %44 = arith.addf %40, %43 : vector<9x16xf32>
    %c0_15 = arith.constant 0 : index
    %c0_16 = arith.constant 0 : index
    %c0_17 = arith.constant 0 : index
    %45 = vector.load %arg3[%c0_15, %c0_16, %c0_17] : memref<1x9x16xf32, #tpu.memory_space<vmem>>, vector<1x9x16xf32>
    %46 = vector.shape_cast %45 : vector<1x9x16xf32> to vector<9x16xf32>
    %47 = vector.shape_cast %44 : vector<9x16xf32> to vector<1x9x16xf32>
    tpu.vector_store %arg3[%c0_15, %c0_16, %c0_17], %47 {strides = array<i32>} : memref<1x9x16xf32, #tpu.memory_space<vmem>>, vector<1x9x16xf32>,
    return
  }
  func.func @transform_0(%arg0: i32) -> (i32, i32, i32) {
    %c0_i32 = arith.constant 0 : i32
    %c0_i32_0 = arith.constant 0 : i32
    %c0_i32_1 = arith.constant 0 : i32
    return %arg0, %c0_i32, %c0_i32_0 : i32, i32, i32
  }
  func.func @transform_1(%arg0: i32) -> (i32, i32, i32) {
    %c0_i32 = arith.constant 0 : i32
    %c0_i32_0 = arith.constant 0 : i32
    %c0_i32_1 = arith.constant 0 : i32
    return %arg0, %c0_i32, %c0_i32_0 : i32, i32, i32
  }
  func.func @transform_2(%arg0: i32) -> (i32, i32, i32) {
    %c0_i32 = arith.constant 0 : i32
    %c0_i32_0 = arith.constant 0 : i32
    %c0_i32_1 = arith.constant 0 : i32
    return %arg0, %c0_i32, %c0_i32_0 : i32, i32, i32
  }
}

module attributes {stable_mosaic.version = 11 : i64} {
  func.func @_conv_kernel(%arg0: i32, %arg1: memref<8x152xbf16, #tpu.memory_space<vmem>>, %arg2: memref<1x152x256xbf16, #tpu.memory_space<vmem>>, %arg3: memref<8x1xf32, #tpu.memory_space<vmem>>, %arg4: memref<1x8x256xf32, #tpu.memory_space<vmem>>) attributes {dimension_semantics = [#tpu.dimension_semantics<parallel>], iteration_bounds = array<i64: 2>, scalar_prefetch = 0 : i64, scratch_operands = 0 : i64, tpu.core_type = #tpu.core_type<tc>, window_params = [{pipeline_mode = #tpu.pipeline_mode<synchronous>, transform_indices = @transform_0, window_bounds = array<i64: 8, 152>}, {transform_indices = @transform_1, window_bounds = array<i64: 1, 152, 256>}, {pipeline_mode = #tpu.pipeline_mode<synchronous>, transform_indices = @transform_2, window_bounds = array<i64: 8, 1>}, {transform_indices = @transform_3, window_bounds = array<i64: 1, 8, 256>}]} {
    %c0 = arith.constant 0 : index
    %c0_0 = arith.constant 0 : index
    %0 = vector.load %arg1[%c0, %c0_0] : memref<8x152xbf16, #tpu.memory_space<vmem>>, vector<8x152xbf16>
    %c0_1 = arith.constant 0 : index
    %c0_2 = arith.constant 0 : index
    %c0_3 = arith.constant 0 : index
    %1 = vector.load %arg2[%c0_1, %c0_2, %c0_3] : memref<1x152x256xbf16, #tpu.memory_space<vmem>>, vector<1x152x256xbf16>
    %2 = vector.shape_cast %1 : vector<1x152x256xbf16> to vector<152x256xbf16>
    %cst = arith.constant dense<0.000000e+00> : vector<8x256xf32>
    %3 = tpu.matmul %0, %2, %cst {dimension_numbers = #tpu.dot_dimension_numbers<[1], [0], [0], [1], [0, 0, 1, 1], [], []>} : vector<8x152xbf16>, vector<152x256xbf16>, vector<8x256xf32> -> vector<8x256xf32>
    %c0_4 = arith.constant 0 : index
    %c0_5 = arith.constant 0 : index
    %4 = vector.load %arg3[%c0_4, %c0_5] : memref<8x1xf32, #tpu.memory_space<vmem>>, vector<8x1xf32>
    %5 = vector.broadcast %4 : vector<8x1xf32> to vector<8x256xf32>
    %6 = arith.addf %3, %5 : vector<8x256xf32>
    %c0_6 = arith.constant 0 : index
    %c0_7 = arith.constant 0 : index
    %c0_8 = arith.constant 0 : index
    %7 = vector.load %arg4[%c0_6, %c0_7, %c0_8] : memref<1x8x256xf32, #tpu.memory_space<vmem>>, vector<1x8x256xf32>
    %8 = vector.shape_cast %7 : vector<1x8x256xf32> to vector<8x256xf32>
    %9 = vector.shape_cast %6 : vector<8x256xf32> to vector<1x8x256xf32>
    tpu.vector_store %arg4[%c0_6, %c0_7, %c0_8], %9 {strides = array<i32>} : memref<1x8x256xf32, #tpu.memory_space<vmem>>, vector<1x8x256xf32>,
    return
  }
  func.func @transform_0(%arg0: i32) -> (i32, i32) {
    %c0_i32 = arith.constant 0 : i32
    %c0_i32_0 = arith.constant 0 : i32
    %c0_i32_1 = arith.constant 0 : i32
    return %c0_i32, %c0_i32_0 : i32, i32
  }
  func.func @transform_1(%arg0: i32) -> (i32, i32, i32) {
    %c0_i32 = arith.constant 0 : i32
    %c0_i32_0 = arith.constant 0 : i32
    %c0_i32_1 = arith.constant 0 : i32
    return %arg0, %c0_i32, %c0_i32_0 : i32, i32, i32
  }
  func.func @transform_2(%arg0: i32) -> (i32, i32) {
    %c0_i32 = arith.constant 0 : i32
    %c0_i32_0 = arith.constant 0 : i32
    %c0_i32_1 = arith.constant 0 : i32
    return %c0_i32, %c0_i32_0 : i32, i32
  }
  func.func @transform_3(%arg0: i32) -> (i32, i32, i32) {
    %c0_i32 = arith.constant 0 : i32
    %c0_i32_0 = arith.constant 0 : i32
    %c0_i32_1 = arith.constant 0 : i32
    return %arg0, %c0_i32, %c0_i32_0 : i32, i32, i32
  }
}

module attributes {stable_mosaic.version = 11 : i64} {
  func.func @_conv_in_lrelu_kernel(%arg0: i32, %arg1: memref<16x72xbf16, #tpu.memory_space<vmem>>, %arg2: memref<1x72x64xbf16, #tpu.memory_space<vmem>>, %arg3: memref<16x1xf32, #tpu.memory_space<vmem>>, %arg4: memref<1x16x64xf32, #tpu.memory_space<vmem>>) attributes {dimension_semantics = [#tpu.dimension_semantics<parallel>], iteration_bounds = array<i64: 2>, scalar_prefetch = 0 : i64, scratch_operands = 0 : i64, tpu.core_type = #tpu.core_type<tc>, window_params = [{pipeline_mode = #tpu.pipeline_mode<synchronous>, transform_indices = @transform_0, window_bounds = array<i64: 16, 72>}, {transform_indices = @transform_1, window_bounds = array<i64: 1, 72, 64>}, {pipeline_mode = #tpu.pipeline_mode<synchronous>, transform_indices = @transform_2, window_bounds = array<i64: 16, 1>}, {transform_indices = @transform_3, window_bounds = array<i64: 1, 16, 64>}]} {
    %c0 = arith.constant 0 : index
    %c0_0 = arith.constant 0 : index
    %0 = vector.load %arg1[%c0, %c0_0] : memref<16x72xbf16, #tpu.memory_space<vmem>>, vector<16x72xbf16>
    %c0_1 = arith.constant 0 : index
    %c0_2 = arith.constant 0 : index
    %c0_3 = arith.constant 0 : index
    %1 = vector.load %arg2[%c0_1, %c0_2, %c0_3] : memref<1x72x64xbf16, #tpu.memory_space<vmem>>, vector<1x72x64xbf16>
    %2 = vector.shape_cast %1 : vector<1x72x64xbf16> to vector<72x64xbf16>
    %cst = arith.constant dense<0.000000e+00> : vector<16x64xf32>
    %3 = tpu.matmul %0, %2, %cst {dimension_numbers = #tpu.dot_dimension_numbers<[1], [0], [0], [1], [0, 0, 1, 1], [], []>} : vector<16x72xbf16>, vector<72x64xbf16>, vector<16x64xf32> -> vector<16x64xf32>
    %c0_4 = arith.constant 0 : index
    %c0_5 = arith.constant 0 : index
    %4 = vector.load %arg3[%c0_4, %c0_5] : memref<16x1xf32, #tpu.memory_space<vmem>>, vector<16x1xf32>
    %5 = vector.broadcast %4 : vector<16x1xf32> to vector<16x64xf32>
    %6 = arith.addf %3, %5 : vector<16x64xf32>
    %cst_6 = arith.constant dense<0.000000e+00> : vector<16xf32>
    %7 = vector.multi_reduction <add>, %6, %cst_6 [1] : vector<16x64xf32> to vector<16xf32>
    %8 = vector.shape_cast %7 : vector<16xf32> to vector<16x1xf32>
    %cst_7 = arith.constant 6.400000e+01 : f32
    %9 = vector.broadcast %cst_7 : f32 to vector<16x1xf32>
    %10 = arith.divf %8, %9 : vector<16x1xf32>
    %11 = vector.broadcast %10 : vector<16x1xf32> to vector<16x64xf32>
    %12 = arith.subf %6, %11 : vector<16x64xf32>
    %13 = arith.mulf %12, %12 : vector<16x64xf32>
    %cst_8 = arith.constant dense<0.000000e+00> : vector<16xf32>
    %14 = vector.multi_reduction <add>, %13, %cst_8 [1] : vector<16x64xf32> to vector<16xf32>
    %15 = vector.shape_cast %14 : vector<16xf32> to vector<16x1xf32>
    %cst_9 = arith.constant 6.400000e+01 : f32
    %16 = vector.broadcast %cst_9 : f32 to vector<16x1xf32>
    %17 = arith.divf %15, %16 : vector<16x1xf32>
    %cst_10 = arith.constant 9.99999974E-6 : f32
    %18 = vector.broadcast %cst_10 : f32 to vector<16x1xf32>
    %19 = arith.addf %17, %18 : vector<16x1xf32>
    %20 = math.rsqrt %19 : vector<16x1xf32>
    %21 = vector.broadcast %20 : vector<16x1xf32> to vector<16x64xf32>
    %22 = arith.mulf %12, %21 : vector<16x64xf32>
    %cst_11 = arith.constant 0.000000e+00 : f32
    %23 = vector.broadcast %cst_11 : f32 to vector<16x64xf32>
    %24 = arith.cmpf oge, %22, %23 : vector<16x64xf32>
    %cst_12 = arith.constant 2.000000e-01 : f32
    %25 = vector.broadcast %cst_12 : f32 to vector<16x64xf32>
    %26 = arith.mulf %25, %22 : vector<16x64xf32>
    %27 = arith.select %24, %22, %26 : vector<16x64xi1>, vector<16x64xf32>
    %c0_13 = arith.constant 0 : index
    %c0_14 = arith.constant 0 : index
    %c0_15 = arith.constant 0 : index
    %28 = vector.load %arg4[%c0_13, %c0_14, %c0_15] : memref<1x16x64xf32, #tpu.memory_space<vmem>>, vector<1x16x64xf32>
    %29 = vector.shape_cast %28 : vector<1x16x64xf32> to vector<16x64xf32>
    %30 = vector.shape_cast %27 : vector<16x64xf32> to vector<1x16x64xf32>
    tpu.vector_store %arg4[%c0_13, %c0_14, %c0_15], %30 {strides = array<i32>} : memref<1x16x64xf32, #tpu.memory_space<vmem>>, vector<1x16x64xf32>,
    return
  }
  func.func @transform_0(%arg0: i32) -> (i32, i32) {
    %c0_i32 = arith.constant 0 : i32
    %c0_i32_0 = arith.constant 0 : i32
    %c0_i32_1 = arith.constant 0 : i32
    return %c0_i32, %c0_i32_0 : i32, i32
  }
  func.func @transform_1(%arg0: i32) -> (i32, i32, i32) {
    %c0_i32 = arith.constant 0 : i32
    %c0_i32_0 = arith.constant 0 : i32
    %c0_i32_1 = arith.constant 0 : i32
    return %arg0, %c0_i32, %c0_i32_0 : i32, i32, i32
  }
  func.func @transform_2(%arg0: i32) -> (i32, i32) {
    %c0_i32 = arith.constant 0 : i32
    %c0_i32_0 = arith.constant 0 : i32
    %c0_i32_1 = arith.constant 0 : i32
    return %c0_i32, %c0_i32_0 : i32, i32
  }
  func.func @transform_3(%arg0: i32) -> (i32, i32, i32) {
    %c0_i32 = arith.constant 0 : i32
    %c0_i32_0 = arith.constant 0 : i32
    %c0_i32_1 = arith.constant 0 : i32
    return %arg0, %c0_i32, %c0_i32_0 : i32, i32, i32
  }
}

module attributes {stable_mosaic.version = 11 : i64} {
  func.func @_conv_in_lrelu_kernel(%arg0: i32, %arg1: memref<32x144xbf16, #tpu.memory_space<vmem>>, %arg2: memref<1x144x16xbf16, #tpu.memory_space<vmem>>, %arg3: memref<32x1xf32, #tpu.memory_space<vmem>>, %arg4: memref<1x32x16xf32, #tpu.memory_space<vmem>>) attributes {dimension_semantics = [#tpu.dimension_semantics<parallel>], iteration_bounds = array<i64: 2>, scalar_prefetch = 0 : i64, scratch_operands = 0 : i64, tpu.core_type = #tpu.core_type<tc>, window_params = [{pipeline_mode = #tpu.pipeline_mode<synchronous>, transform_indices = @transform_0, window_bounds = array<i64: 32, 144>}, {transform_indices = @transform_1, window_bounds = array<i64: 1, 144, 16>}, {pipeline_mode = #tpu.pipeline_mode<synchronous>, transform_indices = @transform_2, window_bounds = array<i64: 32, 1>}, {transform_indices = @transform_3, window_bounds = array<i64: 1, 32, 16>}]} {
    %c0 = arith.constant 0 : index
    %c0_0 = arith.constant 0 : index
    %0 = vector.load %arg1[%c0, %c0_0] : memref<32x144xbf16, #tpu.memory_space<vmem>>, vector<32x144xbf16>
    %c0_1 = arith.constant 0 : index
    %c0_2 = arith.constant 0 : index
    %c0_3 = arith.constant 0 : index
    %1 = vector.load %arg2[%c0_1, %c0_2, %c0_3] : memref<1x144x16xbf16, #tpu.memory_space<vmem>>, vector<1x144x16xbf16>
    %2 = vector.shape_cast %1 : vector<1x144x16xbf16> to vector<144x16xbf16>
    %cst = arith.constant dense<0.000000e+00> : vector<32x16xf32>
    %3 = tpu.matmul %0, %2, %cst {dimension_numbers = #tpu.dot_dimension_numbers<[1], [0], [0], [1], [0, 0, 1, 1], [], []>} : vector<32x144xbf16>, vector<144x16xbf16>, vector<32x16xf32> -> vector<32x16xf32>
    %c0_4 = arith.constant 0 : index
    %c0_5 = arith.constant 0 : index
    %4 = vector.load %arg3[%c0_4, %c0_5] : memref<32x1xf32, #tpu.memory_space<vmem>>, vector<32x1xf32>
    %5 = vector.broadcast %4 : vector<32x1xf32> to vector<32x16xf32>
    %6 = arith.addf %3, %5 : vector<32x16xf32>
    %cst_6 = arith.constant dense<0.000000e+00> : vector<32xf32>
    %7 = vector.multi_reduction <add>, %6, %cst_6 [1] : vector<32x16xf32> to vector<32xf32>
    %8 = vector.shape_cast %7 : vector<32xf32> to vector<32x1xf32>
    %cst_7 = arith.constant 1.600000e+01 : f32
    %9 = vector.broadcast %cst_7 : f32 to vector<32x1xf32>
    %10 = arith.divf %8, %9 : vector<32x1xf32>
    %11 = vector.broadcast %10 : vector<32x1xf32> to vector<32x16xf32>
    %12 = arith.subf %6, %11 : vector<32x16xf32>
    %13 = arith.mulf %12, %12 : vector<32x16xf32>
    %cst_8 = arith.constant dense<0.000000e+00> : vector<32xf32>
    %14 = vector.multi_reduction <add>, %13, %cst_8 [1] : vector<32x16xf32> to vector<32xf32>
    %15 = vector.shape_cast %14 : vector<32xf32> to vector<32x1xf32>
    %cst_9 = arith.constant 1.600000e+01 : f32
    %16 = vector.broadcast %cst_9 : f32 to vector<32x1xf32>
    %17 = arith.divf %15, %16 : vector<32x1xf32>
    %cst_10 = arith.constant 9.99999974E-6 : f32
    %18 = vector.broadcast %cst_10 : f32 to vector<32x1xf32>
    %19 = arith.addf %17, %18 : vector<32x1xf32>
    %20 = math.rsqrt %19 : vector<32x1xf32>
    %21 = vector.broadcast %20 : vector<32x1xf32> to vector<32x16xf32>
    %22 = arith.mulf %12, %21 : vector<32x16xf32>
    %cst_11 = arith.constant 0.000000e+00 : f32
    %23 = vector.broadcast %cst_11 : f32 to vector<32x16xf32>
    %24 = arith.cmpf oge, %22, %23 : vector<32x16xf32>
    %cst_12 = arith.constant 2.000000e-01 : f32
    %25 = vector.broadcast %cst_12 : f32 to vector<32x16xf32>
    %26 = arith.mulf %25, %22 : vector<32x16xf32>
    %27 = arith.select %24, %22, %26 : vector<32x16xi1>, vector<32x16xf32>
    %c0_13 = arith.constant 0 : index
    %c0_14 = arith.constant 0 : index
    %c0_15 = arith.constant 0 : index
    %28 = vector.load %arg4[%c0_13, %c0_14, %c0_15] : memref<1x32x16xf32, #tpu.memory_space<vmem>>, vector<1x32x16xf32>
    %29 = vector.shape_cast %28 : vector<1x32x16xf32> to vector<32x16xf32>
    %30 = vector.shape_cast %27 : vector<32x16xf32> to vector<1x32x16xf32>
    tpu.vector_store %arg4[%c0_13, %c0_14, %c0_15], %30 {strides = array<i32>} : memref<1x32x16xf32, #tpu.memory_space<vmem>>, vector<1x32x16xf32>,
    return
  }
  func.func @transform_0(%arg0: i32) -> (i32, i32) {
    %c0_i32 = arith.constant 0 : i32
    %c0_i32_0 = arith.constant 0 : i32
    %c0_i32_1 = arith.constant 0 : i32
    return %c0_i32, %c0_i32_0 : i32, i32
  }
  func.func @transform_1(%arg0: i32) -> (i32, i32, i32) {
    %c0_i32 = arith.constant 0 : i32
    %c0_i32_0 = arith.constant 0 : i32
    %c0_i32_1 = arith.constant 0 : i32
    return %arg0, %c0_i32, %c0_i32_0 : i32, i32, i32
  }
  func.func @transform_2(%arg0: i32) -> (i32, i32) {
    %c0_i32 = arith.constant 0 : i32
    %c0_i32_0 = arith.constant 0 : i32
    %c0_i32_1 = arith.constant 0 : i32
    return %c0_i32, %c0_i32_0 : i32, i32
  }
  func.func @transform_3(%arg0: i32) -> (i32, i32, i32) {
    %c0_i32 = arith.constant 0 : i32
    %c0_i32_0 = arith.constant 0 : i32
    %c0_i32_1 = arith.constant 0 : i32
    return %arg0, %c0_i32, %c0_i32_0 : i32, i32, i32
  }
}

module attributes {stable_mosaic.version = 11 : i64} {
  func.func @_gb_spade_kernel(%arg0: i32, %arg1: memref<96x16xbf16, #tpu.memory_space<vmem>>, %arg2: memref<1x16x16xbf16, #tpu.memory_space<vmem>>, %arg3: memref<96x1xf32, #tpu.memory_space<vmem>>, %arg4: memref<1x32x16xf32, #tpu.memory_space<vmem>>, %arg5: memref<1x32x16xf32, #tpu.memory_space<vmem>>, %arg6: memref<1x32x16xf32, #tpu.memory_space<vmem>>) attributes {dimension_semantics = [#tpu.dimension_semantics<parallel>], iteration_bounds = array<i64: 2>, scalar_prefetch = 0 : i64, scratch_operands = 0 : i64, tpu.core_type = #tpu.core_type<tc>, window_params = [{pipeline_mode = #tpu.pipeline_mode<synchronous>, transform_indices = @transform_0, window_bounds = array<i64: 96, 16>}, {transform_indices = @transform_1, window_bounds = array<i64: 1, 16, 16>}, {pipeline_mode = #tpu.pipeline_mode<synchronous>, transform_indices = @transform_2, window_bounds = array<i64: 96, 1>}, {transform_indices = @transform_3, window_bounds = array<i64: 1, 32, 16>}, {transform_indices = @transform_4, window_bounds = array<i64: 1, 32, 16>}, {transform_indices = @transform_5, window_bounds = array<i64: 1, 32, 16>}]} {
    %c0 = arith.constant 0 : index
    %c0_0 = arith.constant 0 : index
    %0 = vector.load %arg1[%c0, %c0_0] : memref<96x16xbf16, #tpu.memory_space<vmem>>, vector<96x16xbf16>
    %c0_1 = arith.constant 0 : index
    %c0_2 = arith.constant 0 : index
    %c0_3 = arith.constant 0 : index
    %1 = vector.load %arg2[%c0_1, %c0_2, %c0_3] : memref<1x16x16xbf16, #tpu.memory_space<vmem>>, vector<1x16x16xbf16>
    %2 = vector.shape_cast %1 : vector<1x16x16xbf16> to vector<16x16xbf16>
    %cst = arith.constant dense<0.000000e+00> : vector<96x16xf32>
    %3 = tpu.matmul %0, %2, %cst {dimension_numbers = #tpu.dot_dimension_numbers<[1], [0], [0], [1], [0, 0, 1, 1], [], []>} : vector<96x16xbf16>, vector<16x16xbf16>, vector<96x16xf32> -> vector<96x16xf32>
    %c0_4 = arith.constant 0 : index
    %c0_5 = arith.constant 0 : index
    %4 = vector.load %arg3[%c0_4, %c0_5] : memref<96x1xf32, #tpu.memory_space<vmem>>, vector<96x1xf32>
    %5 = vector.broadcast %4 : vector<96x1xf32> to vector<96x16xf32>
    %6 = arith.addf %3, %5 : vector<96x16xf32>
    %7 = vector.extract_strided_slice %6 {offsets = [0, 0], sizes = [32, 16], strides = [1, 1]} : vector<96x16xf32> to vector<32x16xf32>
    %8 = vector.extract_strided_slice %6 {offsets = [32, 0], sizes = [32, 16], strides = [1, 1]} : vector<96x16xf32> to vector<32x16xf32>
    %c0_6 = arith.constant 0 : index
    %c0_7 = arith.constant 0 : index
    %c0_8 = arith.constant 0 : index
    %9 = vector.load %arg4[%c0_6, %c0_7, %c0_8] : memref<1x32x16xf32, #tpu.memory_space<vmem>>, vector<1x32x16xf32>
    %10 = vector.shape_cast %9 : vector<1x32x16xf32> to vector<32x16xf32>
    %cst_9 = arith.constant dense<0.000000e+00> : vector<32xf32>
    %11 = vector.multi_reduction <add>, %10, %cst_9 [1] : vector<32x16xf32> to vector<32xf32>
    %12 = vector.shape_cast %11 : vector<32xf32> to vector<32x1xf32>
    %cst_10 = arith.constant 1.600000e+01 : f32
    %13 = vector.broadcast %cst_10 : f32 to vector<32x1xf32>
    %14 = arith.divf %12, %13 : vector<32x1xf32>
    %15 = vector.broadcast %14 : vector<32x1xf32> to vector<32x16xf32>
    %16 = arith.subf %10, %15 : vector<32x16xf32>
    %17 = arith.mulf %16, %16 : vector<32x16xf32>
    %cst_11 = arith.constant dense<0.000000e+00> : vector<32xf32>
    %18 = vector.multi_reduction <add>, %17, %cst_11 [1] : vector<32x16xf32> to vector<32xf32>
    %19 = vector.shape_cast %18 : vector<32xf32> to vector<32x1xf32>
    %cst_12 = arith.constant 1.600000e+01 : f32
    %20 = vector.broadcast %cst_12 : f32 to vector<32x1xf32>
    %21 = arith.divf %19, %20 : vector<32x1xf32>
    %cst_13 = arith.constant 9.99999974E-6 : f32
    %22 = vector.broadcast %cst_13 : f32 to vector<32x1xf32>
    %23 = arith.addf %21, %22 : vector<32x1xf32>
    %24 = math.rsqrt %23 : vector<32x1xf32>
    %25 = vector.broadcast %24 : vector<32x1xf32> to vector<32x16xf32>
    %26 = arith.mulf %16, %25 : vector<32x16xf32>
    %cst_14 = arith.constant 1.000000e+00 : f32
    %27 = vector.broadcast %cst_14 : f32 to vector<32x16xf32>
    %28 = arith.addf %27, %7 : vector<32x16xf32>
    %29 = arith.mulf %26, %28 : vector<32x16xf32>
    %30 = arith.addf %29, %8 : vector<32x16xf32>
    %cst_15 = arith.constant 0.000000e+00 : f32
    %31 = vector.broadcast %cst_15 : f32 to vector<32x16xf32>
    %32 = arith.cmpf oge, %30, %31 : vector<32x16xf32>
    %cst_16 = arith.constant 2.000000e-01 : f32
    %33 = vector.broadcast %cst_16 : f32 to vector<32x16xf32>
    %34 = arith.mulf %33, %30 : vector<32x16xf32>
    %35 = arith.select %32, %30, %34 : vector<32x16xi1>, vector<32x16xf32>
    %c0_17 = arith.constant 0 : index
    %c0_18 = arith.constant 0 : index
    %c0_19 = arith.constant 0 : index
    %36 = vector.load %arg5[%c0_17, %c0_18, %c0_19] : memref<1x32x16xf32, #tpu.memory_space<vmem>>, vector<1x32x16xf32>
    %37 = vector.shape_cast %36 : vector<1x32x16xf32> to vector<32x16xf32>
    %38 = vector.shape_cast %35 : vector<32x16xf32> to vector<1x32x16xf32>
    tpu.vector_store %arg5[%c0_17, %c0_18, %c0_19], %38 {strides = array<i32>} : memref<1x32x16xf32, #tpu.memory_space<vmem>>, vector<1x32x16xf32>,
    %39 = vector.extract_strided_slice %6 {offsets = [64, 0], sizes = [32, 16], strides = [1, 1]} : vector<96x16xf32> to vector<32x16xf32>
    %c0_20 = arith.constant 0 : index
    %c0_21 = arith.constant 0 : index
    %c0_22 = arith.constant 0 : index
    %40 = vector.load %arg6[%c0_20, %c0_21, %c0_22] : memref<1x32x16xf32, #tpu.memory_space<vmem>>, vector<1x32x16xf32>
    %41 = vector.shape_cast %40 : vector<1x32x16xf32> to vector<32x16xf32>
    %42 = vector.shape_cast %39 : vector<32x16xf32> to vector<1x32x16xf32>
    tpu.vector_store %arg6[%c0_20, %c0_21, %c0_22], %42 {strides = array<i32>} : memref<1x32x16xf32, #tpu.memory_space<vmem>>, vector<1x32x16xf32>,
    return
  }
  func.func @transform_0(%arg0: i32) -> (i32, i32) {
    %c0_i32 = arith.constant 0 : i32
    %c0_i32_0 = arith.constant 0 : i32
    %c0_i32_1 = arith.constant 0 : i32
    return %c0_i32, %c0_i32_0 : i32, i32
  }
  func.func @transform_1(%arg0: i32) -> (i32, i32, i32) {
    %c0_i32 = arith.constant 0 : i32
    %c0_i32_0 = arith.constant 0 : i32
    %c0_i32_1 = arith.constant 0 : i32
    return %arg0, %c0_i32, %c0_i32_0 : i32, i32, i32
  }
  func.func @transform_2(%arg0: i32) -> (i32, i32) {
    %c0_i32 = arith.constant 0 : i32
    %c0_i32_0 = arith.constant 0 : i32
    %c0_i32_1 = arith.constant 0 : i32
    return %c0_i32, %c0_i32_0 : i32, i32
  }
  func.func @transform_3(%arg0: i32) -> (i32, i32, i32) {
    %c0_i32 = arith.constant 0 : i32
    %c0_i32_0 = arith.constant 0 : i32
    %c0_i32_1 = arith.constant 0 : i32
    return %arg0, %c0_i32, %c0_i32_0 : i32, i32, i32
  }
  func.func @transform_4(%arg0: i32) -> (i32, i32, i32) {
    %c0_i32 = arith.constant 0 : i32
    %c0_i32_0 = arith.constant 0 : i32
    %c0_i32_1 = arith.constant 0 : i32
    return %arg0, %c0_i32, %c0_i32_0 : i32, i32, i32
  }
  func.func @transform_5(%arg0: i32) -> (i32, i32, i32) {
    %c0_i32 = arith.constant 0 : i32
    %c0_i32_0 = arith.constant 0 : i32
    %c0_i32_1 = arith.constant 0 : i32
    return %arg0, %c0_i32, %c0_i32_0 : i32, i32, i32
  }
}

module attributes {stable_mosaic.version = 11 : i64} {
  func.func @_conv_spade_lrelu_kernel(%arg0: i32, %arg1: memref<16x288xbf16, #tpu.memory_space<vmem>>, %arg2: memref<1x288x16xbf16, #tpu.memory_space<vmem>>, %arg3: memref<16x1xf32, #tpu.memory_space<vmem>>, %arg4: memref<1x16x16xf32, #tpu.memory_space<vmem>>, %arg5: memref<1x16x16xf32, #tpu.memory_space<vmem>>, %arg6: memref<1x16x16xf32, #tpu.memory_space<vmem>>) attributes {dimension_semantics = [#tpu.dimension_semantics<parallel>], iteration_bounds = array<i64: 2>, scalar_prefetch = 0 : i64, scratch_operands = 0 : i64, tpu.core_type = #tpu.core_type<tc>, window_params = [{pipeline_mode = #tpu.pipeline_mode<synchronous>, transform_indices = @transform_0, window_bounds = array<i64: 16, 288>}, {transform_indices = @transform_1, window_bounds = array<i64: 1, 288, 16>}, {pipeline_mode = #tpu.pipeline_mode<synchronous>, transform_indices = @transform_2, window_bounds = array<i64: 16, 1>}, {transform_indices = @transform_3, window_bounds = array<i64: 1, 16, 16>}, {transform_indices = @transform_4, window_bounds = array<i64: 1, 16, 16>}, {transform_indices = @transform_5, window_bounds = array<i64: 1, 16, 16>}]} {
    %c0 = arith.constant 0 : index
    %c0_0 = arith.constant 0 : index
    %0 = vector.load %arg1[%c0, %c0_0] : memref<16x288xbf16, #tpu.memory_space<vmem>>, vector<16x288xbf16>
    %c0_1 = arith.constant 0 : index
    %c0_2 = arith.constant 0 : index
    %c0_3 = arith.constant 0 : index
    %1 = vector.load %arg2[%c0_1, %c0_2, %c0_3] : memref<1x288x16xbf16, #tpu.memory_space<vmem>>, vector<1x288x16xbf16>
    %2 = vector.shape_cast %1 : vector<1x288x16xbf16> to vector<288x16xbf16>
    %cst = arith.constant dense<0.000000e+00> : vector<16x16xf32>
    %3 = tpu.matmul %0, %2, %cst {dimension_numbers = #tpu.dot_dimension_numbers<[1], [0], [0], [1], [0, 0, 1, 1], [], []>} : vector<16x288xbf16>, vector<288x16xbf16>, vector<16x16xf32> -> vector<16x16xf32>
    %c0_4 = arith.constant 0 : index
    %c0_5 = arith.constant 0 : index
    %4 = vector.load %arg3[%c0_4, %c0_5] : memref<16x1xf32, #tpu.memory_space<vmem>>, vector<16x1xf32>
    %5 = vector.broadcast %4 : vector<16x1xf32> to vector<16x16xf32>
    %6 = arith.addf %3, %5 : vector<16x16xf32>
    %cst_6 = arith.constant dense<0.000000e+00> : vector<16xf32>
    %7 = vector.multi_reduction <add>, %6, %cst_6 [1] : vector<16x16xf32> to vector<16xf32>
    %8 = vector.shape_cast %7 : vector<16xf32> to vector<16x1xf32>
    %cst_7 = arith.constant 1.600000e+01 : f32
    %9 = vector.broadcast %cst_7 : f32 to vector<16x1xf32>
    %10 = arith.divf %8, %9 : vector<16x1xf32>
    %11 = vector.broadcast %10 : vector<16x1xf32> to vector<16x16xf32>
    %12 = arith.subf %6, %11 : vector<16x16xf32>
    %13 = arith.mulf %12, %12 : vector<16x16xf32>
    %cst_8 = arith.constant dense<0.000000e+00> : vector<16xf32>
    %14 = vector.multi_reduction <add>, %13, %cst_8 [1] : vector<16x16xf32> to vector<16xf32>
    %15 = vector.shape_cast %14 : vector<16xf32> to vector<16x1xf32>
    %cst_9 = arith.constant 1.600000e+01 : f32
    %16 = vector.broadcast %cst_9 : f32 to vector<16x1xf32>
    %17 = arith.divf %15, %16 : vector<16x1xf32>
    %cst_10 = arith.constant 9.99999974E-6 : f32
    %18 = vector.broadcast %cst_10 : f32 to vector<16x1xf32>
    %19 = arith.addf %17, %18 : vector<16x1xf32>
    %20 = math.rsqrt %19 : vector<16x1xf32>
    %21 = vector.broadcast %20 : vector<16x1xf32> to vector<16x16xf32>
    %22 = arith.mulf %12, %21 : vector<16x16xf32>
    %c0_11 = arith.constant 0 : index
    %c0_12 = arith.constant 0 : index
    %c0_13 = arith.constant 0 : index
    %23 = vector.load %arg4[%c0_11, %c0_12, %c0_13] : memref<1x16x16xf32, #tpu.memory_space<vmem>>, vector<1x16x16xf32>
    %24 = vector.shape_cast %23 : vector<1x16x16xf32> to vector<16x16xf32>
    %cst_14 = arith.constant 1.000000e+00 : f32
    %25 = vector.broadcast %cst_14 : f32 to vector<16x16xf32>
    %26 = arith.addf %25, %24 : vector<16x16xf32>
    %27 = arith.mulf %22, %26 : vector<16x16xf32>
    %c0_15 = arith.constant 0 : index
    %c0_16 = arith.constant 0 : index
    %c0_17 = arith.constant 0 : index
    %28 = vector.load %arg5[%c0_15, %c0_16, %c0_17] : memref<1x16x16xf32, #tpu.memory_space<vmem>>, vector<1x16x16xf32>
    %29 = vector.shape_cast %28 : vector<1x16x16xf32> to vector<16x16xf32>
    %30 = arith.addf %27, %29 : vector<16x16xf32>
    %cst_18 = arith.constant 0.000000e+00 : f32
    %31 = vector.broadcast %cst_18 : f32 to vector<16x16xf32>
    %32 = arith.cmpf oge, %30, %31 : vector<16x16xf32>
    %cst_19 = arith.constant 2.000000e-01 : f32
    %33 = vector.broadcast %cst_19 : f32 to vector<16x16xf32>
    %34 = arith.mulf %33, %30 : vector<16x16xf32>
    %35 = arith.select %32, %30, %34 : vector<16x16xi1>, vector<16x16xf32>
    %c0_20 = arith.constant 0 : index
    %c0_21 = arith.constant 0 : index
    %c0_22 = arith.constant 0 : index
    %36 = vector.load %arg6[%c0_20, %c0_21, %c0_22] : memref<1x16x16xf32, #tpu.memory_space<vmem>>, vector<1x16x16xf32>
    %37 = vector.shape_cast %36 : vector<1x16x16xf32> to vector<16x16xf32>
    %38 = vector.shape_cast %35 : vector<16x16xf32> to vector<1x16x16xf32>
    tpu.vector_store %arg6[%c0_20, %c0_21, %c0_22], %38 {strides = array<i32>} : memref<1x16x16xf32, #tpu.memory_space<vmem>>, vector<1x16x16xf32>,
    return
  }
  func.func @transform_0(%arg0: i32) -> (i32, i32) {
    %c0_i32 = arith.constant 0 : i32
    %c0_i32_0 = arith.constant 0 : i32
    %c0_i32_1 = arith.constant 0 : i32
    return %c0_i32, %c0_i32_0 : i32, i32
  }
  func.func @transform_1(%arg0: i32) -> (i32, i32, i32) {
    %c0_i32 = arith.constant 0 : i32
    %c0_i32_0 = arith.constant 0 : i32
    %c0_i32_1 = arith.constant 0 : i32
    return %arg0, %c0_i32, %c0_i32_0 : i32, i32, i32
  }
  func.func @transform_2(%arg0: i32) -> (i32, i32) {
    %c0_i32 = arith.constant 0 : i32
    %c0_i32_0 = arith.constant 0 : i32
    %c0_i32_1 = arith.constant 0 : i32
    return %c0_i32, %c0_i32_0 : i32, i32
  }
  func.func @transform_3(%arg0: i32) -> (i32, i32, i32) {
    %c0_i32 = arith.constant 0 : i32
    %c0_i32_0 = arith.constant 0 : i32
    %c0_i32_1 = arith.constant 0 : i32
    return %arg0, %c0_i32, %c0_i32_0 : i32, i32, i32
  }
  func.func @transform_4(%arg0: i32) -> (i32, i32, i32) {
    %c0_i32 = arith.constant 0 : i32
    %c0_i32_0 = arith.constant 0 : i32
    %c0_i32_1 = arith.constant 0 : i32
    return %arg0, %c0_i32, %c0_i32_0 : i32, i32, i32
  }
  func.func @transform_5(%arg0: i32) -> (i32, i32, i32) {
    %c0_i32 = arith.constant 0 : i32
    %c0_i32_0 = arith.constant 0 : i32
    %c0_i32_1 = arith.constant 0 : i32
    return %arg0, %c0_i32, %c0_i32_0 : i32, i32, i32
  }
}

module attributes {stable_mosaic.version = 11 : i64} {
  func.func @_conv2_skip_kernel(%arg0: i32, %arg1: memref<16x144xbf16, #tpu.memory_space<vmem>>, %arg2: memref<1x144x16xbf16, #tpu.memory_space<vmem>>, %arg3: memref<16x1xf32, #tpu.memory_space<vmem>>, %arg4: memref<16x32xbf16, #tpu.memory_space<vmem>>, %arg5: memref<1x32x16xbf16, #tpu.memory_space<vmem>>, %arg6: memref<16x1xf32, #tpu.memory_space<vmem>>, %arg7: memref<1x16x16xf32, #tpu.memory_space<vmem>>) attributes {dimension_semantics = [#tpu.dimension_semantics<parallel>], iteration_bounds = array<i64: 2>, scalar_prefetch = 0 : i64, scratch_operands = 0 : i64, tpu.core_type = #tpu.core_type<tc>, window_params = [{pipeline_mode = #tpu.pipeline_mode<synchronous>, transform_indices = @transform_0, window_bounds = array<i64: 16, 144>}, {transform_indices = @transform_1, window_bounds = array<i64: 1, 144, 16>}, {pipeline_mode = #tpu.pipeline_mode<synchronous>, transform_indices = @transform_2, window_bounds = array<i64: 16, 1>}, {pipeline_mode = #tpu.pipeline_mode<synchronous>, transform_indices = @transform_3, window_bounds = array<i64: 16, 32>}, {transform_indices = @transform_4, window_bounds = array<i64: 1, 32, 16>}, {pipeline_mode = #tpu.pipeline_mode<synchronous>, transform_indices = @transform_5, window_bounds = array<i64: 16, 1>}, {transform_indices = @transform_6, window_bounds = array<i64: 1, 16, 16>}]} {
    %c0 = arith.constant 0 : index
    %c0_0 = arith.constant 0 : index
    %0 = vector.load %arg1[%c0, %c0_0] : memref<16x144xbf16, #tpu.memory_space<vmem>>, vector<16x144xbf16>
    %c0_1 = arith.constant 0 : index
    %c0_2 = arith.constant 0 : index
    %c0_3 = arith.constant 0 : index
    %1 = vector.load %arg2[%c0_1, %c0_2, %c0_3] : memref<1x144x16xbf16, #tpu.memory_space<vmem>>, vector<1x144x16xbf16>
    %2 = vector.shape_cast %1 : vector<1x144x16xbf16> to vector<144x16xbf16>
    %cst = arith.constant dense<0.000000e+00> : vector<16x16xf32>
    %3 = tpu.matmul %0, %2, %cst {dimension_numbers = #tpu.dot_dimension_numbers<[1], [0], [0], [1], [0, 0, 1, 1], [], []>} : vector<16x144xbf16>, vector<144x16xbf16>, vector<16x16xf32> -> vector<16x16xf32>
    %c0_4 = arith.constant 0 : index
    %c0_5 = arith.constant 0 : index
    %4 = vector.load %arg3[%c0_4, %c0_5] : memref<16x1xf32, #tpu.memory_space<vmem>>, vector<16x1xf32>
    %5 = vector.broadcast %4 : vector<16x1xf32> to vector<16x16xf32>
    %6 = arith.addf %3, %5 : vector<16x16xf32>
    %c0_6 = arith.constant 0 : index
    %c0_7 = arith.constant 0 : index
    %7 = vector.load %arg4[%c0_6, %c0_7] : memref<16x32xbf16, #tpu.memory_space<vmem>>, vector<16x32xbf16>
    %c0_8 = arith.constant 0 : index
    %c0_9 = arith.constant 0 : index
    %c0_10 = arith.constant 0 : index
    %8 = vector.load %arg5[%c0_8, %c0_9, %c0_10] : memref<1x32x16xbf16, #tpu.memory_space<vmem>>, vector<1x32x16xbf16>
    %9 = vector.shape_cast %8 : vector<1x32x16xbf16> to vector<32x16xbf16>
    %cst_11 = arith.constant dense<0.000000e+00> : vector<16x16xf32>
    %10 = tpu.matmul %7, %9, %cst_11 {dimension_numbers = #tpu.dot_dimension_numbers<[1], [0], [0], [1], [0, 0, 1, 1], [], []>} : vector<16x32xbf16>, vector<32x16xbf16>, vector<16x16xf32> -> vector<16x16xf32>
    %11 = arith.addf %6, %10 : vector<16x16xf32>
    %c0_12 = arith.constant 0 : index
    %c0_13 = arith.constant 0 : index
    %12 = vector.load %arg6[%c0_12, %c0_13] : memref<16x1xf32, #tpu.memory_space<vmem>>, vector<16x1xf32>
    %13 = vector.broadcast %12 : vector<16x1xf32> to vector<16x16xf32>
    %14 = arith.addf %11, %13 : vector<16x16xf32>
    %c0_14 = arith.constant 0 : index
    %c0_15 = arith.constant 0 : index
    %c0_16 = arith.constant 0 : index
    %15 = vector.load %arg7[%c0_14, %c0_15, %c0_16] : memref<1x16x16xf32, #tpu.memory_space<vmem>>, vector<1x16x16xf32>
    %16 = vector.shape_cast %15 : vector<1x16x16xf32> to vector<16x16xf32>
    %17 = vector.shape_cast %14 : vector<16x16xf32> to vector<1x16x16xf32>
    tpu.vector_store %arg7[%c0_14, %c0_15, %c0_16], %17 {strides = array<i32>} : memref<1x16x16xf32, #tpu.memory_space<vmem>>, vector<1x16x16xf32>,
    return
  }
  func.func @transform_0(%arg0: i32) -> (i32, i32) {
    %c0_i32 = arith.constant 0 : i32
    %c0_i32_0 = arith.constant 0 : i32
    %c0_i32_1 = arith.constant 0 : i32
    return %c0_i32, %c0_i32_0 : i32, i32
  }
  func.func @transform_1(%arg0: i32) -> (i32, i32, i32) {
    %c0_i32 = arith.constant 0 : i32
    %c0_i32_0 = arith.constant 0 : i32
    %c0_i32_1 = arith.constant 0 : i32
    return %arg0, %c0_i32, %c0_i32_0 : i32, i32, i32
  }
  func.func @transform_2(%arg0: i32) -> (i32, i32) {
    %c0_i32 = arith.constant 0 : i32
    %c0_i32_0 = arith.constant 0 : i32
    %c0_i32_1 = arith.constant 0 : i32
    return %c0_i32, %c0_i32_0 : i32, i32
  }
  func.func @transform_3(%arg0: i32) -> (i32, i32) {
    %c0_i32 = arith.constant 0 : i32
    %c0_i32_0 = arith.constant 0 : i32
    %c0_i32_1 = arith.constant 0 : i32
    return %c0_i32, %c0_i32_0 : i32, i32
  }
  func.func @transform_4(%arg0: i32) -> (i32, i32, i32) {
    %c0_i32 = arith.constant 0 : i32
    %c0_i32_0 = arith.constant 0 : i32
    %c0_i32_1 = arith.constant 0 : i32
    return %arg0, %c0_i32, %c0_i32_0 : i32, i32, i32
  }
  func.func @transform_5(%arg0: i32) -> (i32, i32) {
    %c0_i32 = arith.constant 0 : i32
    %c0_i32_0 = arith.constant 0 : i32
    %c0_i32_1 = arith.constant 0 : i32
    return %c0_i32, %c0_i32_0 : i32, i32
  }
  func.func @transform_6(%arg0: i32) -> (i32, i32, i32) {
    %c0_i32 = arith.constant 0 : i32
    %c0_i32_0 = arith.constant 0 : i32
    %c0_i32_1 = arith.constant 0 : i32
    return %arg0, %c0_i32, %c0_i32_0 : i32, i32, i32
  }
}

module attributes {stable_mosaic.version = 11 : i64} {
  func.func @_gb_spade_kernel(%arg0: i32, %arg1: memref<48x16xbf16, #tpu.memory_space<vmem>>, %arg2: memref<1x16x64xbf16, #tpu.memory_space<vmem>>, %arg3: memref<48x1xf32, #tpu.memory_space<vmem>>, %arg4: memref<1x16x64xf32, #tpu.memory_space<vmem>>, %arg5: memref<1x16x64xf32, #tpu.memory_space<vmem>>, %arg6: memref<1x16x64xf32, #tpu.memory_space<vmem>>) attributes {dimension_semantics = [#tpu.dimension_semantics<parallel>], iteration_bounds = array<i64: 2>, scalar_prefetch = 0 : i64, scratch_operands = 0 : i64, tpu.core_type = #tpu.core_type<tc>, window_params = [{pipeline_mode = #tpu.pipeline_mode<synchronous>, transform_indices = @transform_0, window_bounds = array<i64: 48, 16>}, {transform_indices = @transform_1, window_bounds = array<i64: 1, 16, 64>}, {pipeline_mode = #tpu.pipeline_mode<synchronous>, transform_indices = @transform_2, window_bounds = array<i64: 48, 1>}, {transform_indices = @transform_3, window_bounds = array<i64: 1, 16, 64>}, {transform_indices = @transform_4, window_bounds = array<i64: 1, 16, 64>}, {transform_indices = @transform_5, window_bounds = array<i64: 1, 16, 64>}]} {
    %c0 = arith.constant 0 : index
    %c0_0 = arith.constant 0 : index
    %0 = vector.load %arg1[%c0, %c0_0] : memref<48x16xbf16, #tpu.memory_space<vmem>>, vector<48x16xbf16>
    %c0_1 = arith.constant 0 : index
    %c0_2 = arith.constant 0 : index
    %c0_3 = arith.constant 0 : index
    %1 = vector.load %arg2[%c0_1, %c0_2, %c0_3] : memref<1x16x64xbf16, #tpu.memory_space<vmem>>, vector<1x16x64xbf16>
    %2 = vector.shape_cast %1 : vector<1x16x64xbf16> to vector<16x64xbf16>
    %cst = arith.constant dense<0.000000e+00> : vector<48x64xf32>
    %3 = tpu.matmul %0, %2, %cst {dimension_numbers = #tpu.dot_dimension_numbers<[1], [0], [0], [1], [0, 0, 1, 1], [], []>} : vector<48x16xbf16>, vector<16x64xbf16>, vector<48x64xf32> -> vector<48x64xf32>
    %c0_4 = arith.constant 0 : index
    %c0_5 = arith.constant 0 : index
    %4 = vector.load %arg3[%c0_4, %c0_5] : memref<48x1xf32, #tpu.memory_space<vmem>>, vector<48x1xf32>
    %5 = vector.broadcast %4 : vector<48x1xf32> to vector<48x64xf32>
    %6 = arith.addf %3, %5 : vector<48x64xf32>
    %7 = vector.extract_strided_slice %6 {offsets = [0, 0], sizes = [16, 64], strides = [1, 1]} : vector<48x64xf32> to vector<16x64xf32>
    %8 = vector.extract_strided_slice %6 {offsets = [16, 0], sizes = [16, 64], strides = [1, 1]} : vector<48x64xf32> to vector<16x64xf32>
    %c0_6 = arith.constant 0 : index
    %c0_7 = arith.constant 0 : index
    %c0_8 = arith.constant 0 : index
    %9 = vector.load %arg4[%c0_6, %c0_7, %c0_8] : memref<1x16x64xf32, #tpu.memory_space<vmem>>, vector<1x16x64xf32>
    %10 = vector.shape_cast %9 : vector<1x16x64xf32> to vector<16x64xf32>
    %cst_9 = arith.constant dense<0.000000e+00> : vector<16xf32>
    %11 = vector.multi_reduction <add>, %10, %cst_9 [1] : vector<16x64xf32> to vector<16xf32>
    %12 = vector.shape_cast %11 : vector<16xf32> to vector<16x1xf32>
    %cst_10 = arith.constant 6.400000e+01 : f32
    %13 = vector.broadcast %cst_10 : f32 to vector<16x1xf32>
    %14 = arith.divf %12, %13 : vector<16x1xf32>
    %15 = vector.broadcast %14 : vector<16x1xf32> to vector<16x64xf32>
    %16 = arith.subf %10, %15 : vector<16x64xf32>
    %17 = arith.mulf %16, %16 : vector<16x64xf32>
    %cst_11 = arith.constant dense<0.000000e+00> : vector<16xf32>
    %18 = vector.multi_reduction <add>, %17, %cst_11 [1] : vector<16x64xf32> to vector<16xf32>
    %19 = vector.shape_cast %18 : vector<16xf32> to vector<16x1xf32>
    %cst_12 = arith.constant 6.400000e+01 : f32
    %20 = vector.broadcast %cst_12 : f32 to vector<16x1xf32>
    %21 = arith.divf %19, %20 : vector<16x1xf32>
    %cst_13 = arith.constant 9.99999974E-6 : f32
    %22 = vector.broadcast %cst_13 : f32 to vector<16x1xf32>
    %23 = arith.addf %21, %22 : vector<16x1xf32>
    %24 = math.rsqrt %23 : vector<16x1xf32>
    %25 = vector.broadcast %24 : vector<16x1xf32> to vector<16x64xf32>
    %26 = arith.mulf %16, %25 : vector<16x64xf32>
    %cst_14 = arith.constant 1.000000e+00 : f32
    %27 = vector.broadcast %cst_14 : f32 to vector<16x64xf32>
    %28 = arith.addf %27, %7 : vector<16x64xf32>
    %29 = arith.mulf %26, %28 : vector<16x64xf32>
    %30 = arith.addf %29, %8 : vector<16x64xf32>
    %cst_15 = arith.constant 0.000000e+00 : f32
    %31 = vector.broadcast %cst_15 : f32 to vector<16x64xf32>
    %32 = arith.cmpf oge, %30, %31 : vector<16x64xf32>
    %cst_16 = arith.constant 2.000000e-01 : f32
    %33 = vector.broadcast %cst_16 : f32 to vector<16x64xf32>
    %34 = arith.mulf %33, %30 : vector<16x64xf32>
    %35 = arith.select %32, %30, %34 : vector<16x64xi1>, vector<16x64xf32>
    %c0_17 = arith.constant 0 : index
    %c0_18 = arith.constant 0 : index
    %c0_19 = arith.constant 0 : index
    %36 = vector.load %arg5[%c0_17, %c0_18, %c0_19] : memref<1x16x64xf32, #tpu.memory_space<vmem>>, vector<1x16x64xf32>
    %37 = vector.shape_cast %36 : vector<1x16x64xf32> to vector<16x64xf32>
    %38 = vector.shape_cast %35 : vector<16x64xf32> to vector<1x16x64xf32>
    tpu.vector_store %arg5[%c0_17, %c0_18, %c0_19], %38 {strides = array<i32>} : memref<1x16x64xf32, #tpu.memory_space<vmem>>, vector<1x16x64xf32>,
    %39 = vector.extract_strided_slice %6 {offsets = [32, 0], sizes = [16, 64], strides = [1, 1]} : vector<48x64xf32> to vector<16x64xf32>
    %c0_20 = arith.constant 0 : index
    %c0_21 = arith.constant 0 : index
    %c0_22 = arith.constant 0 : index
    %40 = vector.load %arg6[%c0_20, %c0_21, %c0_22] : memref<1x16x64xf32, #tpu.memory_space<vmem>>, vector<1x16x64xf32>
    %41 = vector.shape_cast %40 : vector<1x16x64xf32> to vector<16x64xf32>
    %42 = vector.shape_cast %39 : vector<16x64xf32> to vector<1x16x64xf32>
    tpu.vector_store %arg6[%c0_20, %c0_21, %c0_22], %42 {strides = array<i32>} : memref<1x16x64xf32, #tpu.memory_space<vmem>>, vector<1x16x64xf32>,
    return
  }
  func.func @transform_0(%arg0: i32) -> (i32, i32) {
    %c0_i32 = arith.constant 0 : i32
    %c0_i32_0 = arith.constant 0 : i32
    %c0_i32_1 = arith.constant 0 : i32
    return %c0_i32, %c0_i32_0 : i32, i32
  }
  func.func @transform_1(%arg0: i32) -> (i32, i32, i32) {
    %c0_i32 = arith.constant 0 : i32
    %c0_i32_0 = arith.constant 0 : i32
    %c0_i32_1 = arith.constant 0 : i32
    return %arg0, %c0_i32, %c0_i32_0 : i32, i32, i32
  }
  func.func @transform_2(%arg0: i32) -> (i32, i32) {
    %c0_i32 = arith.constant 0 : i32
    %c0_i32_0 = arith.constant 0 : i32
    %c0_i32_1 = arith.constant 0 : i32
    return %c0_i32, %c0_i32_0 : i32, i32
  }
  func.func @transform_3(%arg0: i32) -> (i32, i32, i32) {
    %c0_i32 = arith.constant 0 : i32
    %c0_i32_0 = arith.constant 0 : i32
    %c0_i32_1 = arith.constant 0 : i32
    return %arg0, %c0_i32, %c0_i32_0 : i32, i32, i32
  }
  func.func @transform_4(%arg0: i32) -> (i32, i32, i32) {
    %c0_i32 = arith.constant 0 : i32
    %c0_i32_0 = arith.constant 0 : i32
    %c0_i32_1 = arith.constant 0 : i32
    return %arg0, %c0_i32, %c0_i32_0 : i32, i32, i32
  }
  func.func @transform_5(%arg0: i32) -> (i32, i32, i32) {
    %c0_i32 = arith.constant 0 : i32
    %c0_i32_0 = arith.constant 0 : i32
    %c0_i32_1 = arith.constant 0 : i32
    return %arg0, %c0_i32, %c0_i32_0 : i32, i32, i32
  }
}

module attributes {stable_mosaic.version = 11 : i64} {
  func.func @_conv_spade_lrelu_kernel(%arg0: i32, %arg1: memref<8x144xbf16, #tpu.memory_space<vmem>>, %arg2: memref<1x144x64xbf16, #tpu.memory_space<vmem>>, %arg3: memref<8x1xf32, #tpu.memory_space<vmem>>, %arg4: memref<1x8x64xf32, #tpu.memory_space<vmem>>, %arg5: memref<1x8x64xf32, #tpu.memory_space<vmem>>, %arg6: memref<1x8x64xf32, #tpu.memory_space<vmem>>) attributes {dimension_semantics = [#tpu.dimension_semantics<parallel>], iteration_bounds = array<i64: 2>, scalar_prefetch = 0 : i64, scratch_operands = 0 : i64, tpu.core_type = #tpu.core_type<tc>, window_params = [{pipeline_mode = #tpu.pipeline_mode<synchronous>, transform_indices = @transform_0, window_bounds = array<i64: 8, 144>}, {transform_indices = @transform_1, window_bounds = array<i64: 1, 144, 64>}, {pipeline_mode = #tpu.pipeline_mode<synchronous>, transform_indices = @transform_2, window_bounds = array<i64: 8, 1>}, {transform_indices = @transform_3, window_bounds = array<i64: 1, 8, 64>}, {transform_indices = @transform_4, window_bounds = array<i64: 1, 8, 64>}, {transform_indices = @transform_5, window_bounds = array<i64: 1, 8, 64>}]} {
    %c0 = arith.constant 0 : index
    %c0_0 = arith.constant 0 : index
    %0 = vector.load %arg1[%c0, %c0_0] : memref<8x144xbf16, #tpu.memory_space<vmem>>, vector<8x144xbf16>
    %c0_1 = arith.constant 0 : index
    %c0_2 = arith.constant 0 : index
    %c0_3 = arith.constant 0 : index
    %1 = vector.load %arg2[%c0_1, %c0_2, %c0_3] : memref<1x144x64xbf16, #tpu.memory_space<vmem>>, vector<1x144x64xbf16>
    %2 = vector.shape_cast %1 : vector<1x144x64xbf16> to vector<144x64xbf16>
    %cst = arith.constant dense<0.000000e+00> : vector<8x64xf32>
    %3 = tpu.matmul %0, %2, %cst {dimension_numbers = #tpu.dot_dimension_numbers<[1], [0], [0], [1], [0, 0, 1, 1], [], []>} : vector<8x144xbf16>, vector<144x64xbf16>, vector<8x64xf32> -> vector<8x64xf32>
    %c0_4 = arith.constant 0 : index
    %c0_5 = arith.constant 0 : index
    %4 = vector.load %arg3[%c0_4, %c0_5] : memref<8x1xf32, #tpu.memory_space<vmem>>, vector<8x1xf32>
    %5 = vector.broadcast %4 : vector<8x1xf32> to vector<8x64xf32>
    %6 = arith.addf %3, %5 : vector<8x64xf32>
    %cst_6 = arith.constant dense<0.000000e+00> : vector<8xf32>
    %7 = vector.multi_reduction <add>, %6, %cst_6 [1] : vector<8x64xf32> to vector<8xf32>
    %8 = vector.shape_cast %7 : vector<8xf32> to vector<8x1xf32>
    %cst_7 = arith.constant 6.400000e+01 : f32
    %9 = vector.broadcast %cst_7 : f32 to vector<8x1xf32>
    %10 = arith.divf %8, %9 : vector<8x1xf32>
    %11 = vector.broadcast %10 : vector<8x1xf32> to vector<8x64xf32>
    %12 = arith.subf %6, %11 : vector<8x64xf32>
    %13 = arith.mulf %12, %12 : vector<8x64xf32>
    %cst_8 = arith.constant dense<0.000000e+00> : vector<8xf32>
    %14 = vector.multi_reduction <add>, %13, %cst_8 [1] : vector<8x64xf32> to vector<8xf32>
    %15 = vector.shape_cast %14 : vector<8xf32> to vector<8x1xf32>
    %cst_9 = arith.constant 6.400000e+01 : f32
    %16 = vector.broadcast %cst_9 : f32 to vector<8x1xf32>
    %17 = arith.divf %15, %16 : vector<8x1xf32>
    %cst_10 = arith.constant 9.99999974E-6 : f32
    %18 = vector.broadcast %cst_10 : f32 to vector<8x1xf32>
    %19 = arith.addf %17, %18 : vector<8x1xf32>
    %20 = math.rsqrt %19 : vector<8x1xf32>
    %21 = vector.broadcast %20 : vector<8x1xf32> to vector<8x64xf32>
    %22 = arith.mulf %12, %21 : vector<8x64xf32>
    %c0_11 = arith.constant 0 : index
    %c0_12 = arith.constant 0 : index
    %c0_13 = arith.constant 0 : index
    %23 = vector.load %arg4[%c0_11, %c0_12, %c0_13] : memref<1x8x64xf32, #tpu.memory_space<vmem>>, vector<1x8x64xf32>
    %24 = vector.shape_cast %23 : vector<1x8x64xf32> to vector<8x64xf32>
    %cst_14 = arith.constant 1.000000e+00 : f32
    %25 = vector.broadcast %cst_14 : f32 to vector<8x64xf32>
    %26 = arith.addf %25, %24 : vector<8x64xf32>
    %27 = arith.mulf %22, %26 : vector<8x64xf32>
    %c0_15 = arith.constant 0 : index
    %c0_16 = arith.constant 0 : index
    %c0_17 = arith.constant 0 : index
    %28 = vector.load %arg5[%c0_15, %c0_16, %c0_17] : memref<1x8x64xf32, #tpu.memory_space<vmem>>, vector<1x8x64xf32>
    %29 = vector.shape_cast %28 : vector<1x8x64xf32> to vector<8x64xf32>
    %30 = arith.addf %27, %29 : vector<8x64xf32>
    %cst_18 = arith.constant 0.000000e+00 : f32
    %31 = vector.broadcast %cst_18 : f32 to vector<8x64xf32>
    %32 = arith.cmpf oge, %30, %31 : vector<8x64xf32>
    %cst_19 = arith.constant 2.000000e-01 : f32
    %33 = vector.broadcast %cst_19 : f32 to vector<8x64xf32>
    %34 = arith.mulf %33, %30 : vector<8x64xf32>
    %35 = arith.select %32, %30, %34 : vector<8x64xi1>, vector<8x64xf32>
    %c0_20 = arith.constant 0 : index
    %c0_21 = arith.constant 0 : index
    %c0_22 = arith.constant 0 : index
    %36 = vector.load %arg6[%c0_20, %c0_21, %c0_22] : memref<1x8x64xf32, #tpu.memory_space<vmem>>, vector<1x8x64xf32>
    %37 = vector.shape_cast %36 : vector<1x8x64xf32> to vector<8x64xf32>
    %38 = vector.shape_cast %35 : vector<8x64xf32> to vector<1x8x64xf32>
    tpu.vector_store %arg6[%c0_20, %c0_21, %c0_22], %38 {strides = array<i32>} : memref<1x8x64xf32, #tpu.memory_space<vmem>>, vector<1x8x64xf32>,
    return
  }
  func.func @transform_0(%arg0: i32) -> (i32, i32) {
    %c0_i32 = arith.constant 0 : i32
    %c0_i32_0 = arith.constant 0 : i32
    %c0_i32_1 = arith.constant 0 : i32
    return %c0_i32, %c0_i32_0 : i32, i32
  }
  func.func @transform_1(%arg0: i32) -> (i32, i32, i32) {
    %c0_i32 = arith.constant 0 : i32
    %c0_i32_0 = arith.constant 0 : i32
    %c0_i32_1 = arith.constant 0 : i32
    return %arg0, %c0_i32, %c0_i32_0 : i32, i32, i32
  }
  func.func @transform_2(%arg0: i32) -> (i32, i32) {
    %c0_i32 = arith.constant 0 : i32
    %c0_i32_0 = arith.constant 0 : i32
    %c0_i32_1 = arith.constant 0 : i32
    return %c0_i32, %c0_i32_0 : i32, i32
  }
  func.func @transform_3(%arg0: i32) -> (i32, i32, i32) {
    %c0_i32 = arith.constant 0 : i32
    %c0_i32_0 = arith.constant 0 : i32
    %c0_i32_1 = arith.constant 0 : i32
    return %arg0, %c0_i32, %c0_i32_0 : i32, i32, i32
  }
  func.func @transform_4(%arg0: i32) -> (i32, i32, i32) {
    %c0_i32 = arith.constant 0 : i32
    %c0_i32_0 = arith.constant 0 : i32
    %c0_i32_1 = arith.constant 0 : i32
    return %arg0, %c0_i32, %c0_i32_0 : i32, i32, i32
  }
  func.func @transform_5(%arg0: i32) -> (i32, i32, i32) {
    %c0_i32 = arith.constant 0 : i32
    %c0_i32_0 = arith.constant 0 : i32
    %c0_i32_1 = arith.constant 0 : i32
    return %arg0, %c0_i32, %c0_i32_0 : i32, i32, i32
  }
}

module attributes {stable_mosaic.version = 11 : i64} {
  func.func @_conv2_skip_kernel(%arg0: i32, %arg1: memref<8x72xbf16, #tpu.memory_space<vmem>>, %arg2: memref<1x72x64xbf16, #tpu.memory_space<vmem>>, %arg3: memref<8x1xf32, #tpu.memory_space<vmem>>, %arg4: memref<8x16xbf16, #tpu.memory_space<vmem>>, %arg5: memref<1x16x64xbf16, #tpu.memory_space<vmem>>, %arg6: memref<8x1xf32, #tpu.memory_space<vmem>>, %arg7: memref<1x8x64xf32, #tpu.memory_space<vmem>>) attributes {dimension_semantics = [#tpu.dimension_semantics<parallel>], iteration_bounds = array<i64: 2>, scalar_prefetch = 0 : i64, scratch_operands = 0 : i64, tpu.core_type = #tpu.core_type<tc>, window_params = [{pipeline_mode = #tpu.pipeline_mode<synchronous>, transform_indices = @transform_0, window_bounds = array<i64: 8, 72>}, {transform_indices = @transform_1, window_bounds = array<i64: 1, 72, 64>}, {pipeline_mode = #tpu.pipeline_mode<synchronous>, transform_indices = @transform_2, window_bounds = array<i64: 8, 1>}, {pipeline_mode = #tpu.pipeline_mode<synchronous>, transform_indices = @transform_3, window_bounds = array<i64: 8, 16>}, {transform_indices = @transform_4, window_bounds = array<i64: 1, 16, 64>}, {pipeline_mode = #tpu.pipeline_mode<synchronous>, transform_indices = @transform_5, window_bounds = array<i64: 8, 1>}, {transform_indices = @transform_6, window_bounds = array<i64: 1, 8, 64>}]} {
    %c0 = arith.constant 0 : index
    %c0_0 = arith.constant 0 : index
    %0 = vector.load %arg1[%c0, %c0_0] : memref<8x72xbf16, #tpu.memory_space<vmem>>, vector<8x72xbf16>
    %c0_1 = arith.constant 0 : index
    %c0_2 = arith.constant 0 : index
    %c0_3 = arith.constant 0 : index
    %1 = vector.load %arg2[%c0_1, %c0_2, %c0_3] : memref<1x72x64xbf16, #tpu.memory_space<vmem>>, vector<1x72x64xbf16>
    %2 = vector.shape_cast %1 : vector<1x72x64xbf16> to vector<72x64xbf16>
    %cst = arith.constant dense<0.000000e+00> : vector<8x64xf32>
    %3 = tpu.matmul %0, %2, %cst {dimension_numbers = #tpu.dot_dimension_numbers<[1], [0], [0], [1], [0, 0, 1, 1], [], []>} : vector<8x72xbf16>, vector<72x64xbf16>, vector<8x64xf32> -> vector<8x64xf32>
    %c0_4 = arith.constant 0 : index
    %c0_5 = arith.constant 0 : index
    %4 = vector.load %arg3[%c0_4, %c0_5] : memref<8x1xf32, #tpu.memory_space<vmem>>, vector<8x1xf32>
    %5 = vector.broadcast %4 : vector<8x1xf32> to vector<8x64xf32>
    %6 = arith.addf %3, %5 : vector<8x64xf32>
    %c0_6 = arith.constant 0 : index
    %c0_7 = arith.constant 0 : index
    %7 = vector.load %arg4[%c0_6, %c0_7] : memref<8x16xbf16, #tpu.memory_space<vmem>>, vector<8x16xbf16>
    %c0_8 = arith.constant 0 : index
    %c0_9 = arith.constant 0 : index
    %c0_10 = arith.constant 0 : index
    %8 = vector.load %arg5[%c0_8, %c0_9, %c0_10] : memref<1x16x64xbf16, #tpu.memory_space<vmem>>, vector<1x16x64xbf16>
    %9 = vector.shape_cast %8 : vector<1x16x64xbf16> to vector<16x64xbf16>
    %cst_11 = arith.constant dense<0.000000e+00> : vector<8x64xf32>
    %10 = tpu.matmul %7, %9, %cst_11 {dimension_numbers = #tpu.dot_dimension_numbers<[1], [0], [0], [1], [0, 0, 1, 1], [], []>} : vector<8x16xbf16>, vector<16x64xbf16>, vector<8x64xf32> -> vector<8x64xf32>
    %11 = arith.addf %6, %10 : vector<8x64xf32>
    %c0_12 = arith.constant 0 : index
    %c0_13 = arith.constant 0 : index
    %12 = vector.load %arg6[%c0_12, %c0_13] : memref<8x1xf32, #tpu.memory_space<vmem>>, vector<8x1xf32>
    %13 = vector.broadcast %12 : vector<8x1xf32> to vector<8x64xf32>
    %14 = arith.addf %11, %13 : vector<8x64xf32>
    %c0_14 = arith.constant 0 : index
    %c0_15 = arith.constant 0 : index
    %c0_16 = arith.constant 0 : index
    %15 = vector.load %arg7[%c0_14, %c0_15, %c0_16] : memref<1x8x64xf32, #tpu.memory_space<vmem>>, vector<1x8x64xf32>
    %16 = vector.shape_cast %15 : vector<1x8x64xf32> to vector<8x64xf32>
    %17 = vector.shape_cast %14 : vector<8x64xf32> to vector<1x8x64xf32>
    tpu.vector_store %arg7[%c0_14, %c0_15, %c0_16], %17 {strides = array<i32>} : memref<1x8x64xf32, #tpu.memory_space<vmem>>, vector<1x8x64xf32>,
    return
  }
  func.func @transform_0(%arg0: i32) -> (i32, i32) {
    %c0_i32 = arith.constant 0 : i32
    %c0_i32_0 = arith.constant 0 : i32
    %c0_i32_1 = arith.constant 0 : i32
    return %c0_i32, %c0_i32_0 : i32, i32
  }
  func.func @transform_1(%arg0: i32) -> (i32, i32, i32) {
    %c0_i32 = arith.constant 0 : i32
    %c0_i32_0 = arith.constant 0 : i32
    %c0_i32_1 = arith.constant 0 : i32
    return %arg0, %c0_i32, %c0_i32_0 : i32, i32, i32
  }
  func.func @transform_2(%arg0: i32) -> (i32, i32) {
    %c0_i32 = arith.constant 0 : i32
    %c0_i32_0 = arith.constant 0 : i32
    %c0_i32_1 = arith.constant 0 : i32
    return %c0_i32, %c0_i32_0 : i32, i32
  }
  func.func @transform_3(%arg0: i32) -> (i32, i32) {
    %c0_i32 = arith.constant 0 : i32
    %c0_i32_0 = arith.constant 0 : i32
    %c0_i32_1 = arith.constant 0 : i32
    return %c0_i32, %c0_i32_0 : i32, i32
  }
  func.func @transform_4(%arg0: i32) -> (i32, i32, i32) {
    %c0_i32 = arith.constant 0 : i32
    %c0_i32_0 = arith.constant 0 : i32
    %c0_i32_1 = arith.constant 0 : i32
    return %arg0, %c0_i32, %c0_i32_0 : i32, i32, i32
  }
  func.func @transform_5(%arg0: i32) -> (i32, i32) {
    %c0_i32 = arith.constant 0 : i32
    %c0_i32_0 = arith.constant 0 : i32
    %c0_i32_1 = arith.constant 0 : i32
    return %c0_i32, %c0_i32_0 : i32, i32
  }
  func.func @transform_6(%arg0: i32) -> (i32, i32, i32) {
    %c0_i32 = arith.constant 0 : i32
    %c0_i32_0 = arith.constant 0 : i32
    %c0_i32_1 = arith.constant 0 : i32
    return %arg0, %c0_i32, %c0_i32_0 : i32, i32, i32
  }
}

module attributes {stable_mosaic.version = 11 : i64} {
  func.func @_conv_tanh_kernel(%arg0: i32, %arg1: memref<3x392xbf16, #tpu.memory_space<vmem>>, %arg2: memref<1x392x256xbf16, #tpu.memory_space<vmem>>, %arg3: memref<3x1xf32, #tpu.memory_space<vmem>>, %arg4: memref<1x3x256xf32, #tpu.memory_space<vmem>>) attributes {dimension_semantics = [#tpu.dimension_semantics<parallel>], iteration_bounds = array<i64: 2>, scalar_prefetch = 0 : i64, scratch_operands = 0 : i64, tpu.core_type = #tpu.core_type<tc>, window_params = [{pipeline_mode = #tpu.pipeline_mode<synchronous>, transform_indices = @transform_0, window_bounds = array<i64: 3, 392>}, {transform_indices = @transform_1, window_bounds = array<i64: 1, 392, 256>}, {pipeline_mode = #tpu.pipeline_mode<synchronous>, transform_indices = @transform_2, window_bounds = array<i64: 3, 1>}, {transform_indices = @transform_3, window_bounds = array<i64: 1, 3, 256>}]} {
    %c0 = arith.constant 0 : index
    %c0_0 = arith.constant 0 : index
    %0 = vector.load %arg1[%c0, %c0_0] : memref<3x392xbf16, #tpu.memory_space<vmem>>, vector<3x392xbf16>
    %c0_1 = arith.constant 0 : index
    %c0_2 = arith.constant 0 : index
    %c0_3 = arith.constant 0 : index
    %1 = vector.load %arg2[%c0_1, %c0_2, %c0_3] : memref<1x392x256xbf16, #tpu.memory_space<vmem>>, vector<1x392x256xbf16>
    %2 = vector.shape_cast %1 : vector<1x392x256xbf16> to vector<392x256xbf16>
    %cst = arith.constant dense<0.000000e+00> : vector<3x256xf32>
    %3 = tpu.matmul %0, %2, %cst {dimension_numbers = #tpu.dot_dimension_numbers<[1], [0], [0], [1], [0, 0, 1, 1], [], []>} : vector<3x392xbf16>, vector<392x256xbf16>, vector<3x256xf32> -> vector<3x256xf32>
    %c0_4 = arith.constant 0 : index
    %c0_5 = arith.constant 0 : index
    %4 = vector.load %arg3[%c0_4, %c0_5] : memref<3x1xf32, #tpu.memory_space<vmem>>, vector<3x1xf32>
    %5 = vector.broadcast %4 : vector<3x1xf32> to vector<3x256xf32>
    %6 = arith.addf %3, %5 : vector<3x256xf32>
    %7 = math.tanh %6 : vector<3x256xf32>
    %c0_6 = arith.constant 0 : index
    %c0_7 = arith.constant 0 : index
    %c0_8 = arith.constant 0 : index
    %8 = vector.load %arg4[%c0_6, %c0_7, %c0_8] : memref<1x3x256xf32, #tpu.memory_space<vmem>>, vector<1x3x256xf32>
    %9 = vector.shape_cast %8 : vector<1x3x256xf32> to vector<3x256xf32>
    %10 = vector.shape_cast %7 : vector<3x256xf32> to vector<1x3x256xf32>
    tpu.vector_store %arg4[%c0_6, %c0_7, %c0_8], %10 {strides = array<i32>} : memref<1x3x256xf32, #tpu.memory_space<vmem>>, vector<1x3x256xf32>,
    return
  }
  func.func @transform_0(%arg0: i32) -> (i32, i32) {
    %c0_i32 = arith.constant 0 : i32
    %c0_i32_0 = arith.constant 0 : i32
    %c0_i32_1 = arith.constant 0 : i32
    return %c0_i32, %c0_i32_0 : i32, i32
  }
  func.func @transform_1(%arg0: i32) -> (i32, i32, i32) {
    %c0_i32 = arith.constant 0 : i32
    %c0_i32_0 = arith.constant 0 : i32
    %c0_i32_1 = arith.constant 0 : i32
    return %arg0, %c0_i32, %c0_i32_0 : i32, i32, i32
  }
  func.func @transform_2(%arg0: i32) -> (i32, i32) {
    %c0_i32 = arith.constant 0 : i32
    %c0_i32_0 = arith.constant 0 : i32
    %c0_i32_1 = arith.constant 0 : i32
    return %c0_i32, %c0_i32_0 : i32, i32
  }
  func.func @transform_3(%arg0: i32) -> (i32, i32, i32) {
    %c0_i32 = arith.constant 0 : i32
    %c0_i32_0 = arith.constant 0 : i32
    %c0_i32_1 = arith.constant 0 : i32
    return %arg0, %c0_i32, %c0_i32_0 : i32, i32, i32
  }
}

</mosaic_0001>

<bundles_post_ra>
// kernel: _lambda_.12
= control target key start
LH: loop header
LB: loop body
LE: loop exit
PB: predicated region body
PF: predicated region fallthrough
CT: control target
= control target key end

     0   :  { %s487_s9 = smov 0   ;;  %s551_s0 = inlined_call_operand.vmem [shape: f32[2,9,16], index: 0, kind: input, shape index: {}]   ;;  %s552_s1 = inlined_call_operand.vmem [shape: f32[2,1,2], index: 1, kind: input, shape index: {}]   ;;  %s553_s2 = inlined_call_operand.vmem [shape: f32[2,9,16], index: 2, kind: output, shape index: {}]  }
   0x1 LB: > { %s407_s10 = sadd.s32 4294967295, %s464_s9   ;;  %p411_p0 = scmp.ge.s32.totalorder %s464_s9, 1  ;;  %s464_s9 = sphi %s487_s9, %s12_s9  }
   0x2   : > { %p120_p1 = scmp.lt.s32.totalorder %s464_s9, 3 }
   0x4   : > { %p121_p2 = pnand %p411_p0, %p120_p1 }
   0x5   : > { %p145_p3 = scmp.lt.s32.totalorder (!%p121_p2), %s407_s10, 1 }
   0x6   : > { %124 = sbr.rel (%p121_p2) target bundleno = 351 (0x15f), region = 28 }
   0xb   : > { %s557_s10 = smov (!%p145_p3, %s407_s10), 1  ;;  %vm164_vm0 = vcmask 122880   ;;  %vm160_vm1 = vcmask 130048   ;;  %v466_v4 = vmov 16.0   ;;  %v467_v9 = vmov 9.0  }
   0xc   : > { %s418_s11 = sshll.u32 %s557_s10, 4  ;;  %s152_s17 = scalar_lea.vmem %s552_s1, %s557_s10  ;;  %438 = vrcp.f32 %v466_v4  ;;  %vm252_vm3 = vcmask 1040384   ;;  %v468_v19 = vmov 0   ;;  %v469_v20 = vmov 1  }
   0xd   : > { %s149_s14 = scalar_lea.vmem %s551_s0, %s418_s11  ;;  %440 = vrcp.f32 %v467_v9  ;;  %v437_v17 = vld [vmem:[%s152_s17] ss:$0 sm:$0xff]  ;;  %434 = vset.pattern.permute.xlu0 %v468_v19  ;;  %435 = vset.pattern.permute.xlu1 %v469_v20  ;;  %v470_v46 = vmov 15.0   ;;  %v471_v59 = vmov 143.0   ;;  %s157_s20 = scalar_lea.vmem %s553_s2, %s418_s11 }
   0xe   : > { %v159_v0 = vld [vmem:[%s149_s14 + $0x8] sm:$0x1]  ;;  %v158_v2 = vld [vmem:[%s149_s14] sm:$0xff]  ;;  %442 = vrcp.f32 %v470_v46 }
   0xf   : > { %v165_v1 = vsel %vm164_vm0, %v159_v0, 0.0  ;;  %v161_v3 = vsel %vm160_vm1, %v158_v2, 0.0 }
  0x10   : > { %166 = vadd.xlane.f32.xlu0 %v165_v1 }
  0x12   : > { %v439_v5 = vpop.eup %438 }
  0x13   : > { %v169_v6 = vmul.f32 16.0, %v439_v5  ;;  %vm173_vm2 = vweird.f32 %v439_v5  ;;  %v441_v12 = vpop.eup %440 }
  0x14   : > { %v262_v15 = vmul.f32 9.0, %v441_v12  ;;  %vm266_vm4 = vweird.f32 %v441_v12  ;;  %v443_v47 = vpop.eup %442 }
  0x15   : > { %v170_v7 = vsub.f32 1.0, %v169_v6  ;;  %v188_v48 = vmul.f32 15.0, %v443_v47  ;;  %vm192_vm5 = vweird.f32 %v443_v47 }
  0x16   : > { %v263_v22 = vsub.f32 1.0, %v262_v15 }
  0x17   : > { %v171_v8 = vmul.f32 %v439_v5, %v170_v7  ;;  %v189_v49 = vsub.f32 1.0, %v188_v48 }
  0x18   : > { %162 = vadd.xlane.f32.xlu0 %v161_v3  ;;  %v264_v27 = vmul.f32 %v441_v12, %v263_v22 }
  0x19   : > { %v172_v10 = vadd.f32 %v439_v5, %v171_v8  ;;  %v190_v50 = vmul.f32 %v443_v47, %v189_v49 }
  0x1a   : > { %v265_v32 = vadd.f32 %v441_v12, %v264_v27 }
  0x1b   : > { %v174_v13 = vsel %vm173_vm2, %v439_v5, %v172_v10  ;;  %v191_v51 = vadd.f32 %v443_v47, %v190_v50 }
  0x1c   : > { %v267_v36 = vsel %vm266_vm4, %v441_v12, %v265_v32 }
  0x1d   : > { %v193_v52 = vsel %vm192_vm5, %v443_v47, %v191_v51 }
  0x2c   : > { %328 = vperm.xlu0 %434, %v437_v17  }
  0x34   : > { %436 = vset.pattern.permute.xlu0 %v469_v20 }
  0x83   : > { %v167_v11 = vpop.xlane.xlu0 %166 }
  0x84   : > { %v176_v14 = vmul.f32 %v174_v13, %v167_v11 }
  0x86   : > { %v253_v21 = vsel %vm252_vm3, %v176_v14, 0.0  ;;  %v514_v28 = vsub.f32 %v159_v0, %v176_v14 }
  0x88   : > { %v180_v34 = vmul.f32 %v514_v28, %v514_v28 }
  0x8a   : > { %v184_v37 = vsel %vm164_vm0, %v180_v34, 0.0 }
  0x8b   : > { %v163_v16 = vpop.xlane.xlu0 %162 }
  0x8c   : > { %v175_v18 = vmul.f32 %v174_v13, %v163_v16 }
  0x8e   : > { %v510_v23 = vsub.f32 %v158_v2, %v175_v18  ;;  %v254_v24 = vadd.f32 %v253_v21, %v175_v18 }
  0x90   : > { %v255_v25 = vrot.slane %v254_v24, 4  ;;  %v179_v26 = vmul.f32 %v510_v23, %v510_v23 }
  0x92   : > { %v256_v29 = vadd.f32 %v255_v25, %v254_v24  ;;  %v181_v30 = vsel %vm160_vm1, %v179_v26, 0.0 }
  0x93   : > { %182 = vadd.xlane.f32.xlu2 %v181_v30 }
  0x94   : > { %v257_v31 = vrot.slane %v256_v29, 2 }
  0x96   : > { %v258_v33 = vadd.f32 %v257_v31, %v256_v29 }
  0x98   : > { %v259_v35 = vrot.slane %v258_v33, 1 }
  0x9a   : > { %v260_v38 = vadd.f32 %v259_v35, %v258_v33 }
  0x9b   : > { %185 = vadd.xlane.f32.xlu2 %v184_v37 }
  0x9c   : > { %v268_v39 = vmul.f32 %v267_v36, %v260_v38 }
  0x9e   : > { %v520_v40 = vsub.f32 %v159_v0, %v268_v39  ;;  %v525_v43 = vsub.f32 %v158_v2, %v268_v39 }
  0xa0   : > { %v272_v41 = vmul.f32 %v520_v40, %v520_v40  ;;  %v271_v44 = vmul.f32 %v525_v43, %v525_v43 }
  0xa2   : > { %v276_v42 = vsel %vm164_vm0, %v272_v41, 0.0  ;;  %v273_v45 = vsel %vm160_vm1, %v271_v44, 0.0 }
  0xa3   : > { %277 = vadd.xlane.f32.xlu1 %v276_v42 }
  0xab   : > { %274 = vadd.xlane.f32.xlu1 %v273_v45 }
  0xc4   : > { %334 = vperm.xlu1 %435, %v437_v17  }
 0x106   : > { %v183_v53 = vpop.xlane.xlu2 %182 }
 0x107   : > { %v194_v54 = vmul.f32 %v193_v52, %v183_v53 }
 0x109   : > { %v196_v55 = vadd.f32 1e-08, %v194_v54 }
 0x10b   : > { %444 = vrsqrt.f32 %v196_v55  ;;  %vm205_vm7 = vcmp.eq.f32.partialorder %v196_v55, inf  ;;  %v208_v31 = vand.u32 2147483648, %v196_v55  ;;  %vm207_vm9 = vcmp.eq.f32.partialorder %v196_v55, 0.0 }
 0x10c   : > { %446 = vrcp.f32 %v471_v59 }
 0x10e   : > { %v186_v56 = vpop.xlane.xlu2 %185 }
 0x10f   : > { %v195_v57 = vmul.f32 %v193_v52, %v186_v56 }
 0x111   : > { %v197_v58 = vadd.f32 1e-08, %v195_v57  ;;  %v445_v60 = vpop.eup %444 }
 0x112   : > { %v447_v62 = vpop.eup %446  ;;  %v199_v63 = vmul.f32 %v445_v60, %v196_v55 }
 0x113   : > { %448 = vrsqrt.f32 %v197_v58  ;;  %v288_v2 = vmul.f32 143.0, %v447_v62  ;;  %vm292_vm6 = vweird.f32 %v447_v62  ;;  %vm217_vm8 = vcmp.eq.f32.partialorder %v197_v58, inf }
 0x114   : > { %v200_v3 = vmul.f32 %v445_v60, %v199_v63  ;;  %v220_v33 = vand.u32 2147483648, %v197_v58  ;;  %vm219_vm10 = vcmp.eq.f32.partialorder %v197_v58, 0.0 }
 0x115   : > { %v289_v6 = vsub.f32 1.0, %v288_v2 }
 0x116   : > { %v278_v61 = vpop.xlane.xlu1 %277  ;;  %v201_v9 = vmul.f32 0.5, %v200_v3 }
 0x117   : > { %v279_v5 = vsel %vm252_vm3, %v278_v61, 0.0  ;;  %v290_v12 = vmul.f32 %v447_v62, %v289_v6 }
 0x118   : > { %v202_v14 = vsub.f32 1.5, %v201_v9 }
 0x119   : > { %v449_v0 = vpop.eup %448  ;;  %v291_v17 = vadd.f32 %v447_v62, %v290_v12 }
 0x11a   : > { %v211_v1 = vmul.f32 %v449_v0, %v197_v58  ;;  %v203_v19 = vmul.f32 %v445_v60, %v202_v14 }
 0x11b   : > { %v293_v22 = vsel %vm292_vm6, %v447_v62, %v291_v17 }
 0x11c   : > { %v212_v4 = vmul.f32 %v449_v0, %v211_v1  ;;  %v204_v25 = vmul.f32 %v203_v19, %v196_v55 }
 0x11e   : > { %v275_v7 = vpop.xlane.xlu1 %274  ;;  %v213_v10 = vmul.f32 0.5, %v212_v4  ;;  %v206_v30 = vsel %vm205_vm7, %v196_v55, %v204_v25 }
 0x11f   : > { %v280_v8 = vadd.f32 %v279_v5, %v275_v7  ;;  %v209_v34 = vsel %vm207_vm9, %v208_v31, %v206_v30 }
 0x120   : > { %v214_v15 = vsub.f32 1.5, %v213_v10  ;;  %vm227_vm15 = vweird.f32 %v209_v34  ;;  %v231_v59 = vand.u32 2147483647, %v209_v34  ;;  %v233_v60 = vand.u32 2147483648, %v209_v34 }
 0x121   : > { %v281_v11 = vrot.slane %v280_v8, 4 }
 0x122   : > { %v215_v20 = vmul.f32 %v449_v0, %v214_v15  ;;  %vm232_vm5 = vcmp.eq.f32.partialorder %v231_v59, 8.507059e+37  ;;  %v234_v4 = vor.u32 1.1754944e-38, %v233_v60 }
 0x123   : > { %v282_v13 = vadd.f32 %v281_v11, %v280_v8 }
 0x124   : > { %v216_v26 = vmul.f32 %v215_v20, %v197_v58 }
 0x125   : > { %v283_v16 = vrot.slane %v282_v13, 2 }
 0x126   : > { %v218_v32 = vsel %vm217_vm8, %v197_v58, %v216_v26 }
 0x127   : > { %v284_v18 = vadd.f32 %v283_v16, %v282_v13  ;;  %v221_v35 = vsel %vm219_vm10, %v220_v33, %v218_v32  ;;  %v329_v16 = vpop.permute.xlu0 %328 }
 0x128   : > { %v248_v61 = vand.u32 2147483648, %v221_v35  ;;  %vm242_vm3 = vweird.f32 %v221_v35  ;;  %v246_v63 = vand.u32 2147483647, %v221_v35 }
 0x129   : > { %v285_v21 = vrot.slane %v284_v18, 1 }
 0x12a   : > { %v249_v5 = vor.u32 1.1754944e-38, %v248_v61  ;;  %vm247_vm6 = vcmp.eq.f32.partialorder %v246_v63, 8.507059e+37 }
 0x12b   : > { %v286_v24 = vadd.f32 %v285_v21, %v284_v18 }
 0x12d   : > { %v294_v27 = vmul.f32 %v293_v22, %v286_v24 }
 0x12f   : > { %v295_v29 = vadd.f32 1e-08, %v294_v27 }
 0x131   : > { %450 = vrsqrt.f32 %v295_v29  ;;  %vm303_vm11 = vcmp.eq.f32.partialorder %v295_v29, inf  ;;  %v306_v51 = vand.u32 2147483648, %v295_v29  ;;  %vm305_vm12 = vcmp.eq.f32.partialorder %v295_v29, 0.0 }
 0x132   : > { %452 = vrcp.f32 %v209_v34 }
 0x133   : > { %454 = vrcp.f32 %v221_v35 }
 0x136   : > { %v335_v18 = vpop.permute.xlu1 %334 }
 0x137   : > { %v451_v36 = vpop.eup %450 }
 0x138   : > { %v297_v37 = vmul.f32 %v451_v36, %v295_v29  ;;  %v453_v39 = vpop.eup %452 }
 0x139   : > { %v455_v41 = vpop.eup %454  ;;  %v223_v45 = vmul.f32 %v453_v39, %v209_v34  ;;  %vm228_vm13 = vweird.f32 %v453_v39 }
 0x13a   : > { %v298_v38 = vmul.f32 %v451_v36, %v297_v37  ;;  %v238_v46 = vmul.f32 %v455_v41, %v221_v35  ;;  %vm243_vm14 = vweird.f32 %v455_v41  ;;  %vm531_vm2 = vmor %vm227_vm15, %vm228_vm13 }
 0x13b   : > { %v224_v49 = vsub.f32 1.0, %v223_v45  ;;  %vm244_vm4 = vmor %vm242_vm3, %vm243_vm14 }
 0x13c   : > { %v299_v42 = vmul.f32 0.5, %v298_v38  ;;  %v239_v50 = vsub.f32 1.0, %v238_v46 }
 0x13d   : > { %v225_v54 = vmul.f32 %v453_v39, %v224_v49 }
 0x13e   : > { %v300_v44 = vsub.f32 1.5, %v299_v42  ;;  %v240_v55 = vmul.f32 %v455_v41, %v239_v50 }
 0x13f   : > { %v226_v56 = vadd.f32 %v453_v39, %v225_v54 }
 0x140   : > { %v301_v47 = vmul.f32 %v451_v36, %v300_v44  ;;  %v241_v57 = vadd.f32 %v455_v41, %v240_v55 }
 0x141   : > { %v230_v1 = vsel %vm531_vm2, %v453_v39, %v226_v56 }
 0x142   : > { %v302_v48 = vmul.f32 %v301_v47, %v295_v29  ;;  %v245_v2 = vsel %vm244_vm4, %v455_v41, %v241_v57  ;;  %v235_v9 = vsel %vm232_vm5, %v234_v4, %v230_v1 }
 0x143   : > { %v250_v10 = vsel %vm247_vm6, %v249_v5, %v245_v2  ;;  %v236_v13 = vmul.f32 %v235_v9, %v510_v23 }
 0x144   : > { %v304_v52 = vsel %vm303_vm11, %v295_v29, %v302_v48  ;;  %v251_v14 = vmul.f32 %v250_v10, %v514_v28 }
 0x145   : > { %v307_v53 = vsel %vm305_vm12, %v306_v51, %v304_v52  ;;  %v331_v21 = vmul.f32 %v329_v16, %v236_v13 }
 0x146   : > { %456 = vrcp.f32 %v307_v53  ;;  %v319_v6 = vand.u32 2147483648, %v307_v53  ;;  %v317_v8 = vand.u32 2147483647, %v307_v53  ;;  %vm313_vm8 = vweird.f32 %v307_v53 }
 0x147   : > { %v332_v22 = vmul.f32 %v329_v16, %v251_v14 }
 0x148   : > { %v320_v12 = vor.u32 1.1754944e-38, %v319_v6  ;;  %vm318_vm10 = vcmp.eq.f32.partialorder %v317_v8, 8.507059e+37 }
 0x14c   : > { %v457_v58 = vpop.eup %456 }
 0x14d   : > { %v309_v0 = vmul.f32 %v457_v58, %v307_v53  ;;  %vm314_vm7 = vweird.f32 %v457_v58 }
 0x14e   : > { %vm315_vm9 = vmor %vm313_vm8, %vm314_vm7 }
 0x14f   : > { %v310_v3 = vsub.f32 1.0, %v309_v0 }
 0x151   : > { %v311_v7 = vmul.f32 %v457_v58, %v310_v3 }
 0x153   : > { %v312_v11 = vadd.f32 %v457_v58, %v311_v7 }
 0x155   : > { %v316_v15 = vsel %vm315_vm9, %v457_v58, %v312_v11 }
 0x156   : > { %v321_v17 = vsel %vm318_vm10, %v320_v12, %v316_v15 }
 0x157   : > { %v322_v19 = vmul.f32 %v321_v17, %v525_v43  ;;  %v323_v20 = vmul.f32 %v321_v17, %v520_v40 }
 0x159   : > { %v337_v24 = vmul.f32 %v335_v18, %v322_v19  ;;  %v338_v25 = vmul.f32 %v335_v18, %v323_v20 }
 0x15b   : > { %v339_v23 = vadd.f32 %v337_v24, %v331_v21  ;;  %v340_v28 = vadd.f32 %v338_v25, %v332_v22 }
 0x15d   : > { %341 = vst.msk [vmem:[%s157_s20] sm:$0xff] %vm160_vm1, %v339_v23 }
 0x15e   : > { %342 = vst.msk [vmem:[%s157_s20 + $0x8] sm:$0x1] %vm164_vm0, %v340_v28 }
 0x15f PF: > { %s12_s9 = sadd.s32 1, %s464_s9  }
 0x160   : > { %p9_p4 = scmp.ge.s32.totalorder %s12_s9, 4  }
 0x162   :  { %11 = sbr.rel (!%p9_p4) target bundleno = 1 (0x1), region = 61 }

// kernel: _lambda_.11
= control target key start
LH: loop header
LB: loop body
LE: loop exit
PB: predicated region body
PF: predicated region fallthrough
CT: control target
= control target key end

     0   :  { %s562_s12 = smov 0   ;;  %s634_s0 = inlined_call_operand.vmem [shape: bf16[8,152], index: 0, kind: input, shape index: {}]   ;;  %s635_s1 = inlined_call_operand.vmem [shape: bf16[2,152,256], index: 1, kind: input, shape index: {}]   ;;  %s636_s2 = inlined_call_operand.vmem [shape: f32[8,1], index: 2, kind: input, shape index: {}]   ;;  %s637_s3 = inlined_call_operand.vmem [shape: f32[2,8,256], index: 3, kind: output, shape index: {}]  }
   0x1 LB: > { %s419_s13 = sadd.s32 4294967295, %s539_s12   ;;  %p423_p0 = scmp.ge.s32.totalorder %s539_s12, 1  ;;  %s539_s12 = sphi %s562_s12, %s13_s12  }
   0x2   : > { %p137_p1 = scmp.lt.s32.totalorder %s539_s12, 3 }
   0x4   : > { %p138_p2 = pnand %p423_p0, %p137_p1 }
   0x5   : > { %p161_p3 = scmp.lt.s32.totalorder (!%p138_p2), %s419_s13, 1 }
   0x6   : > { %141 = sbr.rel (%p138_p2) target bundleno = 190 (0xbe), region = 32 }
   0xb   : > { %s639_s13 = smov (!%p161_p3, %s419_s13), 1  ;;  %vm303_vm0 = vcmask 1043456   ;;  %v594_v20 = vld [vmem:[%s634_s0] sm:$0xff]  ;;  %v541_v21 = vmov 0   ;;  %vm299_vm1 = vcmask 195584  }
   0xc   : > { %s522_s14 = smul.u32 152, %s639_s13  ;;  %532 = vset.pattern.permute.xlu0 %v541_v21  ;;  %v200_v36 = vunpack.c.h.b16 %v594_v20  ;;  %v192_v41 = vld [vmem:[%s636_s2] sm:$0xff]  ;;  %s503_s22 = sshll.u32 %s639_s13, 4 }
   0xd   : > { %195 = vperm.xlu0 %532, %v192_v41   ;;  %s170_s25 = scalar_lea.vmem %s637_s3, %s503_s22 }
   0xe   : > { %s576_s17 = scalar_lea.vmem %s635_s1, %s522_s14  ;;  %v202_v46 = vpack.c.b16 %v200_v36, %v200_v36 }
   0xf   : > { %v485_v0 = vld [vmem:[%s576_s17 + $0x70] sm:$0xf]  ;;  %v519_v1 = vld [vmem:[%s576_s17 + $0x74] sm:$0xf0]  ;;  %v518_v2 = vld [vmem:[%s576_s17 + $0x74] sm:$0xf] }
  0x10   : > { %v486_v3 = vor.u32 %v519_v1, %v485_v0  ;;  %v487_v4 = vld [vmem:[%s576_s17 + $0x78] sm:$0xf0]  ;;  %v477_v5 = vld [vmem:[%s576_s17 + $0x60] sm:$0xf]  ;;  %v517_v6 = vld [vmem:[%s576_s17 + $0x64] sm:$0xf0]  ;;  %v199_v0 = vunpack.c.l.b16 %v594_v20 }
  0x11   : > { %v490_v7 = vor.u32 %v518_v2, %v487_v4  ;;  %v516_v8 = vld [vmem:[%s576_s17 + $0x64] sm:$0xf]  ;;  %v479_v9 = vld [vmem:[%s576_s17 + $0x68] sm:$0xf0]  ;;  %v478_v10 = vor.u32 %v517_v6, %v477_v5  ;;  %v469_v12 = vld [vmem:[%s576_s17 + $0x50] sm:$0xf] }
  0x12   : > { %310 = vmatpush.bf16.msra.mxu0 %v486_v3  ;;  %v482_v11 = vor.u32 %v516_v8, %v479_v9  ;;  %v515_v13 = vld [vmem:[%s576_s17 + $0x54] sm:$0xf0]  ;;  %v514_v14 = vld [vmem:[%s576_s17 + $0x54] sm:$0xf]  ;;  %v471_v15 = vld [vmem:[%s576_s17 + $0x58] sm:$0xf0]  ;;  %v201_v3 = vpack.c.b16 %v199_v0, %v199_v0 }
  0x13   : > { %336 = vmatpush.bf16.msra.mxu2 %v490_v7  ;;  %v191_v16 = vld [vmem:[%s576_s17 + $0x90] sm:$0xff]  ;;  %v470_v17 = vor.u32 %v515_v13, %v469_v12  ;;  %v474_v22 = vor.u32 %v514_v14, %v471_v15  ;;  %v461_v23 = vld [vmem:[%s576_s17 + $0x40] sm:$0xf]  ;;  %v513_v24 = vld [vmem:[%s576_s17 + $0x44] sm:$0xf0] }
  0x14   : > { %v260_v18 = vunpack.c.h.b16 %v191_v16  ;;  %v259_v19 = vunpack.c.l.b16 %v191_v16  ;;  %v512_v25 = vld [vmem:[%s576_s17 + $0x44] sm:$0xf]  ;;  %v463_v26 = vld [vmem:[%s576_s17 + $0x48] sm:$0xf0]  ;;  %v493_v31 = vld [vmem:[%s576_s17 + $0x80] sm:$0xf]  ;;  %v462_v33 = vor.u32 %v513_v24, %v461_v23 }
  0x15   : > { %v520_v28 = vld [vmem:[%s576_s17 + $0x84] sm:$0xf]  ;;  %v495_v29 = vld [vmem:[%s576_s17 + $0x88] sm:$0xf0]  ;;  %v521_v32 = vld [vmem:[%s576_s17 + $0x84] sm:$0xf0]  ;;  %v466_v37 = vor.u32 %v512_v25, %v463_v26 }
  0x16   : > { %311 = vmatpush.bf16.msra.mxu0 %v478_v10  ;;  %v280_v27 = vpack.c.b16 %v260_v18, %v260_v18  ;;  %v279_v30 = vpack.c.b16 %v259_v19, %v259_v19  ;;  %v453_v38 = vld [vmem:[%s576_s17 + $0x30] sm:$0xf]  ;;  %v511_v39 = vld [vmem:[%s576_s17 + $0x34] sm:$0xf0]  ;;  %v498_v40 = vor.u32 %v520_v28, %v495_v29  ;;  %v510_v42 = vld [vmem:[%s576_s17 + $0x34] sm:$0xf]  ;;  %v494_v44 = vor.u32 %v521_v32, %v493_v31 }
  0x17   : > { %337 = vmatpush.bf16.msra.mxu2 %v482_v11  ;;  %v455_v43 = vld [vmem:[%s576_s17 + $0x38] sm:$0xf0]  ;;  %v454_v45 = vor.u32 %v511_v39, %v453_v38  ;;  %v445_v48 = vld [vmem:[%s576_s17 + $0x20] sm:$0xf]  ;;  %v509_v49 = vld [vmem:[%s576_s17 + $0x24] sm:$0xf0] }
  0x18   : > { %v308_v34 = vsel %vm303_vm0, %v280_v27, 0  ;;  %v305_v35 = vsel %vm303_vm0, %v279_v30, 0  ;;  %v458_v47 = vor.u32 %v510_v42, %v455_v43  ;;  %v508_v50 = vld [vmem:[%s576_s17 + $0x24] sm:$0xf]  ;;  %v447_v51 = vld [vmem:[%s576_s17 + $0x28] sm:$0xf0]  ;;  %v446_v52 = vor.u32 %v509_v49, %v445_v48 }
  0x19   : > { %355 = vmatpush.bf16.msra.mxu3 %v308_v34  ;;  %329 = vmatpush.bf16.msra.mxu1 %v305_v35  ;;  %v450_v53 = vor.u32 %v508_v50, %v447_v51  ;;  %v437_v54 = vld [vmem:[%s576_s17 + $0x10] sm:$0xf]  ;;  %v507_v55 = vld [vmem:[%s576_s17 + $0x14] sm:$0xf0]  ;;  %v506_v56 = vld [vmem:[%s576_s17 + $0x14] sm:$0xf] }
  0x1a   : > { %312 = vmatpush.bf16.msra.mxu0 %v470_v17  ;;  %v439_v57 = vld [vmem:[%s576_s17 + $0x18] sm:$0xf0]  ;;  %v438_v58 = vor.u32 %v507_v55, %v437_v54  ;;  %v429_v60 = vld [vmem:[%s576_s17] sm:$0xf]  ;;  %v505_v61 = vld [vmem:[%s576_s17 + $0x4] sm:$0xf0] }
  0x1b   : > { %338 = vmatpush.bf16.msra.mxu2 %v474_v22  ;;  %v442_v59 = vor.u32 %v506_v56, %v439_v57  ;;  %v504_v62 = vld [vmem:[%s576_s17 + $0x4] sm:$0xf]  ;;  %v431_v63 = vld [vmem:[%s576_s17 + $0x8] sm:$0xf0]  ;;  %v430_v1 = vor.u32 %v505_v61, %v429_v60 }
  0x1c   : > { %v434_v2 = vor.u32 %v504_v62, %v431_v63 }
  0x1d   : > { %356 = vmatpush.bf16.msra.mxu3 %v498_v40  ;;  %330 = vmatpush.bf16.msra.mxu1 %v494_v44 }
  0x1e   : > { %313 = vmatpush.bf16.msra.mxu0 %v462_v33 }
  0x1f   : > { %339 = vmatpush.bf16.msra.mxu2 %v466_v37 }
  0x20   : > { %500 = vmatmul.msk.bf16.vlgmr.msra.gmra.mxu3 %vm299_vm1, %v202_v46  ;;  %499 = vmatmul.msk.bf16.vlgmr.msra.gmra.mxu1 %vm299_vm1, %v202_v46 }
  0x22   : > { %314 = vmatpush.bf16.msra.mxu0 %v454_v45 }
  0x23   : > { %340 = vmatpush.bf16.msra.mxu2 %v458_v47 }
  0x26   : > { %315 = vmatpush.bf16.msra.mxu0 %v446_v52 }
  0x27   : > { %341 = vmatpush.bf16.msra.mxu2 %v450_v53 }
  0x2a   : > { %316 = vmatpush.bf16.msra.mxu0 %v438_v58 }
  0x2b   : > { %342 = vmatpush.bf16.msra.mxu2 %v442_v59 }
  0x2e   : > { %317 = vmatpush.bf16.msra.mxu0 %v430_v1 }
  0x2f   : > { %343 = vmatpush.bf16.msra.mxu2 %v434_v2 }
  0x31   : > { %318 = vmatmul.bf16.vlgmr.msra.gmra.mxu0 %v201_v3 }
  0x32   : > { %344 = vmatmul.bf16.vlgmr.msra.gmra.mxu2 %v201_v3 }
  0x7f   : > { %v196_v7 = vpop.permute.xlu0 %195 }
  0x9d   : > { %v332_v4 = vpop.f32.mrf.mxu1 }
  0xa3   : > { %v358_v5 = vpop.f32.mrf.mxu3 }
  0xa5   : > { %v334_v6 = vpop.f32.mrf.mxu1 }
  0xab   : > { %v360_v8 = vpop.f32.mrf.mxu3 }
  0xae   : > { %v319_v9 = vpop.f32.mrf.mxu0 }
  0xaf   : > { %v320_v10 = vadd.f32 %v319_v9, %v196_v7 }
  0xb1   : > { %v333_v11 = vadd.f32 %v332_v4, %v320_v10 }
  0xb3   : > { %362 = vst [vmem:[%s170_s25] sm:$0xff] %v333_v11 }
  0xb5   : > { %v345_v12 = vpop.f32.mrf.mxu2 }
  0xb6   : > { %v346_v13 = vadd.f32 %v345_v12, %v196_v7  ;;  %v321_v14 = vpop.f32.mrf.mxu0 }
  0xb8   : > { %v359_v15 = vadd.f32 %v358_v5, %v346_v13 }
  0xba   : > { %363 = vst [vmem:[%s170_s25 + $0x8] sm:$0xff] %v359_v15 }
  0xbd   : > { %v347_v16 = vpop.f32.mrf.mxu2 }
  0xbe PF: > { %s13_s12 = sadd.s32 1, %s539_s12  }
  0xbf   : > { %p10_p4 = scmp.ge.s32.totalorder %s13_s12, 4  }
  0xc1   :  { %12 = sbr.rel (!%p10_p4) target bundleno = 1 (0x1), region = 62 }

// kernel: _lambda_.13
= control target key start
LH: loop header
LB: loop body
LE: loop exit
PB: predicated region body
PF: predicated region fallthrough
CT: control target
= control target key end

     0   :  { %s449_s12 = smov 0   ;;  %s485_s0 = inlined_call_operand.vmem [shape: bf16[16,72], index: 0, kind: input, shape index: {}]   ;;  %s486_s1 = inlined_call_operand.vmem [shape: bf16[2,72,64], index: 1, kind: input, shape index: {}]   ;;  %s487_s2 = inlined_call_operand.vmem [shape: f32[16,1], index: 2, kind: input, shape index: {}]   ;;  %s488_s3 = inlined_call_operand.vmem [shape: f32[2,16,64], index: 3, kind: output, shape index: {}]  }
   0x1 LB: > { %s364_s13 = sadd.s32 4294967295, %s425_s12   ;;  %p368_p0 = scmp.ge.s32.totalorder %s425_s12, 1  ;;  %s425_s12 = sphi %s449_s12, %s13_s12  }
   0x2   : > { %p137_p1 = scmp.lt.s32.totalorder %s425_s12, 3 }
   0x4   : > { %p138_p2 = pnand %p368_p0, %p137_p1 }
   0x5   : > { %p161_p3 = scmp.lt.s32.totalorder (!%p138_p2), %s364_s13, 1 }
   0x6   : > { %141 = sbr.rel (%p138_p2) target bundleno = 444 (0x1bc), region = 32 }
   0xb   : > { %v183_v0 = vld [vmem:[%s487_s2] sm:$0xff]  ;;  %v427_v1 = vmov 0   ;;  %s490_s13 = smov (!%p161_p3, %s364_s13), 1  ;;  %v184_v3 = vld [vmem:[%s487_s2 + $0x8] sm:$0xff]  ;;  %vm231_vm0 = vcmask 1043456   ;;  %vm227_vm1 = vcmask 588800  }
   0xc   : > { %412 = vset.pattern.permute.xlu0 %v427_v1  ;;  %s401_s16 = smul.u32 36, %s490_s13  ;;  %v396_v11 = vld [vmem:[%s485_s0] sm:$0xff]  ;;  %vm249_vm2 = vcmask 523264   ;;  %v428_v20 = vmov 64.0   ;;  %s395_s24 = sshll.u32 %s490_s13, 4 }
   0xd   : > { %187 = vperm.xlu0 %412, %v183_v0   ;;  %413 = vrcp.f32 %v428_v20  ;;  %s170_s27 = scalar_lea.vmem %s488_s3, %s395_s24 }
   0xe   : > { %s165_s19 = scalar_lea.vmem %s486_s1, %s401_s16 }
   0xf   : > { %v182_v2 = vld [vmem:[%s165_s19 + $0x20] sm:$0xf]  ;;  %v400_v7 = vld [vmem:[%s165_s19 + $0x18] sm:$0xff]  ;;  %v399_v8 = vld [vmem:[%s165_s19 + $0x10] sm:$0xff] }
  0x10   : > { %v217_v4 = vunpack.c.l.b16 %v182_v2  ;;  %v398_v9 = vld [vmem:[%s165_s19 + $0x8] sm:$0xff]  ;;  %v397_v10 = vld [vmem:[%s165_s19] sm:$0xff] }
  0x12   : > { %v222_v5 = vpack.c.b16 %v217_v4, %v217_v4 }
  0x13   : > { %v414_v21 = vpop.eup %413 }
  0x14   : > { %v233_v6 = vsel %vm231_vm0, %v222_v5, 0  ;;  %v257_v22 = vmul.f32 64.0, %v414_v21  ;;  %vm261_vm3 = vweird.f32 %v414_v21 }
  0x15   : > { %192 = vperm.xlu0 %412, %v184_v3   ;;  %238 = vmatpush.bf16.msra.mxu0 %v233_v6 }
  0x16   : > { %v258_v23 = vsub.f32 1.0, %v257_v22 }
  0x18   : > { %v259_v24 = vmul.f32 %v414_v21, %v258_v23 }
  0x19   : > { %239 = vmatpush.bf16.msra.mxu0 %v400_v7 }
  0x1a   : > { %v260_v25 = vadd.f32 %v414_v21, %v259_v24 }
  0x1c   : > { %v262_v26 = vsel %vm261_vm3, %v414_v21, %v260_v25 }
  0x1d   : > { %240 = vmatpush.bf16.msra.mxu0 %v399_v8 }
  0x21   : > { %241 = vmatpush.bf16.msra.mxu0 %v398_v9 }
  0x25   : > { %242 = vmatpush.bf16.msra.mxu0 %v397_v10 }
  0x28   : > { %392 = vmatmul.msk.bf16.vlgmr.msra.gmra.mxu0 %vm227_vm1, %v396_v11 }
  0x7f   : > { %v188_v12 = vpop.permute.xlu0 %187 }
  0x87   : > { %v193_v16 = vpop.permute.xlu0 %192 }
  0xa5   : > { %v244_v13 = vpop.f32.mrf.mxu0 }
  0xa6   : > { %v245_v14 = vadd.f32 %v244_v13, %v188_v12 }
  0xa8   : > { %v250_v15 = vsel %vm249_vm2, %v245_v14, 0.0 }
  0xa9   : > { %251 = vadd.xlane.f32.xlu1 %v250_v15 }
  0xad   : > { %v246_v17 = vpop.f32.mrf.mxu0 }
  0xae   : > { %v247_v18 = vadd.f32 %v246_v17, %v193_v16 }
  0xb0   : > { %v253_v19 = vsel %vm249_vm2, %v247_v18, 0.0 }
  0xb1   : > { %254 = vadd.xlane.f32.xlu1 %v253_v19 }
 0x11c   : > { %v252_v27 = vpop.xlane.xlu1 %251 }
 0x11d   : > { %v263_v28 = vmul.f32 %v262_v26, %v252_v27 }
 0x11f   : > { %v265_v29 = vsub.f32 %v245_v14, %v263_v28 }
 0x121   : > { %v267_v30 = vmul.f32 %v265_v29, %v265_v29 }
 0x123   : > { %v269_v31 = vsel %vm249_vm2, %v267_v30, 0.0 }
 0x124   : > { %270 = vadd.xlane.f32.xlu2 %v269_v31  ;;  %v255_v32 = vpop.xlane.xlu1 %254 }
 0x125   : > { %v264_v33 = vmul.f32 %v262_v26, %v255_v32 }
 0x127   : > { %v266_v34 = vsub.f32 %v247_v18, %v264_v33 }
 0x129   : > { %v268_v35 = vmul.f32 %v266_v34, %v266_v34 }
 0x12b   : > { %v272_v36 = vsel %vm249_vm2, %v268_v35, 0.0 }
 0x12c   : > { %273 = vadd.xlane.f32.xlu2 %v272_v36 }
 0x197   : > { %v271_v37 = vpop.xlane.xlu2 %270 }
 0x198   : > { %v275_v38 = vmul.f32 %v271_v37, %v262_v26 }
 0x19a   : > { %v277_v39 = vadd.f32 1e-05, %v275_v38 }
 0x19c   : > { %415 = vrsqrt.f32 %v277_v39  ;;  %vm285_vm5 = vweird.f32 %v277_v39 }
 0x19f   : > { %v274_v40 = vpop.xlane.xlu2 %273 }
 0x1a0   : > { %v276_v41 = vmul.f32 %v274_v40, %v262_v26 }
 0x1a2   : > { %v416_v42 = vpop.eup %415  ;;  %v278_v43 = vadd.f32 1e-05, %v276_v41 }
 0x1a3   : > { %v280_v44 = vmul.f32 %v416_v42, %v277_v39  ;;  %vm286_vm4 = vweird.f32 %v416_v42 }
 0x1a4   : > { %417 = vrsqrt.f32 %v278_v43  ;;  %vm287_vm6 = vmor %vm285_vm5, %vm286_vm4  ;;  %vm295_vm9 = vweird.f32 %v278_v43 }
 0x1a5   : > { %v281_v45 = vmul.f32 %v416_v42, %v280_v44 }
 0x1a7   : > { %v282_v46 = vmul.f32 0.5, %v281_v45 }
 0x1a9   : > { %v283_v47 = vsub.f32 1.5, %v282_v46 }
 0x1aa   : > { %v418_v48 = vpop.eup %417 }
 0x1ab   : > { %v284_v49 = vmul.f32 %v416_v42, %v283_v47  ;;  %v290_v50 = vmul.f32 %v418_v48, %v278_v43  ;;  %vm296_vm8 = vweird.f32 %v418_v48 }
 0x1ac   : > { %vm297_vm10 = vmor %vm295_vm9, %vm296_vm8 }
 0x1ad   : > { %v288_v51 = vsel %vm287_vm6, %v416_v42, %v284_v49  ;;  %v291_v52 = vmul.f32 %v418_v48, %v290_v50 }
 0x1ae   : > { %v299_v53 = vmul.f32 %v288_v51, %v265_v29 }
 0x1af   : > { %v292_v54 = vmul.f32 0.5, %v291_v52 }
 0x1b0   : > { %vm301_vm7 = vcmp.ge.f32.partialorder %v299_v53, 0.0  ;;  %v303_v55 = vmul.f32 0.2, %v299_v53 }
 0x1b1   : > { %v293_v56 = vsub.f32 1.5, %v292_v54 }
 0x1b2   : > { %v305_v57 = vsel %vm301_vm7, %v299_v53, %v303_v55 }
 0x1b3   : > { %307 = vst.msk [vmem:[%s170_s27] sm:$0xff] %vm249_vm2, %v305_v57  ;;  %v294_v58 = vmul.f32 %v418_v48, %v293_v56 }
 0x1b5   : > { %v298_v59 = vsel %vm297_vm10, %v418_v48, %v294_v58 }
 0x1b6   : > { %v300_v60 = vmul.f32 %v298_v59, %v266_v34 }
 0x1b8   : > { %vm302_vm11 = vcmp.ge.f32.partialorder %v300_v60, 0.0  ;;  %v304_v61 = vmul.f32 0.2, %v300_v60 }
 0x1ba   : > { %v306_v62 = vsel %vm302_vm11, %v300_v60, %v304_v61 }
 0x1bb   : > { %308 = vst.msk [vmem:[%s170_s27 + $0x8] sm:$0xff] %vm249_vm2, %v306_v62 }
 0x1bc PF: > { %s13_s12 = sadd.s32 1, %s425_s12  }
 0x1bd   : > { %p10_p4 = scmp.ge.s32.totalorder %s13_s12, 4  }
 0x1bf   :  { %12 = sbr.rel (!%p10_p4) target bundleno = 1 (0x1), region = 62 }

// kernel: _lambda_.14
= control target key start
LH: loop header
LB: loop body
LE: loop exit
PB: predicated region body
PF: predicated region fallthrough
CT: control target
= control target key end

     0   :  { %s640_s12 = smov 0   ;;  %s738_s0 = inlined_call_operand.vmem [shape: bf16[32,144], index: 0, kind: input, shape index: {}]   ;;  %s739_s1 = inlined_call_operand.vmem [shape: bf16[2,144,16], index: 1, kind: input, shape index: {}]   ;;  %s740_s2 = inlined_call_operand.vmem [shape: f32[32,1], index: 2, kind: input, shape index: {}]   ;;  %s741_s3 = inlined_call_operand.vmem [shape: f32[2,32,16], index: 3, kind: output, shape index: {}]  }
   0x1 LB: > { %s501_s13 = sadd.s32 4294967295, %s616_s12   ;;  %p505_p0 = scmp.ge.s32.totalorder %s616_s12, 1  ;;  %s616_s12 = sphi %s640_s12, %s13_s12  }
   0x2   : > { %p137_p1 = scmp.lt.s32.totalorder %s616_s12, 3 }
   0x4   : > { %p138_p2 = pnand %p505_p0, %p137_p1 }
   0x5   : > { %p161_p3 = scmp.lt.s32.totalorder (!%p138_p2), %s501_s13, 1 }
   0x6   : > { %141 = sbr.rel (%p138_p2) target bundleno = 469 (0x1d5), region = 32 }
   0xb   : > { %s743_s13 = smov (!%p161_p3, %s501_s13), 1  ;;  %v566_v1 = vld [vmem:[%s738_s0 + $0x4] sm:$0xf]  ;;  %v513_v2 = vld [vmem:[%s738_s0 + $0x8] sm:$0xf0]  ;;  %v618_v6 = vmov 0  }
   0xc   : > { %s587_s14 = smul.u32 72, %s743_s13  ;;  %v516_v5 = vor.u32 %v566_v1, %v513_v2  ;;  %598 = vset.pattern.permute.xlu0 %v618_v6  ;;  %v194_v7 = vld [vmem:[%s740_s2] sm:$0xff]  ;;  %vm290_vm0 = vcmask 130048   ;;  %599 = vset.pattern.permute.xlu1 %v618_v6  ;;  %v196_v8 = vld [vmem:[%s740_s2 + $0x10] sm:$0xff]  ;;  %v195_v10 = vld [vmem:[%s740_s2 + $0x8] sm:$0xff]  ;;  %v619_v50 = vmov 16.0  }
   0xd   : > { %200 = vperm.xlu0 %598, %v194_v7   ;;  %210 = vperm.xlu1 %599, %v196_v8   ;;  %v197_v12 = vld [vmem:[%s740_s2 + $0x18] sm:$0xff]  ;;  %v568_v14 = vld [vmem:[%s738_s0 + $0x14] sm:$0xf]  ;;  %v511_v19 = vld [vmem:[%s738_s0] sm:$0xf]  ;;  %600 = vrcp.f32 %v619_v50 }
   0xe   : > { %s654_s17 = scalar_lea.vmem %s739_s1, %s587_s14  ;;  %v521_v15 = vld [vmem:[%s738_s0 + $0x18] sm:$0xf0]  ;;  %v567_v20 = vld [vmem:[%s738_s0 + $0x4] sm:$0xf0]  ;;  %v519_v22 = vld [vmem:[%s738_s0 + $0x10] sm:$0xf] }
   0xf   : > { %v577_v0 = vld [vmem:[%s654_s17 + $0x38] sm:$0xff]  ;;  %v578_v3 = vld [vmem:[%s654_s17 + $0x40] sm:$0xff]  ;;  %v576_v4 = vld [vmem:[%s654_s17 + $0x30] sm:$0xff]  ;;  %v524_v17 = vor.u32 %v568_v14, %v521_v15  ;;  %v512_v24 = vor.u32 %v567_v20, %v511_v19 }
  0x10   : > { %297 = vmatpush.bf16.msra.mxu0 %v577_v0  ;;  %579 = vmatpush.bf16.msra.mxu2 %v577_v0  ;;  %v575_v9 = vld [vmem:[%s654_s17 + $0x28] sm:$0xff]  ;;  %v574_v11 = vld [vmem:[%s654_s17 + $0x20] sm:$0xff]  ;;  %v573_v13 = vld [vmem:[%s654_s17 + $0x18] sm:$0xff] }
  0x11   : > { %323 = vmatpush.bf16.msra.mxu1 %v578_v3  ;;  %v572_v16 = vld [vmem:[%s654_s17 + $0x10] sm:$0xff]  ;;  %v571_v18 = vld [vmem:[%s654_s17 + $0x8] sm:$0xff]  ;;  %v570_v21 = vld [vmem:[%s654_s17] sm:$0xff]  ;;  %s565_s17 = sshll.u32 %s743_s13, 5 }
  0x12   : > { %v569_v23 = vld [vmem:[%s738_s0 + $0x14] sm:$0xf0]  ;;  %s723_s20 = scalar_lea.vmem %s741_s3, %s565_s17 }
  0x13   : > { %v520_v25 = vor.u32 %v569_v23, %v519_v22  ;;  %v601_v51 = vpop.eup %600 }
  0x14   : > { %298 = vmatpush.bf16.msra.mxu0 %v576_v4  ;;  %580 = vmatpush.bf16.msra.mxu2 %v576_v4  ;;  %v348_v52 = vmul.f32 16.0, %v601_v51  ;;  %vm352_vm1 = vweird.f32 %v601_v51 }
  0x15   : > { %561 = vmatmul.msk.bf16.vlgmr.msra.gmra.mxu1 %vm290_vm0, %v516_v5  ;;  %205 = vperm.xlu0 %598, %v195_v10  }
  0x16   : > { %215 = vperm.xlu1 %599, %v197_v12   ;;  %v349_v53 = vsub.f32 1.0, %v348_v52 }
  0x18   : > { %299 = vmatpush.bf16.msra.mxu0 %v575_v9  ;;  %581 = vmatpush.bf16.msra.mxu2 %v575_v9  ;;  %v350_v54 = vmul.f32 %v601_v51, %v349_v53 }
  0x1a   : > { %v351_v55 = vadd.f32 %v601_v51, %v350_v54 }
  0x1c   : > { %300 = vmatpush.bf16.msra.mxu0 %v574_v11  ;;  %582 = vmatpush.bf16.msra.mxu2 %v574_v11  ;;  %v353_v56 = vsel %vm352_vm1, %v601_v51, %v351_v55 }
  0x20   : > { %301 = vmatpush.bf16.msra.mxu0 %v573_v13  ;;  %583 = vmatpush.bf16.msra.mxu2 %v573_v13 }
  0x24   : > { %302 = vmatpush.bf16.msra.mxu0 %v572_v16  ;;  %584 = vmatpush.bf16.msra.mxu2 %v572_v16 }
  0x25   : > { %562 = vmatmul.msk.bf16.gmra.mxu1 %vm290_vm0, %v524_v17 }
  0x28   : > { %303 = vmatpush.bf16.msra.mxu0 %v571_v18  ;;  %585 = vmatpush.bf16.msra.mxu2 %v571_v18 }
  0x2c   : > { %304 = vmatpush.bf16.msra.mxu0 %v570_v21  ;;  %586 = vmatpush.bf16.msra.mxu2 %v570_v21 }
  0x2f   : > { %305 = vmatmul.bf16.vlgmr.msra.gmra.mxu0 %v512_v24  ;;  %310 = vmatmul.bf16.vlgmr.msra.gmra.mxu2 %v520_v25 }
  0x7f   : > { %v201_v28 = vpop.permute.xlu0 %200  ;;  %v211_v32 = vpop.permute.xlu1 %210 }
  0x87   : > { %v206_v37 = vpop.permute.xlu0 %205 }
  0x88   : > { %v216_v44 = vpop.permute.xlu1 %215 }
  0x92   : > { %v325_v26 = vpop.f32.mrf.mxu1 }
  0x9a   : > { %v327_v27 = vpop.f32.mrf.mxu1 }
  0xa2   : > { %v330_v34 = vpop.f32.mrf.mxu1 }
  0xaa   : > { %v332_v47 = vpop.f32.mrf.mxu1 }
  0xac   : > { %v306_v29 = vpop.f32.mrf.mxu0 }
  0xad   : > { %v307_v30 = vadd.f32 %v306_v29, %v201_v28 }
  0xaf   : > { %v326_v31 = vadd.f32 %v325_v26, %v307_v30 }
  0xb1   : > { %v335_v33 = vsel %vm290_vm0, %v326_v31, 0.0 }
  0xb2   : > { %v311_v35 = vpop.f32.mrf.mxu2  ;;  %336 = vadd.xlane.f32.xlu2 %v335_v33 }
  0xb3   : > { %v312_v36 = vadd.f32 %v311_v35, %v211_v32 }
  0xb4   : > { %v308_v38 = vpop.f32.mrf.mxu0 }
  0xb5   : > { %v309_v39 = vadd.f32 %v308_v38, %v206_v37  ;;  %v331_v40 = vadd.f32 %v330_v34, %v312_v36 }
  0xb7   : > { %v341_v41 = vsel %vm290_vm0, %v331_v40, 0.0  ;;  %v328_v42 = vadd.f32 %v327_v27, %v309_v39 }
  0xb8   : > { %342 = vadd.xlane.f32.xlu0 %v341_v41 }
  0xb9   : > { %v338_v43 = vsel %vm290_vm0, %v328_v42, 0.0 }
  0xba   : > { %v313_v45 = vpop.f32.mrf.mxu2  ;;  %339 = vadd.xlane.f32.xlu2 %v338_v43 }
  0xbb   : > { %v314_v46 = vadd.f32 %v313_v45, %v216_v44 }
  0xbd   : > { %v333_v48 = vadd.f32 %v332_v47, %v314_v46 }
  0xbf   : > { %v344_v49 = vsel %vm290_vm0, %v333_v48, 0.0 }
  0xc0   : > { %345 = vadd.xlane.f32.xlu1 %v344_v49 }
 0x125   : > { %v337_v57 = vpop.xlane.xlu2 %336 }
 0x126   : > { %v354_v58 = vmul.f32 %v353_v56, %v337_v57 }
 0x128   : > { %v358_v59 = vsub.f32 %v326_v31, %v354_v58 }
 0x12a   : > { %v362_v60 = vmul.f32 %v358_v59, %v358_v59 }
 0x12b   : > { %v343_v61 = vpop.xlane.xlu0 %342 }
 0x12c   : > { %v356_v62 = vmul.f32 %v353_v56, %v343_v61  ;;  %v366_v63 = vsel %vm290_vm0, %v362_v60, 0.0 }
 0x12d   : > { %367 = vadd.xlane.f32.xlu2 %v366_v63  ;;  %v340_v0 = vpop.xlane.xlu2 %339 }
 0x12e   : > { %v360_v1 = vsub.f32 %v331_v40, %v356_v62  ;;  %v355_v2 = vmul.f32 %v353_v56, %v340_v0 }
 0x130   : > { %v364_v3 = vmul.f32 %v360_v1, %v360_v1  ;;  %v708_v4 = vsub.f32 %v328_v42, %v355_v2 }
 0x132   : > { %v372_v5 = vsel %vm290_vm0, %v364_v3, 0.0  ;;  %v363_v8 = vmul.f32 %v708_v4, %v708_v4 }
 0x133   : > { %v346_v6 = vpop.xlane.xlu1 %345 }
 0x134   : > { %v357_v7 = vmul.f32 %v353_v56, %v346_v6  ;;  %v369_v10 = vsel %vm290_vm0, %v363_v8, 0.0 }
 0x135   : > { %373 = vadd.xlane.f32.xlu2 %v372_v5 }
 0x136   : > { %v713_v9 = vsub.f32 %v333_v48, %v357_v7 }
 0x138   : > { %v365_v11 = vmul.f32 %v713_v9, %v713_v9 }
 0x13a   : > { %v375_v12 = vsel %vm290_vm0, %v365_v11, 0.0 }
 0x13d   : > { %370 = vadd.xlane.f32.xlu2 %v369_v10 }
 0x145   : > { %376 = vadd.xlane.f32.xlu2 %v375_v12 }
 0x1a0   : > { %v368_v13 = vpop.xlane.xlu2 %367 }
 0x1a1   : > { %v378_v14 = vmul.f32 %v368_v13, %v353_v56 }
 0x1a3   : > { %v382_v15 = vadd.f32 1e-05, %v378_v14 }
 0x1a5   : > { %602 = vrsqrt.f32 %v382_v15  ;;  %vm392_vm3 = vweird.f32 %v382_v15 }
 0x1a8   : > { %v374_v16 = vpop.xlane.xlu2 %373 }
 0x1a9   : > { %v380_v17 = vmul.f32 %v374_v16, %v353_v56 }
 0x1ab   : > { %v603_v18 = vpop.eup %602  ;;  %v384_v19 = vadd.f32 1e-05, %v380_v17 }
 0x1ac   : > { %v387_v20 = vmul.f32 %v603_v18, %v382_v15  ;;  %vm393_vm2 = vweird.f32 %v603_v18 }
 0x1ad   : > { %604 = vrsqrt.f32 %v384_v19  ;;  %vm394_vm4 = vmor %vm392_vm3, %vm393_vm2  ;;  %vm412_vm7 = vweird.f32 %v384_v19 }
 0x1ae   : > { %v388_v21 = vmul.f32 %v603_v18, %v387_v20 }
 0x1b0   : > { %v389_v22 = vmul.f32 0.5, %v388_v21  ;;  %v371_v23 = vpop.xlane.xlu2 %370 }
 0x1b1   : > { %v379_v24 = vmul.f32 %v371_v23, %v353_v56 }
 0x1b2   : > { %v390_v25 = vsub.f32 1.5, %v389_v22 }
 0x1b3   : > { %v605_v26 = vpop.eup %604  ;;  %v383_v27 = vadd.f32 1e-05, %v379_v24 }
 0x1b4   : > { %v391_v28 = vmul.f32 %v603_v18, %v390_v25  ;;  %v407_v29 = vmul.f32 %v605_v26, %v384_v19  ;;  %vm413_vm6 = vweird.f32 %v605_v26 }
 0x1b5   : > { %606 = vrsqrt.f32 %v383_v27  ;;  %vm414_vm8 = vmor %vm412_vm7, %vm413_vm6  ;;  %vm402_vm11 = vweird.f32 %v383_v27 }
 0x1b6   : > { %v395_v30 = vsel %vm394_vm4, %v603_v18, %v391_v28  ;;  %v408_v31 = vmul.f32 %v605_v26, %v407_v29 }
 0x1b7   : > { %v426_v32 = vmul.f32 %v395_v30, %v358_v59 }
 0x1b8   : > { %v409_v33 = vmul.f32 0.5, %v408_v31  ;;  %v377_v34 = vpop.xlane.xlu2 %376 }
 0x1b9   : > { %vm430_vm5 = vcmp.ge.f32.partialorder %v426_v32, 0.0  ;;  %v434_v35 = vmul.f32 0.2, %v426_v32  ;;  %v381_v36 = vmul.f32 %v377_v34, %v353_v56 }
 0x1ba   : > { %v410_v37 = vsub.f32 1.5, %v409_v33 }
 0x1bb   : > { %v607_v38 = vpop.eup %606  ;;  %v438_v39 = vsel %vm430_vm5, %v426_v32, %v434_v35  ;;  %v385_v40 = vadd.f32 1e-05, %v381_v36 }
 0x1bc   : > { %442 = vst.msk [vmem:[%s723_s20] sm:$0xff] %vm290_vm0, %v438_v39  ;;  %v411_v41 = vmul.f32 %v605_v26, %v410_v37  ;;  %v397_v42 = vmul.f32 %v607_v38, %v383_v27  ;;  %vm403_vm10 = vweird.f32 %v607_v38 }
 0x1bd   : > { %608 = vrsqrt.f32 %v385_v40  ;;  %vm404_vm12 = vmor %vm402_vm11, %vm403_vm10  ;;  %vm422_vm15 = vweird.f32 %v385_v40 }
 0x1be   : > { %v415_v43 = vsel %vm414_vm8, %v605_v26, %v411_v41  ;;  %v398_v44 = vmul.f32 %v607_v38, %v397_v42 }
 0x1bf   : > { %v428_v45 = vmul.f32 %v415_v43, %v360_v1 }
 0x1c0   : > { %v399_v46 = vmul.f32 0.5, %v398_v44 }
 0x1c1   : > { %vm432_vm9 = vcmp.ge.f32.partialorder %v428_v45, 0.0  ;;  %v436_v47 = vmul.f32 0.2, %v428_v45 }
 0x1c2   : > { %v400_v48 = vsub.f32 1.5, %v399_v46 }
 0x1c3   : > { %v609_v49 = vpop.eup %608  ;;  %v440_v50 = vsel %vm432_vm9, %v428_v45, %v436_v47 }
 0x1c4   : > { %444 = vst.msk [vmem:[%s723_s20 + $0x10] sm:$0xff] %vm290_vm0, %v440_v50  ;;  %v401_v51 = vmul.f32 %v607_v38, %v400_v48  ;;  %v417_v52 = vmul.f32 %v609_v49, %v385_v40  ;;  %vm423_vm14 = vweird.f32 %v609_v49 }
 0x1c5   : > { %vm424_vm1 = vmor %vm422_vm15, %vm423_vm14 }
 0x1c6   : > { %v405_v53 = vsel %vm404_vm12, %v607_v38, %v401_v51  ;;  %v418_v54 = vmul.f32 %v609_v49, %v417_v52 }
 0x1c7   : > { %v427_v55 = vmul.f32 %v405_v53, %v708_v4 }
 0x1c8   : > { %v419_v56 = vmul.f32 0.5, %v418_v54 }
 0x1c9   : > { %vm431_vm13 = vcmp.ge.f32.partialorder %v427_v55, 0.0  ;;  %v435_v57 = vmul.f32 0.2, %v427_v55 }
 0x1ca   : > { %v420_v58 = vsub.f32 1.5, %v419_v56 }
 0x1cb   : > { %v439_v59 = vsel %vm431_vm13, %v427_v55, %v435_v57 }
 0x1cc   : > { %443 = vst.msk [vmem:[%s723_s20 + $0x8] sm:$0xff] %vm290_vm0, %v439_v59  ;;  %v421_v60 = vmul.f32 %v609_v49, %v420_v58 }
 0x1ce   : > { %v425_v61 = vsel %vm424_vm1, %v609_v49, %v421_v60 }
 0x1cf   : > { %v429_v62 = vmul.f32 %v425_v61, %v713_v9 }
 0x1d1   : > { %vm433_vm2 = vcmp.ge.f32.partialorder %v429_v62, 0.0  ;;  %v437_v63 = vmul.f32 0.2, %v429_v62 }
 0x1d3   : > { %v441_v0 = vsel %vm433_vm2, %v429_v62, %v437_v63 }
 0x1d4   : > { %445 = vst.msk [vmem:[%s723_s20 + $0x18] sm:$0xff] %vm290_vm0, %v441_v0 }
 0x1d5 PF: > { %s13_s12 = sadd.s32 1, %s616_s12  }
 0x1d6   : > { %p10_p4 = scmp.ge.s32.totalorder %s13_s12, 4  }
 0x1d8   :  { %12 = sbr.rel (!%p10_p4) target bundleno = 1 (0x1), region = 62 }

// kernel: _lambda_.15
= control target key start
LH: loop header
LB: loop body
LE: loop exit
PB: predicated region body
PF: predicated region fallthrough
CT: control target
= control target key end

     0   :  { %s796_s18 = smov 0   ;;  %s968_s0 = inlined_call_operand.vmem [shape: bf16[96,16], index: 0, kind: input, shape index: {}]   ;;  %s969_s1 = inlined_call_operand.vmem [shape: bf16[2,16,16], index: 1, kind: input, shape index: {}]   ;;  %s970_s2 = inlined_call_operand.vmem [shape: f32[96,1], index: 2, kind: input, shape index: {}]   ;;  %s971_s3 = inlined_call_operand.vmem [shape: f32[2,32,16], index: 3, kind: input, shape index: {}]   ;;  %s972_s4 = inlined_call_operand.vmem [shape: f32[2,32,16], index: 4, kind: output, shape index: {0}]   ;;  %s973_s5 = inlined_call_operand.vmem [shape: f32[2,32,16], index: 5, kind: output, shape index: {1}]  }
   0x1 LB: > { %s670_s19 = sadd.s32 4294967295, %s762_s18   ;;  %p674_p0 = scmp.ge.s32.totalorder %s762_s18, 1  ;;  %s762_s18 = sphi %s796_s18, %s16_s18  }
   0x2   : > { %p200_p1 = scmp.lt.s32.totalorder %s762_s18, 3 }
   0x4   : > { %p201_p2 = pnand %p674_p0, %p200_p1 }
   0x5   : > { %p238_p3 = scmp.lt.s32.totalorder (!%p201_p2), %s670_s19, 1 }
   0x6   : > { %204 = sbr.rel (%p201_p2) target bundleno = 370 (0x172), region = 36 }
   0xb   : > { %v764_v0 = vmov 0   ;;  %s975_s19 = smov (!%p238_p3, %s670_s19), 1  ;;  %vm381_vm0 = vcmask 130048   ;;  %v724_v6 = vld [vmem:[%s968_s0 + $0x8] sm:$0xff]  ;;  %v273_v7 = vld [vmem:[%s970_s2] sm:$0xff]  ;;  %v276_v14 = vld [vmem:[%s970_s2 + $0x18] sm:$0xff] }
   0xc   : > { %745 = vset.pattern.permute.xlu1 %v764_v0  ;;  %743 = vset.pattern.permute.xlu2 %v764_v0  ;;  %s804_s20 = sshll.u32 %s975_s19, 5  ;;  %s719_s21 = sshll.u32 %s975_s19, 3  ;;  %v723_v8 = vld [vmem:[%s968_s0] sm:$0xff]  ;;  %v274_v13 = vld [vmem:[%s970_s2 + $0x8] sm:$0xff]  ;;  %v726_v15 = vld [vmem:[%s968_s0 + $0x18] sm:$0xff]  ;;  %v765_v17 = vmov 16.0  }
   0xd   : > { %744 = vset.pattern.permute.xlu0 %v764_v0  ;;  %s247_s24 = scalar_lea.vmem %s971_s3, %s804_s20  ;;  %s242_s27 = scalar_lea.vmem %s969_s1, %s719_s21  ;;  %287 = vperm.xlu2 %743, %v273_v7   ;;  %v725_v16 = vld [vmem:[%s968_s0 + $0x10] sm:$0xff]  ;;  %746 = vrcp.f32 %v765_v17  ;;  %v727_v20 = vld [vmem:[%s968_s0 + $0x20] sm:$0xff]  ;;  %v728_v34 = vld [vmem:[%s968_s0 + $0x28] sm:$0xff] }
   0xe   : > { %v439_v1 = vld [vmem:[%s247_s24] sm:$0xff]  ;;  %v810_v2 = vld [vmem:[%s247_s24 + $0x10] sm:$0xff]  ;;  %v440_v9 = vld [vmem:[%s247_s24 + $0x8] sm:$0xff]  ;;  %s927_s19 = scalar_lea.vmem %s973_s5, %s804_s20  ;;  %s938_s23 = scalar_lea.vmem %s972_s4, %s804_s20 }
   0xf   : > { %v443_v3 = vsel %vm381_vm0, %v439_v1, 0.0  ;;  %v449_v4 = vsel %vm381_vm0, %v810_v2, 0.0  ;;  %v729_v5 = vld [vmem:[%s242_s27] sm:$0xff]  ;;  %v827_v10 = vld [vmem:[%s247_s24 + $0x18] sm:$0xff]  ;;  %v446_v11 = vsel %vm381_vm0, %v440_v9, 0.0  ;;  %v275_v21 = vld [vmem:[%s970_s2 + $0x10] sm:$0xff] }
  0x10   : > { %444 = vadd.xlane.f32.xlu0 %v443_v3  ;;  %450 = vadd.xlane.f32.xlu1 %v449_v4  ;;  %v452_v12 = vsel %vm381_vm0, %v827_v10, 0.0  ;;  %v277_v24 = vld [vmem:[%s970_s2 + $0x20] sm:$0xff]  ;;  %v279_v35 = vld [vmem:[%s970_s2 + $0x30] sm:$0xff]  ;;  %v280_v40 = vld [vmem:[%s970_s2 + $0x38] sm:$0xff] }
  0x11   : > { %730 = vmatpush.bf16.msra.mxu1 %v729_v5  ;;  %407 = vmatpush.bf16.msra.mxu0 %v729_v5  ;;  %v281_v39 = vld [vmem:[%s970_s2 + $0x40] sm:$0xff]  ;;  %v278_v41 = vld [vmem:[%s970_s2 + $0x28] sm:$0xff]  ;;  %v283_v43 = vld [vmem:[%s970_s2 + $0x50] sm:$0xff] }
  0x12   : > { %731 = vmatpush.bf16.msra.mxu2 %v729_v5  ;;  %732 = vmatpush.bf16.msra.mxu3 %v729_v5  ;;  %v282_v42 = vld [vmem:[%s970_s2 + $0x48] sm:$0xff]  ;;  %v284_v55 = vld [vmem:[%s970_s2 + $0x58] sm:$0xff] }
  0x13   : > { %v747_v18 = vpop.eup %746 }
  0x14   : > { %712 = vmatmul.msk.bf16.vlgmr.msra.gmra.mxu1 %vm381_vm0, %v724_v6  ;;  %711 = vmatmul.msk.bf16.vlgmr.msra.gmra.mxu0 %vm381_vm0, %v723_v8  ;;  %v456_v19 = vmul.f32 16.0, %v747_v18  ;;  %vm460_vm1 = vweird.f32 %v747_v18 }
  0x15   : > { %292 = vperm.xlu2 %743, %v274_v13   ;;  %714 = vmatmul.msk.bf16.vlgmr.msra.gmra.mxu2 %vm381_vm0, %v726_v15 }
  0x16   : > { %v457_v22 = vsub.f32 1.0, %v456_v19  ;;  %716 = vmatmul.msk.bf16.vlgmr.msra.gmra.mxu3 %vm381_vm0, %v728_v34 }
  0x18   : > { %447 = vadd.xlane.f32.xlu0 %v446_v11  ;;  %453 = vadd.xlane.f32.xlu1 %v452_v12  ;;  %v458_v23 = vmul.f32 %v747_v18, %v457_v22 }
  0x1a   : > { %v459_v25 = vadd.f32 %v747_v18, %v458_v23 }
  0x1c   : > { %v858_v26 = vsel %vm460_vm1, %v747_v18, %v459_v25 }
  0x24   : > { %713 = vmatmul.msk.bf16.gmra.mxu1 %vm381_vm0, %v725_v16 }
  0x25   : > { %715 = vmatmul.msk.bf16.gmra.mxu2 %vm381_vm0, %v727_v20 }
  0x2c   : > { %297 = vperm.xlu0 %744, %v275_v21  }
  0x31   : > { %302 = vperm.xlu1 %745, %v276_v14  }
  0x34   : > { %307 = vperm.xlu0 %744, %v277_v24  }
  0x3c   : > { %317 = vperm.xlu0 %744, %v279_v35  }
  0x44   : > { %327 = vperm.xlu0 %744, %v281_v39  }
  0x4c   : > { %337 = vperm.xlu0 %744, %v283_v43  }
  0x67   : > { %v288_v54 = vpop.permute.xlu2 %287 }
  0x6f   : > { %v293_v59 = vpop.permute.xlu2 %292 }
  0x83   : > { %v445_v27 = vpop.xlane.xlu0 %444  ;;  %v451_v44 = vpop.xlane.xlu1 %450 }
  0x84   : > { %v462_v28 = vmul.f32 %v858_v26, %v445_v27  ;;  %v464_v45 = vmul.f32 %v858_v26, %v451_v44 }
  0x86   : > { %v861_v29 = vsub.f32 %v439_v1, %v462_v28  ;;  %v896_v46 = vsub.f32 %v810_v2, %v464_v45 }
  0x88   : > { %v470_v30 = vmul.f32 %v861_v29, %v861_v29  ;;  %v472_v49 = vmul.f32 %v896_v46, %v896_v46 }
  0x8a   : > { %v474_v31 = vsel %vm381_vm0, %v470_v30, 0.0  ;;  %v480_v51 = vsel %vm381_vm0, %v472_v49, 0.0 }
  0x8b   : > { %475 = vadd.xlane.f32.xlu1 %v474_v31  ;;  %v448_v32 = vpop.xlane.xlu0 %447  ;;  %v454_v47 = vpop.xlane.xlu1 %453 }
  0x8c   : > { %v463_v33 = vmul.f32 %v858_v26, %v448_v32  ;;  %v465_v48 = vmul.f32 %v858_v26, %v454_v47 }
  0x8e   : > { %v873_v36 = vsub.f32 %v440_v9, %v463_v33  ;;  %v902_v50 = vsub.f32 %v827_v10, %v465_v48 }
  0x90   : > { %v471_v37 = vmul.f32 %v873_v36, %v873_v36  ;;  %v473_v52 = vmul.f32 %v902_v50, %v902_v50 }
  0x91   : > { %v915_v62 = vpop.f32.mrf.mxu1  ;;  %v409_v11 = vpop.f32.mrf.mxu0 }
  0x92   : > { %v477_v38 = vsel %vm381_vm0, %v471_v37, 0.0  ;;  %v483_v53 = vsel %vm381_vm0, %v473_v52, 0.0  ;;  %v410_v18 = vadd.f32 %v409_v11, %v288_v54 }
  0x93   : > { %478 = vadd.xlane.f32.xlu2 %v477_v38 }
  0x94   : > { %v538_v25 = vadd.f32 1.0, %v410_v18 }
  0x98   : > { %v424_v58 = vpop.f32.mrf.mxu2 }
  0x99   : > { %v921_v7 = vpop.f32.mrf.mxu1  ;;  %v411_v30 = vpop.f32.mrf.mxu0 }
  0x9a   : > { %v412_v35 = vadd.f32 %v411_v30, %v293_v59 }
  0x9c   : > { %v539_v44 = vadd.f32 1.0, %v412_v35 }
  0x9e   : > { %v911_v56 = vpop.permute.xlu0 %297 }
  0xa0   : > { %v426_v1 = vpop.f32.mrf.mxu2 }
  0xa1   : > { %v419_v19 = vpop.f32.mrf.mxu1 }
  0xa3   : > { %v913_v57 = vpop.permute.xlu1 %302 }
  0xa4   : > { %322 = vperm.xlu1 %745, %v280_v40  }
  0xa6   : > { %v308_v61 = vpop.permute.xlu0 %307 }
  0xa7   : > { %v420_v27 = vadd.f32 %v419_v19, %v308_v61  ;;  %v417_v19 = vadd.f32 %v921_v7, %v913_v57 }
  0xa8   : > { %v429_v13 = vpop.f32.mrf.mxu2 }
  0xab   : > { %312 = vperm.xlu2 %743, %v278_v41  }
  0xac   : > { %332 = vperm.xlu1 %745, %v282_v42  }
  0xae   : > { %v318_v3 = vpop.permute.xlu0 %317 }
  0xaf   : > { %v919_v5 = vadd.f32 %v424_v58, %v318_v3  ;;  %v434_v58 = vpop.f32.mrf.mxu3 }
  0xb0   : > { %v431_v42 = vpop.f32.mrf.mxu2 }
  0xb6   : > { %v328_v14 = vpop.permute.xlu0 %327 }
  0xb7   : > { %v430_v15 = vadd.f32 %v429_v13, %v328_v14 }
  0xb9   : > { %566 = vst.msk [vmem:[%s927_s19] sm:$0xff] %vm381_vm0, %v430_v15 }
  0xd6   : > { %481 = vadd.xlane.f32.xlu1 %v480_v51 }
  0xde   : > { %484 = vadd.xlane.f32.xlu1 %v483_v53 }
  0xf7   : > { %342 = vperm.xlu1 %745, %v284_v55   ;;  %v338_v55 = vpop.permute.xlu0 %337 }
  0xfe   : > { %v476_v60 = vpop.xlane.xlu1 %475 }
  0xff   : > { %v486_v63 = vmul.f32 %v476_v60, %v858_v26 }
 0x101   : > { %v490_v0 = vadd.f32 1e-05, %v486_v63 }
 0x103   : > { %748 = vrsqrt.f32 %v490_v0  ;;  %vm500_vm3 = vweird.f32 %v490_v0 }
 0x106   : > { %v479_v2 = vpop.xlane.xlu2 %478 }
 0x107   : > { %v487_v4 = vmul.f32 %v479_v2, %v858_v26 }
 0x109   : > { %v749_v6 = vpop.eup %748  ;;  %v491_v8 = vadd.f32 1e-05, %v487_v4 }
 0x10a   : > { %v495_v9 = vmul.f32 %v749_v6, %v490_v0  ;;  %vm501_vm2 = vweird.f32 %v749_v6 }
 0x10b   : > { %750 = vrsqrt.f32 %v491_v8  ;;  %vm502_vm4 = vmor %vm500_vm3, %vm501_vm2  ;;  %vm510_vm5 = vweird.f32 %v491_v8 }
 0x10c   : > { %v496_v10 = vmul.f32 %v749_v6, %v495_v9 }
 0x10e   : > { %v497_v12 = vmul.f32 0.5, %v496_v10  ;;  %v313_v41 = vpop.permute.xlu2 %312  ;;  %v415_v10 = vadd.f32 %v915_v62, %v911_v56 }
 0x110   : > { %v498_v16 = vsub.f32 1.5, %v497_v12  ;;  %v540_v15 = vadd.f32 1.0, %v415_v10 }
 0x111   : > { %v751_v17 = vpop.eup %750 }
 0x112   : > { %v499_v20 = vmul.f32 %v749_v6, %v498_v16  ;;  %v505_v21 = vmul.f32 %v751_v17, %v491_v8  ;;  %vm511_vm6 = vweird.f32 %v751_v17 }
 0x113   : > { %vm512_vm7 = vmor %vm510_vm5, %vm511_vm6 }
 0x114   : > { %v503_v22 = vsel %vm502_vm4, %v749_v6, %v499_v20  ;;  %v506_v23 = vmul.f32 %v751_v17, %v505_v21 }
 0x115   : > { %v534_v24 = vmul.f32 %v503_v22, %v861_v29  ;;  %v421_v29 = vpop.f32.mrf.mxu1  ;;  %v541_v22 = vadd.f32 1.0, %v417_v19 }
 0x116   : > { %v507_v28 = vmul.f32 0.5, %v506_v23  ;;  %v323_v31 = vpop.permute.xlu1 %322  ;;  %v422_v49 = vadd.f32 %v421_v29, %v313_v41 }
 0x117   : > { %v542_v32 = vmul.f32 %v538_v25, %v534_v24  ;;  %v932_v33 = vadd.f32 %v426_v1, %v323_v31  ;;  %v436_v24 = vpop.f32.mrf.mxu3 }
 0x118   : > { %v508_v34 = vsub.f32 1.5, %v507_v28 }
 0x119   : > { %v546_v37 = vadd.f32 %v542_v32, %v420_v27 }
 0x11a   : > { %v509_v38 = vmul.f32 %v751_v17, %v508_v34 }
 0x11b   : > { %vm550_vm8 = vcmp.ge.f32.partialorder %v546_v37, 0.0  ;;  %v554_v39 = vmul.f32 0.2, %v546_v37 }
 0x11c   : > { %v513_v40 = vsel %vm512_vm7, %v751_v17, %v509_v38 }
 0x11d   : > { %v535_v43 = vmul.f32 %v513_v40, %v873_v36  ;;  %v558_v45 = vsel %vm550_vm8, %v546_v37, %v554_v39  ;;  %v435_v36 = vadd.f32 %v434_v58, %v338_v55 }
 0x11e   : > { %562 = vst.msk [vmem:[%s938_s23] sm:$0xff] %vm381_vm0, %v558_v45  ;;  %v333_v47 = vpop.permute.xlu1 %332 }
 0x11f   : > { %v543_v48 = vmul.f32 %v539_v44, %v535_v43  ;;  %v432_v51 = vadd.f32 %v431_v42, %v333_v47  ;;  %568 = vst.msk [vmem:[%s927_s19 + $0x10] sm:$0xff] %vm381_vm0, %v435_v36 }
 0x121   : > { %v547_v52 = vadd.f32 %v543_v48, %v422_v49  ;;  %567 = vst.msk [vmem:[%s927_s19 + $0x8] sm:$0xff] %vm381_vm0, %v432_v51 }
 0x123   : > { %vm551_vm9 = vcmp.ge.f32.partialorder %v547_v52, 0.0  ;;  %v555_v53 = vmul.f32 0.2, %v547_v52 }
 0x125   : > { %v559_v54 = vsel %vm551_vm9, %v547_v52, %v555_v53 }
 0x126   : > { %563 = vst.msk [vmem:[%s938_s23 + $0x8] sm:$0xff] %vm381_vm0, %v559_v54 }
 0x149   : > { %v482_v59 = vpop.xlane.xlu1 %481 }
 0x14a   : > { %v488_v60 = vmul.f32 %v482_v59, %v858_v26 }
 0x14c   : > { %v492_v61 = vadd.f32 1e-05, %v488_v60 }
 0x14e   : > { %752 = vrsqrt.f32 %v492_v61  ;;  %vm520_vm11 = vweird.f32 %v492_v61 }
 0x151   : > { %v485_v63 = vpop.xlane.xlu1 %484 }
 0x152   : > { %v489_v0 = vmul.f32 %v485_v63, %v858_v26 }
 0x154   : > { %v753_v1 = vpop.eup %752  ;;  %v493_v2 = vadd.f32 1e-05, %v489_v0 }
 0x155   : > { %v515_v3 = vmul.f32 %v753_v1, %v492_v61  ;;  %vm521_vm10 = vweird.f32 %v753_v1 }
 0x156   : > { %754 = vrsqrt.f32 %v493_v2  ;;  %vm522_vm12 = vmor %vm520_vm11, %vm521_vm10  ;;  %vm530_vm14 = vweird.f32 %v493_v2 }
 0x157   : > { %v516_v4 = vmul.f32 %v753_v1, %v515_v3 }
 0x159   : > { %v517_v6 = vmul.f32 0.5, %v516_v4 }
 0x15b   : > { %v518_v8 = vsub.f32 1.5, %v517_v6 }
 0x15c   : > { %v755_v9 = vpop.eup %754 }
 0x15d   : > { %v519_v11 = vmul.f32 %v753_v1, %v518_v8  ;;  %v525_v12 = vmul.f32 %v755_v9, %v493_v2  ;;  %vm531_vm13 = vweird.f32 %v755_v9 }
 0x15e   : > { %vm532_vm1 = vmor %vm530_vm14, %vm531_vm13 }
 0x15f   : > { %v523_v13 = vsel %vm522_vm12, %v753_v1, %v519_v11  ;;  %v526_v14 = vmul.f32 %v755_v9, %v525_v12 }
 0x160   : > { %v536_v26 = vmul.f32 %v523_v13, %v896_v46 }
 0x161   : > { %v527_v16 = vmul.f32 0.5, %v526_v14 }
 0x162   : > { %v544_v17 = vmul.f32 %v540_v15, %v536_v26 }
 0x163   : > { %v528_v18 = vsub.f32 1.5, %v527_v16 }
 0x164   : > { %v548_v20 = vadd.f32 %v544_v17, %v919_v5 }
 0x165   : > { %v529_v56 = vmul.f32 %v755_v9, %v528_v18 }
 0x166   : > { %vm552_vm15 = vcmp.ge.f32.partialorder %v548_v20, 0.0  ;;  %v556_v62 = vmul.f32 0.2, %v548_v20 }
 0x167   : > { %v533_v21 = vsel %vm532_vm1, %v755_v9, %v529_v56 }
 0x168   : > { %v560_v46 = vsel %vm552_vm15, %v548_v20, %v556_v62  ;;  %v537_v23 = vmul.f32 %v533_v21, %v902_v50 }
 0x169   : > { %564 = vst.msk [vmem:[%s938_s23 + $0x10] sm:$0xff] %vm381_vm0, %v560_v46  ;;  %v343_v25 = vpop.permute.xlu1 %342 }
 0x16a   : > { %v545_v27 = vmul.f32 %v541_v22, %v537_v23  ;;  %v437_v57 = vadd.f32 %v436_v24, %v343_v25 }
 0x16c   : > { %v549_v5 = vadd.f32 %v545_v27, %v932_v33  ;;  %569 = vst.msk [vmem:[%s927_s19 + $0x18] sm:$0xff] %vm381_vm0, %v437_v57 }
 0x16e   : > { %vm553_vm2 = vcmp.ge.f32.partialorder %v549_v5, 0.0  ;;  %v557_v7 = vmul.f32 0.2, %v549_v5 }
 0x170   : > { %v561_v28 = vsel %vm553_vm2, %v549_v5, %v557_v7 }
 0x171   : > { %565 = vst.msk [vmem:[%s938_s23 + $0x18] sm:$0xff] %vm381_vm0, %v561_v28 }
 0x172 PF: > { %s16_s18 = sadd.s32 1, %s762_s18  }
 0x173   : > { %p13_p4 = scmp.ge.s32.totalorder %s16_s18, 4  }
 0x175   :  { %15 = sbr.rel (!%p13_p4) target bundleno = 1 (0x1), region = 81 }

// kernel: _lambda_.16
= control target key start
LH: loop header
LB: loop body
LE: loop exit
PB: predicated region body
PF: predicated region fallthrough
CT: control target
= control target key end

     0   :  { %s817_s18 = smov 0   ;;  %s894_s0 = inlined_call_operand.vmem [shape: bf16[16,288], index: 0, kind: input, shape index: {}]   ;;  %s895_s1 = inlined_call_operand.vmem [shape: bf16[2,288,16], index: 1, kind: input, shape index: {}]   ;;  %s896_s2 = inlined_call_operand.vmem [shape: f32[16,1], index: 2, kind: input, shape index: {}]   ;;  %s897_s3 = inlined_call_operand.vmem [shape: f32[2,16,16], index: 3, kind: input, shape index: {}]   ;;  %s898_s4 = inlined_call_operand.vmem [shape: f32[2,16,16], index: 4, kind: input, shape index: {}]   ;;  %s899_s5 = inlined_call_operand.vmem [shape: f32[2,16,16], index: 5, kind: output, shape index: {}]  }
   0x1 LB: > { %s636_s19 = sadd.s32 4294967295, %s783_s18   ;;  %p640_p0 = scmp.ge.s32.totalorder %s783_s18, 1  ;;  %s783_s18 = sphi %s817_s18, %s15_s18  }
   0x2   : > { %p207_p1 = scmp.lt.s32.totalorder %s783_s18, 3 }
   0x4   : > { %p208_p2 = pnand %p640_p0, %p207_p1 }
   0x5   : > { %p245_p3 = scmp.lt.s32.totalorder (!%p208_p2), %s636_s19, 1 }
   0x6   : > { %211 = sbr.rel (%p208_p2) target bundleno = 459 (0x1cb), region = 40 }
   0xb   : > { %s901_s19 = smov (!%p245_p3, %s636_s19), 1  ;;  %v785_v5 = vmov 0   ;;  %v658_v7 = vld [vmem:[%s894_s0 + $0x8] sm:$0xf]  ;;  %v740_v8 = vld [vmem:[%s894_s0 + $0x10] sm:$0xf0] }
   0xc   : > { %s759_s20 = smul.u32 144, %s901_s19  ;;  %770 = vset.pattern.permute.xlu0 %v785_v5  ;;  %v306_v11 = vld [vmem:[%s896_s2] sm:$0xff]  ;;  %v659_v12 = vor.u32 %v740_v8, %v658_v7  ;;  %vm441_vm0 = vcmask 261120   ;;  %v307_v15 = vld [vmem:[%s896_s2 + $0x8] sm:$0xff]  ;;  %v652_v27 = vld [vmem:[%s894_s0 + $0xc] sm:$0xf0] }
   0xd   : > { %310 = vperm.xlu0 %770, %v306_v11   ;;  %v650_v22 = vld [vmem:[%s894_s0] sm:$0xf]  ;;  %v739_v23 = vld [vmem:[%s894_s0 + $0x8] sm:$0xf0]  ;;  %v738_v24 = vld [vmem:[%s894_s0 + $0x4] sm:$0xf] }
   0xe   : > { %s831_s23 = scalar_lea.vmem %s895_s1, %s759_s20  ;;  %v651_v28 = vor.u32 %v739_v23, %v650_v22  ;;  %v655_v29 = vor.u32 %v738_v24, %v652_v27  ;;  %vm487_vm1 = vcmask 130048   ;;  %v786_v46 = vmov 16.0   ;;  %s735_s15 = sshll.u32 %s901_s19, 4 }
   0xf   : > { %v748_v0 = vld [vmem:[%s831_s23 + $0x38] sm:$0xff]  ;;  %v747_v2 = vld [vmem:[%s831_s23 + $0x30] sm:$0xff]  ;;  %v758_v4 = vld [vmem:[%s831_s23 + $0x88] sm:$0xff]  ;;  %771 = vrcp.f32 %v786_v46  ;;  %s254_s20 = scalar_lea.vmem %s897_s3, %s735_s15  ;;  %s264_s25 = scalar_lea.vmem %s899_s5, %s735_s15 }
  0x10   : > { %v756_v1 = vld [vmem:[%s831_s23 + $0x78] sm:$0xff]  ;;  %445 = vmatpush.bf16.msra.mxu0 %v748_v0  ;;  %v755_v3 = vld [vmem:[%s831_s23 + $0x70] sm:$0xff]  ;;  %479 = vmatpush.bf16.msra.mxu2 %v758_v4  ;;  %v757_v6 = vld [vmem:[%s831_s23 + $0x80] sm:$0xff] }
  0x11   : > { %459 = vmatpush.bf16.msra.mxu1 %v756_v1  ;;  %v746_v9 = vld [vmem:[%s831_s23 + $0x28] sm:$0xff]  ;;  %v745_v13 = vld [vmem:[%s831_s23 + $0x20] sm:$0xff]  ;;  %v744_v16 = vld [vmem:[%s831_s23 + $0x18] sm:$0xff] }
  0x12   : > { %v754_v10 = vld [vmem:[%s831_s23 + $0x68] sm:$0xff]  ;;  %v753_v14 = vld [vmem:[%s831_s23 + $0x60] sm:$0xff]  ;;  %v752_v17 = vld [vmem:[%s831_s23 + $0x58] sm:$0xff] }
  0x13   : > { %v743_v18 = vld [vmem:[%s831_s23 + $0x10] sm:$0xff]  ;;  %v742_v20 = vld [vmem:[%s831_s23 + $0x8] sm:$0xff]  ;;  %v741_v25 = vld [vmem:[%s831_s23] sm:$0xff] }
  0x14   : > { %446 = vmatpush.bf16.msra.mxu0 %v747_v2  ;;  %480 = vmatpush.bf16.msra.mxu2 %v757_v6  ;;  %v751_v19 = vld [vmem:[%s831_s23 + $0x50] sm:$0xff]  ;;  %v750_v21 = vld [vmem:[%s831_s23 + $0x48] sm:$0xff]  ;;  %v749_v26 = vld [vmem:[%s831_s23 + $0x40] sm:$0xff]  ;;  %s259_s23 = scalar_lea.vmem %s898_s4, %s735_s15 }
  0x15   : > { %460 = vmatpush.bf16.msra.mxu1 %v755_v3  ;;  %315 = vperm.xlu0 %770, %v307_v15   ;;  %v772_v47 = vpop.eup %771 }
  0x16   : > { %v495_v48 = vmul.f32 16.0, %v772_v47  ;;  %vm499_vm2 = vweird.f32 %v772_v47 }
  0x17   : > { %732 = vmatmul.msk.bf16.vlgmr.msra.gmra.mxu2 %vm441_vm0, %v659_v12 }
  0x18   : > { %447 = vmatpush.bf16.msra.mxu0 %v746_v9  ;;  %v496_v49 = vsub.f32 1.0, %v495_v48  ;;  %v539_v9 = vld [vmem:[%s254_s20] sm:$0xff] }
  0x19   : > { %461 = vmatpush.bf16.msra.mxu1 %v754_v10 }
  0x1a   : > { %v497_v50 = vmul.f32 %v772_v47, %v496_v49 }
  0x1c   : > { %448 = vmatpush.bf16.msra.mxu0 %v745_v13  ;;  %v498_v51 = vadd.f32 %v772_v47, %v497_v50 }
  0x1d   : > { %462 = vmatpush.bf16.msra.mxu1 %v753_v14  ;;  %v541_v14 = vadd.f32 1.0, %v539_v9 }
  0x1e   : > { %v500_v52 = vsel %vm499_vm2, %v772_v47, %v498_v51 }
  0x20   : > { %449 = vmatpush.bf16.msra.mxu0 %v744_v16 }
  0x21   : > { %463 = vmatpush.bf16.msra.mxu1 %v752_v17 }
  0x24   : > { %450 = vmatpush.bf16.msra.mxu0 %v743_v18  ;;  %v545_v18 = vld [vmem:[%s259_s23] sm:$0xff] }
  0x25   : > { %464 = vmatpush.bf16.msra.mxu1 %v751_v19 }
  0x28   : > { %451 = vmatpush.bf16.msra.mxu0 %v742_v20 }
  0x29   : > { %465 = vmatpush.bf16.msra.mxu1 %v750_v21  ;;  %v540_v21 = vld [vmem:[%s254_s20 + $0x8] sm:$0xff] }
  0x2c   : > { %452 = vmatpush.bf16.msra.mxu0 %v741_v25 }
  0x2d   : > { %466 = vmatpush.bf16.msra.mxu1 %v749_v26  ;;  %v542_v26 = vadd.f32 1.0, %v540_v21 }
  0x2f   : > { %453 = vmatmul.bf16.vlgmr.msra.gmra.mxu0 %v651_v28 }
  0x30   : > { %467 = vmatmul.bf16.vlgmr.msra.gmra.mxu1 %v655_v29 }
  0x7f   : > { %v311_v30 = vpop.permute.xlu0 %310 }
  0x87   : > { %v316_v38 = vpop.permute.xlu0 %315 }
  0x9a   : > { %v482_v34 = vpop.f32.mrf.mxu2 }
  0xa2   : > { %v484_v43 = vpop.f32.mrf.mxu2 }
  0xac   : > { %v454_v31 = vpop.f32.mrf.mxu0 }
  0xad   : > { %v468_v32 = vpop.f32.mrf.mxu1  ;;  %v455_v33 = vadd.f32 %v454_v31, %v311_v30  ;;  %v546_v30 = vld [vmem:[%s259_s23 + $0x8] sm:$0xff] }
  0xaf   : > { %v469_v35 = vadd.f32 %v468_v32, %v455_v33 }
  0xb1   : > { %v483_v36 = vadd.f32 %v482_v34, %v469_v35 }
  0xb3   : > { %v488_v37 = vsel %vm487_vm1, %v483_v36, 0.0 }
  0xb4   : > { %v456_v39 = vpop.f32.mrf.mxu0  ;;  %489 = vadd.xlane.f32.xlu1 %v488_v37 }
  0xb5   : > { %v457_v40 = vadd.f32 %v456_v39, %v316_v38  ;;  %v470_v41 = vpop.f32.mrf.mxu1 }
  0xb7   : > { %v471_v42 = vadd.f32 %v470_v41, %v457_v40 }
  0xb9   : > { %v485_v44 = vadd.f32 %v484_v43, %v471_v42 }
  0xbb   : > { %v491_v45 = vsel %vm487_vm1, %v485_v44, 0.0 }
  0xbc   : > { %492 = vadd.xlane.f32.xlu1 %v491_v45 }
 0x127   : > { %v490_v53 = vpop.xlane.xlu1 %489 }
 0x128   : > { %v501_v54 = vmul.f32 %v500_v52, %v490_v53 }
 0x12a   : > { %v503_v55 = vsub.f32 %v483_v36, %v501_v54 }
 0x12c   : > { %v505_v56 = vmul.f32 %v503_v55, %v503_v55 }
 0x12e   : > { %v507_v57 = vsel %vm487_vm1, %v505_v56, 0.0 }
 0x12f   : > { %508 = vadd.xlane.f32.xlu2 %v507_v57  ;;  %v493_v58 = vpop.xlane.xlu1 %492 }
 0x130   : > { %v502_v59 = vmul.f32 %v500_v52, %v493_v58 }
 0x132   : > { %v504_v60 = vsub.f32 %v485_v44, %v502_v59 }
 0x134   : > { %v506_v61 = vmul.f32 %v504_v60, %v504_v60 }
 0x136   : > { %v510_v62 = vsel %vm487_vm1, %v506_v61, 0.0 }
 0x137   : > { %511 = vadd.xlane.f32.xlu2 %v510_v62 }
 0x1a2   : > { %v509_v63 = vpop.xlane.xlu2 %508 }
 0x1a3   : > { %v513_v0 = vmul.f32 %v509_v63, %v500_v52 }
 0x1a5   : > { %v515_v1 = vadd.f32 1e-05, %v513_v0 }
 0x1a7   : > { %773 = vrsqrt.f32 %v515_v1  ;;  %vm523_vm4 = vweird.f32 %v515_v1 }
 0x1aa   : > { %v512_v2 = vpop.xlane.xlu2 %511 }
 0x1ab   : > { %v514_v3 = vmul.f32 %v512_v2, %v500_v52 }
 0x1ad   : > { %v774_v4 = vpop.eup %773  ;;  %v516_v5 = vadd.f32 1e-05, %v514_v3 }
 0x1ae   : > { %v518_v6 = vmul.f32 %v774_v4, %v515_v1  ;;  %vm524_vm3 = vweird.f32 %v774_v4 }
 0x1af   : > { %775 = vrsqrt.f32 %v516_v5  ;;  %vm525_vm5 = vmor %vm523_vm4, %vm524_vm3  ;;  %vm533_vm7 = vweird.f32 %v516_v5 }
 0x1b0   : > { %v519_v7 = vmul.f32 %v774_v4, %v518_v6 }
 0x1b2   : > { %v520_v8 = vmul.f32 0.5, %v519_v7 }
 0x1b4   : > { %v521_v10 = vsub.f32 1.5, %v520_v8 }
 0x1b5   : > { %v776_v11 = vpop.eup %775 }
 0x1b6   : > { %v522_v12 = vmul.f32 %v774_v4, %v521_v10  ;;  %v528_v13 = vmul.f32 %v776_v11, %v516_v5  ;;  %vm534_vm6 = vweird.f32 %v776_v11 }
 0x1b7   : > { %vm535_vm9 = vmor %vm533_vm7, %vm534_vm6 }
 0x1b8   : > { %v526_v15 = vsel %vm525_vm5, %v774_v4, %v522_v12  ;;  %v529_v16 = vmul.f32 %v776_v11, %v528_v13 }
 0x1b9   : > { %v537_v17 = vmul.f32 %v526_v15, %v503_v55 }
 0x1ba   : > { %v530_v19 = vmul.f32 0.5, %v529_v16 }
 0x1bb   : > { %v543_v20 = vmul.f32 %v541_v14, %v537_v17 }
 0x1bc   : > { %v531_v22 = vsub.f32 1.5, %v530_v19 }
 0x1bd   : > { %v547_v23 = vadd.f32 %v545_v18, %v543_v20 }
 0x1be   : > { %v532_v24 = vmul.f32 %v776_v11, %v531_v22 }
 0x1bf   : > { %vm549_vm8 = vcmp.ge.f32.partialorder %v547_v23, 0.0  ;;  %v551_v25 = vmul.f32 0.2, %v547_v23 }
 0x1c0   : > { %v536_v27 = vsel %vm535_vm9, %v776_v11, %v532_v24 }
 0x1c1   : > { %v553_v28 = vsel %vm549_vm8, %v547_v23, %v551_v25  ;;  %v538_v29 = vmul.f32 %v536_v27, %v504_v60 }
 0x1c2   : > { %555 = vst.msk [vmem:[%s264_s25] sm:$0xff] %vm487_vm1, %v553_v28 }
 0x1c3   : > { %v544_v31 = vmul.f32 %v542_v26, %v538_v29 }
 0x1c5   : > { %v548_v32 = vadd.f32 %v546_v30, %v544_v31 }
 0x1c7   : > { %vm550_vm10 = vcmp.ge.f32.partialorder %v548_v32, 0.0  ;;  %v552_v33 = vmul.f32 0.2, %v548_v32 }
 0x1c9   : > { %v554_v34 = vsel %vm550_vm10, %v548_v32, %v552_v33 }
 0x1ca   : > { %556 = vst.msk [vmem:[%s264_s25 + $0x8] sm:$0xff] %vm487_vm1, %v554_v34 }
 0x1cb PF: > { %s15_s18 = sadd.s32 1, %s783_s18  }
 0x1cc   : > { %p12_p4 = scmp.ge.s32.totalorder %s15_s18, 4  }
 0x1ce   :  { %14 = sbr.rel (!%p12_p4) target bundleno = 1 (0x1), region = 76 }

// kernel: _lambda_.17
= control target key start
LH: loop header
LB: loop body
LE: loop exit
PB: predicated region body
PF: predicated region fallthrough
CT: control target
= control target key end

     0   :  { %s668_s21 = smov 0   ;;  %s737_s0 = inlined_call_operand.vmem [shape: bf16[16,144], index: 0, kind: input, shape index: {}]   ;;  %s738_s1 = inlined_call_operand.vmem [shape: bf16[2,144,16], index: 1, kind: input, shape index: {}]   ;;  %s739_s2 = inlined_call_operand.vmem [shape: f32[16,1], index: 2, kind: input, shape index: {}]   ;;  %s740_s3 = inlined_call_operand.vmem [shape: bf16[16,32], index: 3, kind: input, shape index: {}]   ;;  %s741_s4 = inlined_call_operand.vmem [shape: bf16[2,32,16], index: 4, kind: input, shape index: {}]   ;;  %s742_s5 = inlined_call_operand.vmem [shape: f32[16,1], index: 5, kind: input, shape index: {}]   ;;  %s743_s6 = inlined_call_operand.vmem [shape: f32[2,16,16], index: 6, kind: output, shape index: {}]  }
   0x1 LB: > { %s526_s22 = sadd.s32 4294967295, %s630_s21   ;;  %p530_p0 = scmp.ge.s32.totalorder %s630_s21, 1  ;;  %s630_s21 = sphi %s668_s21, %s16_s21  }
   0x2   : > { %p222_p1 = scmp.lt.s32.totalorder %s630_s21, 3 }
   0x4   : > { %p223_p2 = pnand %p530_p0, %p222_p1 }
   0x5   : > { %p257_p3 = scmp.lt.s32.totalorder (!%p223_p2), %s526_s22, 1 }
   0x6   : > { %226 = sbr.rel (%p223_p2) target bundleno = 190 (0xbe), region = 44 }
   0xb   : > { %s745_s22 = smov (!%p257_p3, %s526_s22), 1  ;;  %v598_v2 = vld [vmem:[%s737_s0 + $0x4] sm:$0xf]  ;;  %v540_v3 = vld [vmem:[%s737_s0 + $0x8] sm:$0xf0]  ;;  %v632_v7 = vmov 0  }
   0xc   : > { %s612_s23 = smul.u32 72, %s745_s22  ;;  %s596_s24 = sshll.u32 %s745_s22, 4  ;;  %622 = vset.pattern.permute.xlu0 %v632_v7  ;;  %v543_v8 = vor.u32 %v598_v2, %v540_v3  ;;  %v293_v9 = vld [vmem:[%s739_s2] sm:$0xff]  ;;  %623 = vset.pattern.permute.xlu1 %v632_v7  ;;  %vm368_vm0 = vcmask 130048   ;;  %vm423_vm1 = vcmask 261120   ;;  %v294_v13 = vld [vmem:[%s739_s2 + $0x8] sm:$0xff] }
   0xd   : > { %s266_s27 = scalar_lea.vmem %s741_s4, %s596_s24  ;;  %v443_v10 = vld [vmem:[%s742_s5] sm:$0xff]  ;;  %297 = vperm.xlu0 %622, %v293_v9   ;;  %v444_v15 = vld [vmem:[%s742_s5 + $0x8] sm:$0xff] }
   0xe   : > { %s688_s30 = scalar_lea.vmem %s738_s1, %s612_s23  ;;  %v611_v0 = vld [vmem:[%s266_s27 + $0x8] sm:$0xff]  ;;  %v610_v4 = vld [vmem:[%s266_s27] sm:$0xff]  ;;  %447 = vperm.xlu1 %623, %v443_v10  }
   0xf   : > { %v607_v1 = vld [vmem:[%s688_s30 + $0x38] sm:$0xff]  ;;  %433 = vmatpush.bf16.msra.mxu2 %v611_v0  ;;  %v606_v5 = vld [vmem:[%s688_s30 + $0x30] sm:$0xff]  ;;  %v608_v6 = vld [vmem:[%s688_s30 + $0x40] sm:$0xff] }
  0x10   : > { %372 = vmatpush.bf16.msra.mxu0 %v607_v1  ;;  %v609_v11 = vld [vmem:[%s740_s3] sm:$0xff]  ;;  %393 = vmatpush.bf16.msra.mxu1 %v608_v6  ;;  %v605_v12 = vld [vmem:[%s688_s30 + $0x28] sm:$0xff]  ;;  %v603_v16 = vld [vmem:[%s688_s30 + $0x18] sm:$0xff] }
  0x11   : > { %v604_v14 = vld [vmem:[%s688_s30 + $0x20] sm:$0xff]  ;;  %v602_v17 = vld [vmem:[%s688_s30 + $0x10] sm:$0xff]  ;;  %v601_v18 = vld [vmem:[%s688_s30 + $0x8] sm:$0xff] }
  0x12   : > { %v600_v19 = vld [vmem:[%s688_s30] sm:$0xff]  ;;  %v599_v21 = vld [vmem:[%s737_s0 + $0x4] sm:$0xf0]  ;;  %s271_s30 = scalar_lea.vmem %s743_s6, %s596_s24 }
  0x13   : > { %434 = vmatpush.bf16.msra.mxu2 %v610_v4  ;;  %580 = vmatmul.msk.bf16.vlgmr.msra.gmra.mxu1 %vm368_vm0, %v543_v8  ;;  %v538_v20 = vld [vmem:[%s737_s0] sm:$0xf] }
  0x14   : > { %373 = vmatpush.bf16.msra.mxu0 %v606_v5  ;;  %v539_v22 = vor.u32 %v599_v21, %v538_v20 }
  0x15   : > { %302 = vperm.xlu0 %622, %v294_v13  }
  0x16   : > { %593 = vmatmul.msk.bf16.vlgmr.msra.gmra.mxu2 %vm423_vm1, %v609_v11  ;;  %452 = vperm.xlu1 %623, %v444_v15  }
  0x18   : > { %374 = vmatpush.bf16.msra.mxu0 %v605_v12 }
  0x1c   : > { %375 = vmatpush.bf16.msra.mxu0 %v604_v14 }
  0x20   : > { %376 = vmatpush.bf16.msra.mxu0 %v603_v16 }
  0x24   : > { %377 = vmatpush.bf16.msra.mxu0 %v602_v17 }
  0x28   : > { %378 = vmatpush.bf16.msra.mxu0 %v601_v18 }
  0x2c   : > { %379 = vmatpush.bf16.msra.mxu0 %v600_v19 }
  0x2f   : > { %380 = vmatmul.bf16.vlgmr.msra.gmra.mxu0 %v539_v22 }
  0x7f   : > { %v298_v23 = vpop.permute.xlu0 %297 }
  0x80   : > { %v448_v29 = vpop.permute.xlu1 %447 }
  0x87   : > { %v303_v32 = vpop.permute.xlu0 %302 }
  0x88   : > { %v453_v39 = vpop.permute.xlu1 %452 }
  0x90   : > { %v395_v24 = vpop.f32.mrf.mxu1 }
  0x98   : > { %v397_v35 = vpop.f32.mrf.mxu1 }
  0x99   : > { %v436_v27 = vpop.f32.mrf.mxu2 }
  0xa1   : > { %v438_v37 = vpop.f32.mrf.mxu2 }
  0xac   : > { %v381_v25 = vpop.f32.mrf.mxu0 }
  0xad   : > { %v382_v26 = vadd.f32 %v381_v25, %v298_v23 }
  0xaf   : > { %v396_v28 = vadd.f32 %v395_v24, %v382_v26 }
  0xb1   : > { %v441_v30 = vadd.f32 %v436_v27, %v396_v28 }
  0xb3   : > { %v455_v31 = vadd.f32 %v448_v29, %v441_v30 }
  0xb4   : > { %v383_v33 = vpop.f32.mrf.mxu0 }
  0xb5   : > { %457 = vst.msk [vmem:[%s271_s30] sm:$0xff] %vm368_vm0, %v455_v31  ;;  %v384_v34 = vadd.f32 %v383_v33, %v303_v32 }
  0xb7   : > { %v398_v36 = vadd.f32 %v397_v35, %v384_v34 }
  0xb9   : > { %v442_v38 = vadd.f32 %v438_v37, %v398_v36 }
  0xbb   : > { %v456_v40 = vadd.f32 %v453_v39, %v442_v38 }
  0xbd   : > { %458 = vst.msk [vmem:[%s271_s30 + $0x8] sm:$0xff] %vm368_vm0, %v456_v40 }
  0xbe PF: > { %s16_s21 = sadd.s32 1, %s630_s21  }
  0xbf   : > { %p13_p4 = scmp.ge.s32.totalorder %s16_s21, 4  }
  0xc1   :  { %15 = sbr.rel (!%p13_p4) target bundleno = 1 (0x1), region = 77 }

// kernel: _lambda_.18
= control target key start
LH: loop header
LB: loop body
LE: loop exit
PB: predicated region body
PF: predicated region fallthrough
CT: control target
= control target key end

     0   :  { %s631_s18 = smov 0   ;;  %s694_s0 = inlined_call_operand.vmem [shape: bf16[48,16], index: 0, kind: input, shape index: {}]   ;;  %s695_s1 = inlined_call_operand.vmem [shape: bf16[2,16,64], index: 1, kind: input, shape index: {}]   ;;  %s696_s2 = inlined_call_operand.vmem [shape: f32[48,1], index: 2, kind: input, shape index: {}]   ;;  %s697_s3 = inlined_call_operand.vmem [shape: f32[2,16,64], index: 3, kind: input, shape index: {}]   ;;  %s698_s4 = inlined_call_operand.vmem [shape: f32[2,16,64], index: 4, kind: output, shape index: {0}]   ;;  %s699_s5 = inlined_call_operand.vmem [shape: f32[2,16,64], index: 5, kind: output, shape index: {1}]  }
   0x1 LB: > { %s528_s19 = sadd.s32 4294967295, %s597_s18   ;;  %p532_p0 = scmp.ge.s32.totalorder %s597_s18, 1  ;;  %s597_s18 = sphi %s631_s18, %s16_s18  }
   0x2   : > { %p200_p1 = scmp.lt.s32.totalorder %s597_s18, 3 }
   0x4   : > { %p201_p2 = pnand %p532_p0, %p200_p1 }
   0x5   : > { %p238_p3 = scmp.lt.s32.totalorder (!%p201_p2), %s528_s19, 1 }
   0x6   : > { %204 = sbr.rel (%p201_p2) target bundleno = 295 (0x127), region = 36 }
   0xb   : > { %s701_s19 = smov (!%p238_p3, %s528_s19), 1  ;;  %vm360_vm0 = vcmask 523264   ;;  %v568_v3 = vld [vmem:[%s694_s0 + $0x10] sm:$0xff]  ;;  %vm324_vm1 = vcmask 130048   ;;  %v566_v6 = vld [vmem:[%s694_s0] sm:$0xff]  ;;  %v599_v7 = vmov 64.0  }
   0xc   : > { %s639_s20 = sshll.u32 %s701_s19, 4  ;;  %s562_s21 = sshll.u32 %s701_s19, 3  ;;  %585 = vrcp.f32 %v599_v7  ;;  %v567_v9 = vld [vmem:[%s694_s0 + $0x8] sm:$0xff]  ;;  %v267_v11 = vld [vmem:[%s696_s2] sm:$0xff]  ;;  %v269_v12 = vld [vmem:[%s696_s2 + $0x10] sm:$0xff]  ;;  %v600_v13 = vmov 0  }
   0xd   : > { %s247_s24 = scalar_lea.vmem %s697_s3, %s639_s20  ;;  %s242_s27 = scalar_lea.vmem %s695_s1, %s562_s21  ;;  %582 = vset.pattern.permute.xlu2 %v600_v13  ;;  %583 = vset.pattern.permute.xlu0 %v600_v13  ;;  %v268_v16 = vld [vmem:[%s696_s2 + $0x8] sm:$0xff]  ;;  %v271_v19 = vld [vmem:[%s696_s2 + $0x20] sm:$0xff]  ;;  %v270_v31 = vld [vmem:[%s696_s2 + $0x18] sm:$0xff] }
   0xe   : > { %v358_v0 = vld [vmem:[%s247_s24] sm:$0xff]  ;;  %v359_v4 = vld [vmem:[%s247_s24 + $0x8] sm:$0xff]  ;;  %275 = vperm.xlu2 %582, %v267_v11   ;;  %584 = vset.pattern.permute.xlu1 %v600_v13  ;;  %s257_s25 = scalar_lea.vmem %s699_s5, %s639_s20  ;;  %s252_s28 = scalar_lea.vmem %s698_s4, %s639_s20 }
   0xf   : > { %v361_v1 = vsel %vm360_vm0, %v358_v0, 0.0  ;;  %v569_v2 = vld [vmem:[%s242_s27] sm:$0xff]  ;;  %v364_v5 = vsel %vm360_vm0, %v359_v4, 0.0  ;;  %v272_v27 = vld [vmem:[%s696_s2 + $0x28] sm:$0xff] }
  0x10   : > { %362 = vadd.xlane.f32.xlu0 %v361_v1  ;;  %571 = vmatpush.bf16.msra.mxu2 %v569_v2 }
  0x11   : > { %341 = vmatpush.bf16.msra.mxu0 %v569_v2  ;;  %570 = vmatpush.bf16.msra.mxu1 %v569_v2 }
  0x12   : > { %v586_v8 = vpop.eup %585 }
  0x13   : > { %559 = vmatmul.msk.bf16.vlgmr.msra.gmra.mxu2 %vm324_vm1, %v568_v3  ;;  %v368_v10 = vmul.f32 64.0, %v586_v8  ;;  %vm372_vm2 = vweird.f32 %v586_v8 }
  0x14   : > { %557 = vmatmul.msk.bf16.vlgmr.msra.gmra.mxu0 %vm324_vm1, %v566_v6  ;;  %558 = vmatmul.msk.bf16.vlgmr.msra.gmra.mxu1 %vm324_vm1, %v567_v9 }
  0x15   : > { %v369_v14 = vsub.f32 1.0, %v368_v10 }
  0x16   : > { %280 = vperm.xlu2 %582, %v268_v16  }
  0x17   : > { %v370_v15 = vmul.f32 %v586_v8, %v369_v14 }
  0x18   : > { %365 = vadd.xlane.f32.xlu0 %v364_v5 }
  0x19   : > { %v371_v17 = vadd.f32 %v586_v8, %v370_v15 }
  0x1b   : > { %v373_v18 = vsel %vm372_vm2, %v586_v8, %v371_v17 }
  0x1e   : > { %295 = vperm.xlu2 %582, %v271_v19  }
  0x26   : > { %300 = vperm.xlu2 %582, %v272_v27  }
  0x2c   : > { %285 = vperm.xlu0 %583, %v269_v12  }
  0x68   : > { %v276_v32 = vpop.permute.xlu2 %275 }
  0x70   : > { %v281_v33 = vpop.permute.xlu2 %280 }
  0x78   : > { %v296_v34 = vpop.permute.xlu2 %295 }
  0x80   : > { %v301_v36 = vpop.permute.xlu2 %300 }
  0x83   : > { %v363_v20 = vpop.xlane.xlu0 %362 }
  0x84   : > { %v374_v21 = vmul.f32 %v373_v18, %v363_v20 }
  0x86   : > { %v376_v22 = vsub.f32 %v358_v0, %v374_v21 }
  0x88   : > { %v378_v23 = vmul.f32 %v376_v22, %v376_v22 }
  0x8a   : > { %v380_v24 = vsel %vm360_vm0, %v378_v23, 0.0 }
  0x8b   : > { %381 = vadd.xlane.f32.xlu1 %v380_v24  ;;  %v366_v25 = vpop.xlane.xlu0 %365 }
  0x8c   : > { %v375_v26 = vmul.f32 %v373_v18, %v366_v25 }
  0x8e   : > { %v377_v28 = vsub.f32 %v359_v4, %v375_v26 }
  0x90   : > { %v379_v29 = vmul.f32 %v377_v28, %v377_v28 }
  0x91   : > { %v343_v49 = vpop.f32.mrf.mxu0  ;;  %v348_v59 = vpop.f32.mrf.mxu1 }
  0x92   : > { %v383_v30 = vsel %vm360_vm0, %v379_v29, 0.0  ;;  %v344_v53 = vadd.f32 %v343_v49, %v276_v32 }
  0x93   : > { %384 = vadd.xlane.f32.xlu1 %v383_v30 }
  0x94   : > { %v412_v61 = vadd.f32 1.0, %v344_v53 }
  0x96   : > { %v353_v35 = vpop.f32.mrf.mxu2 }
  0x97   : > { %v354_v37 = vadd.f32 %v353_v35, %v296_v34 }
  0x99   : > { %426 = vst.msk [vmem:[%s257_s25] sm:$0xff] %vm360_vm0, %v354_v37  ;;  %v345_v0 = vpop.f32.mrf.mxu0  ;;  %v350_v11 = vpop.f32.mrf.mxu1 }
  0x9a   : > { %v346_v3 = vadd.f32 %v345_v0, %v281_v33 }
  0x9c   : > { %v413_v9 = vadd.f32 1.0, %v346_v3 }
  0x9e   : > { %v355_v38 = vpop.f32.mrf.mxu2  ;;  %v286_v56 = vpop.permute.xlu0 %285 }
  0x9f   : > { %v356_v39 = vadd.f32 %v355_v38, %v301_v36  ;;  %v349_v62 = vadd.f32 %v348_v59, %v286_v56 }
  0xa1   : > { %427 = vst.msk [vmem:[%s257_s25 + $0x8] sm:$0xff] %vm360_vm0, %v356_v39 }
  0xac   : > { %290 = vperm.xlu1 %584, %v270_v31  }
  0xfe   : > { %v382_v40 = vpop.xlane.xlu1 %381 }
  0xff   : > { %v386_v41 = vmul.f32 %v382_v40, %v373_v18 }
 0x101   : > { %v388_v42 = vadd.f32 1e-05, %v386_v41 }
 0x103   : > { %587 = vrsqrt.f32 %v388_v42  ;;  %vm396_vm4 = vweird.f32 %v388_v42 }
 0x106   : > { %v385_v43 = vpop.xlane.xlu1 %384 }
 0x107   : > { %v387_v44 = vmul.f32 %v385_v43, %v373_v18 }
 0x109   : > { %v588_v45 = vpop.eup %587  ;;  %v389_v46 = vadd.f32 1e-05, %v387_v44 }
 0x10a   : > { %v391_v47 = vmul.f32 %v588_v45, %v388_v42  ;;  %vm397_vm3 = vweird.f32 %v588_v45 }
 0x10b   : > { %589 = vrsqrt.f32 %v389_v46  ;;  %vm398_vm5 = vmor %vm396_vm4, %vm397_vm3  ;;  %vm406_vm7 = vweird.f32 %v389_v46 }
 0x10c   : > { %v392_v48 = vmul.f32 %v588_v45, %v391_v47 }
 0x10e   : > { %v393_v50 = vmul.f32 0.5, %v392_v48 }
 0x110   : > { %v394_v51 = vsub.f32 1.5, %v393_v50 }
 0x111   : > { %v590_v52 = vpop.eup %589 }
 0x112   : > { %v395_v54 = vmul.f32 %v588_v45, %v394_v51  ;;  %v401_v55 = vmul.f32 %v590_v52, %v389_v46  ;;  %vm407_vm6 = vweird.f32 %v590_v52 }
 0x113   : > { %vm408_vm8 = vmor %vm406_vm7, %vm407_vm6 }
 0x114   : > { %v399_v57 = vsel %vm398_vm5, %v588_v45, %v395_v54  ;;  %v402_v58 = vmul.f32 %v590_v52, %v401_v55 }
 0x115   : > { %v410_v60 = vmul.f32 %v399_v57, %v376_v22 }
 0x116   : > { %v403_v63 = vmul.f32 0.5, %v402_v58 }
 0x117   : > { %v414_v1 = vmul.f32 %v412_v61, %v410_v60 }
 0x118   : > { %v404_v2 = vsub.f32 1.5, %v403_v63 }
 0x119   : > { %v416_v4 = vadd.f32 %v414_v1, %v349_v62 }
 0x11a   : > { %v405_v5 = vmul.f32 %v590_v52, %v404_v2 }
 0x11b   : > { %vm418_vm9 = vcmp.ge.f32.partialorder %v416_v4, 0.0  ;;  %v420_v6 = vmul.f32 0.2, %v416_v4 }
 0x11c   : > { %v409_v7 = vsel %vm408_vm8, %v590_v52, %v405_v5 }
 0x11d   : > { %v411_v8 = vmul.f32 %v409_v7, %v377_v28  ;;  %v422_v10 = vsel %vm418_vm9, %v416_v4, %v420_v6 }
 0x11e   : > { %424 = vst.msk [vmem:[%s252_s28] sm:$0xff] %vm360_vm0, %v422_v10  ;;  %v291_v12 = vpop.permute.xlu1 %290 }
 0x11f   : > { %v415_v13 = vmul.f32 %v413_v9, %v411_v8  ;;  %v351_v14 = vadd.f32 %v350_v11, %v291_v12 }
 0x121   : > { %v417_v15 = vadd.f32 %v415_v13, %v351_v14 }
 0x123   : > { %vm419_vm10 = vcmp.ge.f32.partialorder %v417_v15, 0.0  ;;  %v421_v16 = vmul.f32 0.2, %v417_v15 }
 0x125   : > { %v423_v17 = vsel %vm419_vm10, %v417_v15, %v421_v16 }
 0x126   : > { %425 = vst.msk [vmem:[%s252_s28 + $0x8] sm:$0xff] %vm360_vm0, %v423_v17 }
 0x127 PF: > { %s16_s18 = sadd.s32 1, %s597_s18  }
 0x128   : > { %p13_p4 = scmp.ge.s32.totalorder %s16_s18, 4  }
 0x12a   :  { %15 = sbr.rel (!%p13_p4) target bundleno = 1 (0x1), region = 81 }

// kernel: _lambda_.19
= control target key start
LH: loop header
LB: loop body
LE: loop exit
PB: predicated region body
PF: predicated region fallthrough
CT: control target
= control target key end

     0   :  { %s602_s18 = smov 0   ;;  %s638_s0 = inlined_call_operand.vmem [shape: bf16[8,144], index: 0, kind: input, shape index: {}]   ;;  %s639_s1 = inlined_call_operand.vmem [shape: bf16[2,144,64], index: 1, kind: input, shape index: {}]   ;;  %s640_s2 = inlined_call_operand.vmem [shape: f32[8,1], index: 2, kind: input, shape index: {}]   ;;  %s641_s3 = inlined_call_operand.vmem [shape: f32[2,8,64], index: 3, kind: input, shape index: {}]   ;;  %s642_s4 = inlined_call_operand.vmem [shape: f32[2,8,64], index: 4, kind: input, shape index: {}]   ;;  %s643_s5 = inlined_call_operand.vmem [shape: f32[2,8,64], index: 5, kind: output, shape index: {}]  }
   0x1 LB: > { %s489_s19 = sadd.s32 4294967295, %s568_s18   ;;  %p493_p0 = scmp.ge.s32.totalorder %s568_s18, 1  ;;  %s568_s18 = sphi %s602_s18, %s15_s18  }
   0x2   : > { %p205_p1 = scmp.lt.s32.totalorder %s568_s18, 3 }
   0x4   : > { %p206_p2 = pnand %p493_p0, %p205_p1 }
   0x5   : > { %p240_p3 = scmp.lt.s32.totalorder (!%p206_p2), %s489_s19, 1 }
   0x6   : > { %209 = sbr.rel (%p206_p2) target bundleno = 449 (0x1c1), region = 40 }
   0xb   : > { %s645_s19 = smov (!%p240_p3, %s489_s19), 1  ;;  %v258_v0 = vld [vmem:[%s638_s0] sm:$0xff]  ;;  %v570_v5 = vmov 0   ;;  %vm343_vm0 = vcmask 130048   ;;  %vm373_vm1 = vcmask 523264   ;;  %v571_v24 = vmov 64.0  }
   0xc   : > { %s546_s22 = smul.u32 72, %s645_s19  ;;  %v285_v1 = vunpack.c.h.b16 %v258_v0  ;;  %557 = vset.pattern.permute.xlu0 %v570_v5  ;;  %v277_v7 = vld [vmem:[%s640_s2] sm:$0xff]  ;;  %v284_v13 = vunpack.c.l.b16 %v258_v0  ;;  %558 = vrcp.f32 %v571_v24  ;;  %s495_s28 = sshll.u32 %s645_s19, 3 }
   0xd   : > { %280 = vperm.xlu0 %557, %v277_v7   ;;  %s248_s6 = scalar_lea.vmem %s641_s3, %s495_s28  ;;  %s252_s9 = scalar_lea.vmem %s642_s4, %s495_s28 }
   0xe   : > { %s244_s25 = scalar_lea.vmem %s639_s1, %s546_s22  ;;  %v287_v6 = vpack.c.b16 %v285_v1, %v285_v1  ;;  %v286_v15 = vpack.c.b16 %v284_v13, %v284_v13  ;;  %v403_v43 = vld [vmem:[%s248_s6] sm:$0xff]  ;;  %s256_s12 = scalar_lea.vmem %s643_s5, %s495_s28 }
   0xf   : > { %v544_v2 = vld [vmem:[%s244_s25 + $0x38] sm:$0xff]  ;;  %v543_v3 = vld [vmem:[%s244_s25 + $0x30] sm:$0xff]  ;;  %v545_v4 = vld [vmem:[%s244_s25 + $0x40] sm:$0xff]  ;;  %v404_v46 = vadd.f32 1.0, %v403_v43 }
  0x10   : > { %347 = vmatpush.bf16.msra.mxu0 %v544_v2  ;;  %367 = vmatpush.bf16.msra.mxu1 %v545_v4  ;;  %v542_v8 = vld [vmem:[%s244_s25 + $0x28] sm:$0xff]  ;;  %v541_v9 = vld [vmem:[%s244_s25 + $0x20] sm:$0xff]  ;;  %v540_v10 = vld [vmem:[%s244_s25 + $0x18] sm:$0xff] }
  0x11   : > { %v539_v11 = vld [vmem:[%s244_s25 + $0x10] sm:$0xff]  ;;  %v538_v12 = vld [vmem:[%s244_s25 + $0x8] sm:$0xff]  ;;  %v537_v14 = vld [vmem:[%s244_s25] sm:$0xff] }
  0x12   : > { %v559_v25 = vpop.eup %558  ;;  %v406_v49 = vld [vmem:[%s252_s9] sm:$0xff] }
  0x13   : > { %534 = vmatmul.msk.bf16.vlgmr.msra.gmra.mxu1 %vm343_vm0, %v287_v6  ;;  %v378_v26 = vmul.f32 64.0, %v559_v25  ;;  %vm382_vm2 = vweird.f32 %v559_v25 }
  0x14   : > { %348 = vmatpush.bf16.msra.mxu0 %v543_v3 }
  0x15   : > { %v379_v27 = vsub.f32 1.0, %v378_v26 }
  0x17   : > { %v380_v28 = vmul.f32 %v559_v25, %v379_v27 }
  0x18   : > { %349 = vmatpush.bf16.msra.mxu0 %v542_v8 }
  0x19   : > { %v381_v29 = vadd.f32 %v559_v25, %v380_v28 }
  0x1b   : > { %v383_v30 = vsel %vm382_vm2, %v559_v25, %v381_v29 }
  0x1c   : > { %350 = vmatpush.bf16.msra.mxu0 %v541_v9 }
  0x20   : > { %351 = vmatpush.bf16.msra.mxu0 %v540_v10 }
  0x24   : > { %352 = vmatpush.bf16.msra.mxu0 %v539_v11 }
  0x28   : > { %353 = vmatpush.bf16.msra.mxu0 %v538_v12 }
  0x2c   : > { %354 = vmatpush.bf16.msra.mxu0 %v537_v14 }
  0x2f   : > { %355 = vmatmul.bf16.vlgmr.msra.gmra.mxu0 %v286_v15 }
  0x7f   : > { %v281_v18 = vpop.permute.xlu0 %280 }
  0x90   : > { %v369_v16 = vpop.f32.mrf.mxu1 }
  0x98   : > { %v371_v17 = vpop.f32.mrf.mxu1 }
  0xac   : > { %v356_v19 = vpop.f32.mrf.mxu0 }
  0xad   : > { %v357_v20 = vadd.f32 %v356_v19, %v281_v18 }
  0xaf   : > { %v370_v21 = vadd.f32 %v369_v16, %v357_v20 }
  0xb1   : > { %v374_v22 = vsel %vm373_vm1, %v370_v21, 0.0 }
  0xb2   : > { %375 = vadd.xlane.f32.xlu0 %v374_v22 }
  0xb4   : > { %v358_v23 = vpop.f32.mrf.mxu0 }
 0x125   : > { %v376_v31 = vpop.xlane.xlu0 %375 }
 0x126   : > { %v384_v32 = vmul.f32 %v383_v30, %v376_v31 }
 0x128   : > { %v385_v33 = vsub.f32 %v370_v21, %v384_v32 }
 0x12a   : > { %v386_v34 = vmul.f32 %v385_v33, %v385_v33 }
 0x12c   : > { %v387_v35 = vsel %vm373_vm1, %v386_v34, 0.0 }
 0x12d   : > { %388 = vadd.xlane.f32.xlu1 %v387_v35 }
 0x1a0   : > { %v389_v36 = vpop.xlane.xlu1 %388 }
 0x1a1   : > { %v390_v37 = vmul.f32 %v389_v36, %v383_v30 }
 0x1a3   : > { %v391_v38 = vadd.f32 1e-05, %v390_v37 }
 0x1a5   : > { %560 = vrsqrt.f32 %v391_v38  ;;  %vm398_vm4 = vweird.f32 %v391_v38 }
 0x1ab   : > { %v561_v39 = vpop.eup %560 }
 0x1ac   : > { %v393_v40 = vmul.f32 %v561_v39, %v391_v38  ;;  %vm399_vm3 = vweird.f32 %v561_v39 }
 0x1ad   : > { %vm400_vm5 = vmor %vm398_vm4, %vm399_vm3 }
 0x1ae   : > { %v394_v41 = vmul.f32 %v561_v39, %v393_v40 }
 0x1b0   : > { %v395_v42 = vmul.f32 0.5, %v394_v41 }
 0x1b2   : > { %v396_v44 = vsub.f32 1.5, %v395_v42 }
 0x1b4   : > { %v397_v45 = vmul.f32 %v561_v39, %v396_v44 }
 0x1b6   : > { %v401_v47 = vsel %vm400_vm5, %v561_v39, %v397_v45 }
 0x1b7   : > { %v402_v48 = vmul.f32 %v401_v47, %v385_v33 }
 0x1b9   : > { %v405_v50 = vmul.f32 %v404_v46, %v402_v48 }
 0x1bb   : > { %v407_v51 = vadd.f32 %v406_v49, %v405_v50 }
 0x1bd   : > { %vm408_vm6 = vcmp.ge.f32.partialorder %v407_v51, 0.0  ;;  %v409_v52 = vmul.f32 0.2, %v407_v51 }
 0x1bf   : > { %v410_v53 = vsel %vm408_vm6, %v407_v51, %v409_v52 }
 0x1c0   : > { %411 = vst.msk [vmem:[%s256_s12] sm:$0xff] %vm373_vm1, %v410_v53 }
 0x1c1 PF: > { %s15_s18 = sadd.s32 1, %s568_s18  }
 0x1c2   : > { %p12_p4 = scmp.ge.s32.totalorder %s15_s18, 4  }
 0x1c4   :  { %14 = sbr.rel (!%p12_p4) target bundleno = 1 (0x1), region = 76 }

// kernel: _lambda_.20
= control target key start
LH: loop header
LB: loop body
LE: loop exit
PB: predicated region body
PF: predicated region fallthrough
CT: control target
= control target key end

     0   :  { %s530_s21 = smov 0   ;;  %s570_s0 = inlined_call_operand.vmem [shape: bf16[8,72], index: 0, kind: input, shape index: {}]   ;;  %s571_s1 = inlined_call_operand.vmem [shape: bf16[2,72,64], index: 1, kind: input, shape index: {}]   ;;  %s572_s2 = inlined_call_operand.vmem [shape: f32[8,1], index: 2, kind: input, shape index: {}]   ;;  %s573_s3 = inlined_call_operand.vmem [shape: bf16[8,16], index: 3, kind: input, shape index: {}]   ;;  %s574_s4 = inlined_call_operand.vmem [shape: bf16[2,16,64], index: 4, kind: input, shape index: {}]   ;;  %s575_s5 = inlined_call_operand.vmem [shape: f32[8,1], index: 5, kind: input, shape index: {}]   ;;  %s576_s6 = inlined_call_operand.vmem [shape: f32[2,8,64], index: 6, kind: output, shape index: {}]  }
   0x1 LB: > { %s436_s22 = sadd.s32 4294967295, %s492_s21   ;;  %p440_p0 = scmp.ge.s32.totalorder %s492_s21, 1  ;;  %s492_s21 = sphi %s530_s21, %s16_s21  }
   0x2   : > { %p222_p1 = scmp.lt.s32.totalorder %s492_s21, 3 }
   0x4   : > { %p223_p2 = pnand %p440_p0, %p222_p1 }
   0x5   : > { %p256_p3 = scmp.lt.s32.totalorder (!%p223_p2), %s436_s22, 1 }
   0x6   : > { %226 = sbr.rel (%p223_p2) target bundleno = 174 (0xae), region = 44 }
   0xb   : > { %v494_v0 = vmov 0   ;;  %v281_v1 = vld [vmem:[%s572_s2] sm:$0xff]  ;;  %s578_s22 = smov (!%p256_p3, %s436_s22), 1  ;;  %vm344_vm0 = vcmask 130048   ;;  %vm318_vm1 = vcmask 1043456   ;;  %vm314_vm2 = vcmask 588800  }
   0xc   : > { %485 = vset.pattern.permute.xlu0 %v494_v0  ;;  %s475_s25 = smul.u32 36, %s578_s22  ;;  %s469_s26 = sshll.u32 %s578_s22, 3  ;;  %v362_v4 = vld [vmem:[%s575_s5] sm:$0xff]  ;;  %vm369_vm3 = vcmask 523264  }
   0xd   : > { %284 = vperm.xlu0 %485, %v281_v1   ;;  %s265_s29 = scalar_lea.vmem %s574_s4, %s469_s26  ;;  %v335_v6 = vld [vmem:[%s573_s3] sm:$0xf]  ;;  %s269_s17 = scalar_lea.vmem %s576_s6, %s469_s26 }
   0xe   : > { %s260_s8 = scalar_lea.vmem %s571_s1, %s475_s25  ;;  %v474_v2 = vld [vmem:[%s265_s29] sm:$0xff] }
   0xf   : > { %v280_v3 = vld [vmem:[%s260_s8 + $0x20] sm:$0xf]  ;;  %355 = vmatpush.bf16.msra.mxu1 %v474_v2  ;;  %v473_v9 = vld [vmem:[%s260_s8 + $0x18] sm:$0xff]  ;;  %v472_v10 = vld [vmem:[%s260_s8 + $0x10] sm:$0xff] }
  0x10   : > { %v304_v5 = vunpack.c.l.b16 %v280_v3  ;;  %v471_v11 = vld [vmem:[%s260_s8 + $0x8] sm:$0xff]  ;;  %v470_v12 = vld [vmem:[%s260_s8] sm:$0xff] }
  0x11   : > { %v271_v13 = vld [vmem:[%s570_s0] sm:$0xf] }
  0x12   : > { %v309_v7 = vpack.c.b16 %v304_v5, %v304_v5  ;;  %466 = vmatmul.msk.bf16.vlgmr.msra.gmra.mxu1 %vm344_vm0, %v335_v6 }
  0x14   : > { %v320_v8 = vsel %vm318_vm1, %v309_v7, 0 }
  0x15   : > { %365 = vperm.xlu0 %485, %v362_v4   ;;  %325 = vmatpush.bf16.msra.mxu0 %v320_v8 }
  0x19   : > { %326 = vmatpush.bf16.msra.mxu0 %v473_v9 }
  0x1d   : > { %327 = vmatpush.bf16.msra.mxu0 %v472_v10 }
  0x21   : > { %328 = vmatpush.bf16.msra.mxu0 %v471_v11 }
  0x25   : > { %329 = vmatpush.bf16.msra.mxu0 %v470_v12 }
  0x28   : > { %461 = vmatmul.msk.bf16.vlgmr.msra.gmra.mxu0 %vm314_vm2, %v271_v13 }
  0x7f   : > { %v285_v16 = vpop.permute.xlu0 %284 }
  0x87   : > { %v366_v20 = vpop.permute.xlu0 %365 }
  0x8f   : > { %v357_v14 = vpop.f32.mrf.mxu1 }
  0x97   : > { %v359_v15 = vpop.f32.mrf.mxu1 }
  0xa5   : > { %v331_v17 = vpop.f32.mrf.mxu0 }
  0xa6   : > { %v332_v18 = vadd.f32 %v331_v17, %v285_v16 }
  0xa8   : > { %v361_v19 = vadd.f32 %v357_v14, %v332_v18 }
  0xaa   : > { %v368_v21 = vadd.f32 %v366_v20, %v361_v19 }
  0xac   : > { %370 = vst.msk [vmem:[%s269_s17] sm:$0xff] %vm369_vm3, %v368_v21 }
  0xad   : > { %v333_v22 = vpop.f32.mrf.mxu0 }
  0xae PF: > { %s16_s21 = sadd.s32 1, %s492_s21  }
  0xaf   : > { %p13_p4 = scmp.ge.s32.totalorder %s16_s21, 4  }
  0xb1   :  { %15 = sbr.rel (!%p13_p4) target bundleno = 1 (0x1), region = 77 }

// kernel: _lambda_.21
= control target key start
LH: loop header
LB: loop body
LE: loop exit
PB: predicated region body
PF: predicated region fallthrough
CT: control target
= control target key end

     0   :  { %s956_s12 = smov 0   ;;  %s1103_s0 = inlined_call_operand.vmem [shape: bf16[3,392], index: 0, kind: input, shape index: {}]   ;;  %s1104_s1 = inlined_call_operand.vmem [shape: bf16[2,392,256], index: 1, kind: input, shape index: {}]   ;;  %s1105_s2 = inlined_call_operand.vmem [shape: f32[3,1], index: 2, kind: input, shape index: {}]   ;;  %s1106_s3 = inlined_call_operand.vmem [shape: f32[2,3,256], index: 3, kind: output, shape index: {}]  }
   0x1 LB: > { %s659_s13 = sadd.s32 4294967295, %s933_s12   ;;  %p663_p0 = scmp.ge.s32.totalorder %s933_s12, 1  ;;  %s933_s12 = sphi %s956_s12, %s13_s12  }
   0x2   : > { %p137_p1 = scmp.lt.s32.totalorder %s933_s12, 3 }
   0x4   : > { %p138_p2 = pnand %p663_p0, %p137_p1 }
   0x5   : > { %p161_p3 = scmp.lt.s32.totalorder (!%p138_p2), %s659_s13, 1 }
   0x6   : > { %141 = sbr.rel (%p138_p2) target bundleno = 224 (0xe0), region = 32 }
   0xb   : > { %v172_v0 = vld [vmem:[%s1103_s0] sm:$0xff]  ;;  %s1108_s13 = smov (!%p161_p3, %s659_s13), 1  ;;  %vm485_vm0 = vcmask 1043456   ;;  %vm482_vm1 = vcmask 64512  }
   0xc   : > { %229 = vst [vmem:[#allocation1] ss:$4 sm:$0xff] %v172_v0  ;;  %s912_s16 = smul.u32 392, %s1108_s13  ;;  %s863_s22 = sshll.u32 %s1108_s13, 3 }
   0xd   : > { %s170_s25 = scalar_lea.vmem %s1106_s3, %s863_s22 }
   0xe   : > { %s973_s19 = scalar_lea.vmem %s1104_s1, %s912_s16 }
   0xf   : > { %v725_v1 = vld [vmem:[%s973_s19 + $0x70] sm:$0xf]  ;;  %v879_v2 = vld [vmem:[%s973_s19 + $0x74] sm:$0xf0]  ;;  %v717_v10 = vld [vmem:[%s973_s19 + $0x60] sm:$0xf] }
  0x10   : > { %v789_v3 = vld [vmem:[%s973_s19 + $0xf0] sm:$0xf]  ;;  %v726_v4 = vor.u32 %v879_v2, %v725_v1  ;;  %v895_v5 = vld [vmem:[%s973_s19 + $0xf4] sm:$0xf0]  ;;  %v877_v11 = vld [vmem:[%s973_s19 + $0x64] sm:$0xf0] }
  0x11   : > { %v853_v6 = vld [vmem:[%s973_s19 + $0x170] sm:$0xf]  ;;  %v911_v7 = vld [vmem:[%s973_s19 + $0x174] sm:$0xf0]  ;;  %v790_v8 = vor.u32 %v895_v5, %v789_v3  ;;  %v781_v12 = vld [vmem:[%s973_s19 + $0xe0] sm:$0xf]  ;;  %v718_v13 = vor.u32 %v877_v11, %v717_v10 }
  0x12   : > { %v854_v9 = vor.u32 %v911_v7, %v853_v6  ;;  %492 = vmatpush.bf16.msra.mxu0 %v726_v4  ;;  %v893_v14 = vld [vmem:[%s973_s19 + $0xe4] sm:$0xf0]  ;;  %v845_v15 = vld [vmem:[%s973_s19 + $0x160] sm:$0xf]  ;;  %v709_v19 = vld [vmem:[%s973_s19 + $0x50] sm:$0xf] }
  0x13   : > { %v909_v16 = vld [vmem:[%s973_s19 + $0x164] sm:$0xf0]  ;;  %505 = vmatpush.bf16.msra.mxu1 %v790_v8  ;;  %v782_v17 = vor.u32 %v893_v14, %v781_v12  ;;  %v875_v20 = vld [vmem:[%s973_s19 + $0x54] sm:$0xf0]  ;;  %v773_v21 = vld [vmem:[%s973_s19 + $0xd0] sm:$0xf] }
  0x14   : > { %518 = vmatpush.bf16.msra.mxu2 %v854_v9  ;;  %v846_v18 = vor.u32 %v909_v16, %v845_v15  ;;  %v891_v22 = vld [vmem:[%s973_s19 + $0xd4] sm:$0xf0]  ;;  %v837_v23 = vld [vmem:[%s973_s19 + $0x150] sm:$0xf]  ;;  %v710_v25 = vor.u32 %v875_v20, %v709_v19  ;;  %v701_v26 = vld [vmem:[%s973_s19 + $0x40] sm:$0xf] }
  0x15   : > { %v907_v24 = vld [vmem:[%s973_s19 + $0x154] sm:$0xf0]  ;;  %v995_v27 = vld [vmem:[%s973_s19 + $0x180] sm:$0xff]  ;;  %v878_v28 = vld [vmem:[%s973_s19 + $0x74] sm:$0xf]  ;;  %v774_v29 = vor.u32 %v891_v22, %v773_v21 }
  0x16   : > { %493 = vmatpush.bf16.msra.mxu0 %v718_v13  ;;  %v838_v30 = vor.u32 %v907_v24, %v837_v23  ;;  %v873_v31 = vld [vmem:[%s973_s19 + $0x44] sm:$0xf0]  ;;  %v765_v32 = vld [vmem:[%s973_s19 + $0xc0] sm:$0xf]  ;;  %v382_v33 = vunpack.c.l.b16 %v995_v27  ;;  %v727_v34 = vld [vmem:[%s973_s19 + $0x78] sm:$0xf0] }
  0x17   : > { %506 = vmatpush.bf16.msra.mxu1 %v782_v17  ;;  %v889_v35 = vld [vmem:[%s973_s19 + $0xc4] sm:$0xf0]  ;;  %v829_v36 = vld [vmem:[%s973_s19 + $0x140] sm:$0xf]  ;;  %v730_v39 = vor.u32 %v878_v28, %v727_v34  ;;  %v702_v40 = vor.u32 %v873_v31, %v701_v26  ;;  %v693_v41 = vld [vmem:[%s973_s19 + $0x30] sm:$0xf] }
  0x18   : > { %519 = vmatpush.bf16.msra.mxu2 %v846_v18  ;;  %v905_v37 = vld [vmem:[%s973_s19 + $0x144] sm:$0xf0]  ;;  %v432_v38 = vpack.c.b16 %v382_v33, %v382_v33  ;;  %v876_v42 = vld [vmem:[%s973_s19 + $0x64] sm:$0xf]  ;;  %v719_v43 = vld [vmem:[%s973_s19 + $0x68] sm:$0xf0]  ;;  %v766_v44 = vor.u32 %v889_v35, %v765_v32  ;;  %v383_v18 = vunpack.c.h.b16 %v995_v27 }
  0x19   : > { %v830_v46 = vor.u32 %v905_v37, %v829_v36  ;;  %v871_v47 = vld [vmem:[%s973_s19 + $0x34] sm:$0xf0]  ;;  %v757_v48 = vld [vmem:[%s973_s19 + $0xb0] sm:$0xf]  ;;  %v722_v52 = vor.u32 %v876_v42, %v719_v43  ;;  %v874_v54 = vld [vmem:[%s973_s19 + $0x54] sm:$0xf] }
  0x1a   : > { %494 = vmatpush.bf16.msra.mxu0 %v710_v25  ;;  %v487_v45 = vsel %vm485_vm0, %v432_v38, 0  ;;  %v887_v49 = vld [vmem:[%s973_s19 + $0xb4] sm:$0xf0]  ;;  %v821_v50 = vld [vmem:[%s973_s19 + $0x130] sm:$0xf]  ;;  %v694_v53 = vor.u32 %v871_v47, %v693_v41  ;;  %v433_v34 = vpack.c.b16 %v383_v18, %v383_v18  ;;  %v935_v42 = vmov 0  }
  0x1b   : > { %507 = vmatpush.bf16.msra.mxu1 %v774_v29  ;;  %538 = vmatpush.bf16.msra.mxu3 %v487_v45  ;;  %v903_v51 = vld [vmem:[%s973_s19 + $0x134] sm:$0xf0]  ;;  %v711_v55 = vld [vmem:[%s973_s19 + $0x58] sm:$0xf0]  ;;  %v758_v56 = vor.u32 %v887_v49, %v757_v48  ;;  %v685_v58 = vld [vmem:[%s973_s19 + $0x20] sm:$0xf] }
  0x1c   : > { %520 = vmatpush.bf16.msra.mxu2 %v838_v30  ;;  %v822_v57 = vor.u32 %v903_v51, %v821_v50  ;;  %v869_v59 = vld [vmem:[%s973_s19 + $0x24] sm:$0xf0]  ;;  %v749_v60 = vld [vmem:[%s973_s19 + $0xa0] sm:$0xf]  ;;  %v714_v0 = vor.u32 %v874_v54, %v711_v55  ;;  %v872_v1 = vld [vmem:[%s973_s19 + $0x44] sm:$0xf]  ;;  %922 = vset.pattern.permute.xlu0 %v935_v42 }
  0x1d   : > { %v885_v61 = vld [vmem:[%s973_s19 + $0xa4] sm:$0xf0]  ;;  %v813_v62 = vld [vmem:[%s973_s19 + $0x120] sm:$0xf]  ;;  %v686_v2 = vor.u32 %v869_v59, %v685_v58  ;;  %v703_v3 = vld [vmem:[%s973_s19 + $0x48] sm:$0xf0] }
  0x1e   : > { %495 = vmatpush.bf16.msra.mxu0 %v702_v40  ;;  %v901_v63 = vld [vmem:[%s973_s19 + $0x124] sm:$0xf0]  ;;  %v1024_v4 = vld.sshfl [vmem:[#allocation1 + $0x18] sm:$0xff pattern:$0x73625140]  ;;  %v750_v5 = vor.u32 %v885_v61, %v749_v60  ;;  %v706_v13 = vor.u32 %v872_v1, %v703_v3  ;;  %v490_v48 = vsel %vm485_vm0, %v433_v34, 0 }
  0x1f   : > { %544 = vmatpush.bf16.msrb.mxu3 %v730_v39  ;;  %508 = vmatpush.bf16.msra.mxu1 %v766_v44  ;;  %v814_v6 = vor.u32 %v901_v63, %v813_v62  ;;  %v677_v7 = vld [vmem:[%s973_s19 + $0x10] sm:$0xf]  ;;  %v867_v8 = vld [vmem:[%s973_s19 + $0x14] sm:$0xf0]  ;;  %v669_v15 = vld [vmem:[%s973_s19] sm:$0xf] }
  0x20   : > { %521 = vmatpush.bf16.msra.mxu2 %v830_v46  ;;  %v741_v9 = vld [vmem:[%s973_s19 + $0x90] sm:$0xf]  ;;  %v883_v10 = vld [vmem:[%s973_s19 + $0x94] sm:$0xf0]  ;;  %859 = vmatmul.msk.bf16.vlgmr.msra.gmra.mxu3 %vm482_vm1, %v1024_v4  ;;  %v678_v14 = vor.u32 %v867_v8, %v677_v7  ;;  %v870_v16 = vld [vmem:[%s973_s19 + $0x34] sm:$0xf] }
  0x21   : > { %v805_v11 = vld [vmem:[%s973_s19 + $0x110] sm:$0xf]  ;;  %v899_v12 = vld [vmem:[%s973_s19 + $0x114] sm:$0xf0]  ;;  %v695_v17 = vld [vmem:[%s973_s19 + $0x38] sm:$0xf0]  ;;  %v742_v19 = vor.u32 %v883_v10, %v741_v9 }
  0x22   : > { %496 = vmatpush.bf16.msra.mxu0 %v694_v53  ;;  %v806_v20 = vor.u32 %v899_v12, %v805_v11  ;;  %v865_v21 = vld [vmem:[%s973_s19 + $0x4] sm:$0xf0]  ;;  %v733_v22 = vld [vmem:[%s973_s19 + $0x80] sm:$0xf]  ;;  %v894_v24 = vld [vmem:[%s973_s19 + $0xf4] sm:$0xf]  ;;  %v698_v28 = vor.u32 %v870_v16, %v695_v17 }
  0x23   : > { %545 = vmatpush.bf16.msrb.mxu3 %v722_v52  ;;  %509 = vmatpush.bf16.msra.mxu1 %v758_v56  ;;  %v881_v23 = vld [vmem:[%s973_s19 + $0x84] sm:$0xf0]  ;;  %v791_v25 = vld [vmem:[%s973_s19 + $0xf8] sm:$0xf0]  ;;  %v910_v26 = vld [vmem:[%s973_s19 + $0x174] sm:$0xf]  ;;  %v670_v31 = vor.u32 %v865_v21, %v669_v15 }
  0x24   : > { %522 = vmatpush.bf16.msra.mxu2 %v822_v57  ;;  %v855_v29 = vld [vmem:[%s973_s19 + $0x178] sm:$0xf0]  ;;  %v797_v30 = vld [vmem:[%s973_s19 + $0x100] sm:$0xf]  ;;  %v897_v27 = vld [vmem:[%s973_s19 + $0x104] sm:$0xf0]  ;;  %v734_v35 = vor.u32 %v881_v23, %v733_v22  ;;  %v794_v36 = vor.u32 %v894_v24, %v791_v25 }
  0x25   : > { %v868_v32 = vld [vmem:[%s973_s19 + $0x24] sm:$0xf]  ;;  %v687_v33 = vld [vmem:[%s973_s19 + $0x28] sm:$0xf0]  ;;  %v858_v37 = vor.u32 %v910_v26, %v855_v29  ;;  %v798_v38 = vor.u32 %v897_v27, %v797_v30  ;;  %v866_v46 = vld [vmem:[%s973_s19 + $0x14] sm:$0xf] }
  0x26   : > { %497 = vmatpush.bf16.msra.mxu0 %v686_v2  ;;  %v892_v39 = vld [vmem:[%s973_s19 + $0xe4] sm:$0xf]  ;;  %v783_v40 = vld [vmem:[%s973_s19 + $0xe8] sm:$0xf0]  ;;  %v690_v43 = vor.u32 %v868_v32, %v687_v33  ;;  %v679_v47 = vld [vmem:[%s973_s19 + $0x18] sm:$0xf0] }
  0x27   : > { %546 = vmatpush.bf16.msrb.mxu3 %v714_v0  ;;  %510 = vmatpush.bf16.msra.mxu1 %v750_v5  ;;  %v908_v41 = vld [vmem:[%s973_s19 + $0x164] sm:$0xf]  ;;  %v847_v44 = vld [vmem:[%s973_s19 + $0x168] sm:$0xf0]  ;;  %v786_v49 = vor.u32 %v892_v39, %v783_v40  ;;  %v890_v53 = vld [vmem:[%s973_s19 + $0xd4] sm:$0xf]  ;;  %v682_v55 = vor.u32 %v866_v46, %v679_v47 }
  0x28   : > { %523 = vmatpush.bf16.msra.mxu2 %v814_v6  ;;  %v230_v45 = vld.sshfl [vmem:[#allocation1] sm:$0xff pattern:$0x73625140]  ;;  %v1056_v50 = vld.sshfl [vmem:[#allocation1 + $0x10] sm:$0xff pattern:$0x73625140]  ;;  %v850_v52 = vor.u32 %v908_v41, %v847_v44 }
  0x29   : > { %v1058_v51 = vld.sshfl [vmem:[#allocation1 + $0x8] sm:$0xff pattern:$0x73625140]  ;;  %v775_v54 = vld [vmem:[%s973_s19 + $0xd8] sm:$0xf0] }
  0x2a   : > { %498 = vmatpush.bf16.msra.mxu0 %v678_v14  ;;  %v906_v56 = vld [vmem:[%s973_s19 + $0x154] sm:$0xf]  ;;  %v839_v57 = vld [vmem:[%s973_s19 + $0x158] sm:$0xf0]  ;;  %v222_v58 = vld [vmem:[%s1105_s2] sm:$0x7]  ;;  %v778_v61 = vor.u32 %v890_v53, %v775_v54 }
  0x2b   : > { %547 = vmatpush.bf16.msrb.mxu3 %v706_v13  ;;  %511 = vmatpush.bf16.msra.mxu1 %v742_v19  ;;  %v864_v59 = vld [vmem:[%s973_s19 + $0x4] sm:$0xf]  ;;  %v671_v60 = vld [vmem:[%s973_s19 + $0x8] sm:$0xf0]  ;;  %v842_v62 = vor.u32 %v906_v56, %v839_v57  ;;  %v886_v7 = vld [vmem:[%s973_s19 + $0xb4] sm:$0xf] }
  0x2c   : > { %524 = vmatpush.bf16.msra.mxu2 %v806_v20  ;;  %v888_v63 = vld [vmem:[%s973_s19 + $0xc4] sm:$0xf]  ;;  %v767_v0 = vld [vmem:[%s973_s19 + $0xc8] sm:$0xf0]  ;;  %225 = vperm.xlu0 %922, %v222_v58   ;;  %v674_v1 = vor.u32 %v864_v59, %v671_v60  ;;  %v759_v8 = vld [vmem:[%s973_s19 + $0xb8] sm:$0xf0] }
  0x2d   : > { %v904_v2 = vld [vmem:[%s973_s19 + $0x144] sm:$0xf]  ;;  %v831_v3 = vld [vmem:[%s973_s19 + $0x148] sm:$0xf0]  ;;  %v770_v5 = vor.u32 %v888_v63, %v767_v0  ;;  %v902_v9 = vld [vmem:[%s973_s19 + $0x134] sm:$0xf]  ;;  %v762_v11 = vor.u32 %v886_v7, %v759_v8 }
  0x2e   : > { %499 = vmatpush.bf16.msra.mxu0 %v670_v31  ;;  %v834_v6 = vor.u32 %v904_v2, %v831_v3  ;;  %v823_v10 = vld [vmem:[%s973_s19 + $0x138] sm:$0xf0]  ;;  %v884_v13 = vld [vmem:[%s973_s19 + $0xa4] sm:$0xf]  ;;  %v751_v14 = vld [vmem:[%s973_s19 + $0xa8] sm:$0xf0] }
  0x2f   : > { %548 = vmatpush.bf16.msrb.mxu3 %v698_v28  ;;  %512 = vmatpush.bf16.msra.mxu1 %v734_v35  ;;  %v826_v12 = vor.u32 %v902_v9, %v823_v10  ;;  %v900_v15 = vld [vmem:[%s973_s19 + $0x124] sm:$0xf]  ;;  %v815_v16 = vld [vmem:[%s973_s19 + $0x128] sm:$0xf0]  ;;  %v754_v17 = vor.u32 %v884_v13, %v751_v14  ;;  %v882_v19 = vld [vmem:[%s973_s19 + $0x94] sm:$0xf] }
  0x30   : > { %525 = vmatpush.bf16.msra.mxu2 %v798_v38  ;;  %v818_v18 = vor.u32 %v900_v15, %v815_v16  ;;  %v743_v20 = vld [vmem:[%s973_s19 + $0x98] sm:$0xf0]  ;;  %v898_v21 = vld [vmem:[%s973_s19 + $0x114] sm:$0xf]  ;;  %v880_v25 = vld [vmem:[%s973_s19 + $0x84] sm:$0xf] }
  0x31   : > { %500 = vmatmul.bf16.vlgmr.msra.gmra.mxu0 %v230_v45  ;;  %v807_v22 = vld [vmem:[%s973_s19 + $0x118] sm:$0xf0]  ;;  %v746_v23 = vor.u32 %v882_v19, %v743_v20  ;;  %v735_v26 = vld [vmem:[%s973_s19 + $0x88] sm:$0xf0]  ;;  %v896_v28 = vld [vmem:[%s973_s19 + $0x104] sm:$0xf] }
  0x32   : > { %557 = vmatpush.bf16.msrb.mxu0 %v794_v36  ;;  %513 = vmatmul.bf16.vlgmr.msra.gmra.mxu1 %v1058_v51  ;;  %v810_v24 = vor.u32 %v898_v21, %v807_v22  ;;  %v799_v29 = vld [vmem:[%s973_s19 + $0x108] sm:$0xf0]  ;;  %v738_v30 = vor.u32 %v880_v25, %v735_v26 }
  0x33   : > { %570 = vmatpush.bf16.msrb.mxu1 %v858_v37  ;;  %549 = vmatpush.bf16.msrb.mxu3 %v690_v43  ;;  %v802_v27 = vor.u32 %v896_v28, %v799_v29 }
  0x34   : > { %590 = vmatpush.bf16.msrb.mxu2 %v490_v48 }
  0x35   : > { %526 = vmatmul.bf16.vlgmr.msra.gmra.mxu2 %v1056_v50 }
  0x36   : > { %558 = vmatpush.bf16.msrb.mxu0 %v786_v49 }
  0x37   : > { %571 = vmatpush.bf16.msrb.mxu1 %v850_v52  ;;  %550 = vmatpush.bf16.msrb.mxu3 %v682_v55 }
  0x3a   : > { %559 = vmatpush.bf16.msrb.mxu0 %v778_v61 }
  0x3b   : > { %572 = vmatpush.bf16.msrb.mxu1 %v842_v62  ;;  %551 = vmatpush.bf16.msrb.mxu3 %v674_v1 }
  0x3e   : > { %560 = vmatpush.bf16.msrb.mxu0 %v770_v5  ;;  %552 = vmatmul.bf16.vlgmr.msrb.gmra.mxu3 %v230_v45 }
  0x3f   : > { %573 = vmatpush.bf16.msrb.mxu1 %v834_v6 }
  0x42   : > { %561 = vmatpush.bf16.msrb.mxu0 %v762_v11 }
  0x43   : > { %574 = vmatpush.bf16.msrb.mxu1 %v826_v12 }
  0x45   : > { %860 = vmatmul.msk.bf16.vlgmr.msrb.gmra.mxu2 %vm482_vm1, %v1024_v4 }
  0x46   : > { %562 = vmatpush.bf16.msrb.mxu0 %v754_v17 }
  0x47   : > { %575 = vmatpush.bf16.msrb.mxu1 %v818_v18 }
  0x4a   : > { %563 = vmatpush.bf16.msrb.mxu0 %v746_v23 }
  0x4b   : > { %576 = vmatpush.bf16.msrb.mxu1 %v810_v24 }
  0x4e   : > { %564 = vmatpush.bf16.msrb.mxu0 %v738_v30 }
  0x4f   : > { %577 = vmatpush.bf16.msrb.mxu1 %v802_v27 }
  0x51   : > { %565 = vmatmul.bf16.vlgmr.msrb.gmra.mxu0 %v1058_v51 }
  0x52   : > { %578 = vmatmul.bf16.vlgmr.msrb.gmra.mxu1 %v1056_v50 }
  0x9e   : > { %v226_v39 = vpop.permute.xlu0 %225 }
  0xa3   : > { %v540_v31 = vpop.f32.mrf.mxu3 }
  0xab   : > { %v542_v33 = vpop.f32.mrf.mxu3 }
  0xae   : > { %v501_v32 = vpop.f32.mrf.mxu0 }
  0xaf   : > { %v514_v4 = vpop.f32.mrf.mxu1  ;;  %v502_v40 = vadd.f32 %v501_v32, %v226_v39 }
  0xb1   : > { %v515_v43 = vadd.f32 %v514_v4, %v502_v40 }
  0xb6   : > { %v503_v35 = vpop.f32.mrf.mxu0 }
  0xb7   : > { %v516_v36 = vpop.f32.mrf.mxu1 }
  0xb8   : > { %v527_v34 = vpop.f32.mrf.mxu2 }
  0xb9   : > { %v528_v46 = vadd.f32 %v527_v34, %v515_v43 }
  0xbb   : > { %v541_v51 = vadd.f32 %v540_v31, %v528_v46 }
  0xc0   : > { %v529_v37 = vpop.f32.mrf.mxu2 }
  0xc1   : > { %v553_v38 = vpop.f32.mrf.mxu3 }
  0xc2   : > { %v554_v44 = vadd.f32 %v553_v38, %v226_v39 }
  0xc8   : > { %v592_v41 = vpop.f32.mrf.mxu2 }
  0xc9   : > { %v555_v42 = vpop.f32.mrf.mxu3 }
  0xce   : > { %v566_v45 = vpop.f32.mrf.mxu0 }
  0xcf   : > { %v567_v47 = vadd.f32 %v566_v45, %v554_v44  ;;  %v579_v48 = vpop.f32.mrf.mxu1 }
  0xd0   : > { %v594_v50 = vpop.f32.mrf.mxu2 }
  0xd1   : > { %v580_v49 = vadd.f32 %v579_v48, %v567_v47 }
  0xd3   : > { %v593_v52 = vadd.f32 %v592_v41, %v580_v49 }
  0xd5   : > { %923 = vtanh.f32 %v593_v52 }
  0xd6   : > { %v568_v53 = vpop.f32.mrf.mxu0  ;;  %925 = vtanh.f32 %v541_v51 }
  0xd7   : > { %v581_v54 = vpop.f32.mrf.mxu1 }
  0xdb   : > { %v924_v55 = vpop.eup %923 }
  0xdc   : > { %v600_v56 = vrot.slane %v924_v55, 4  ;;  %v926_v57 = vpop.eup %925 }
  0xde   : > { %v601_v58 = vsel %vm485_vm0, %v926_v57, %v600_v56 }
  0xdf   : > { %603 = vst [vmem:[%s170_s25] sm:$0x77] %v601_v58 }
  0xe0 PF: > { %s13_s12 = sadd.s32 1, %s933_s12  }
  0xe1   : > { %p10_p4 = scmp.ge.s32.totalorder %s13_s12, 4  }
  0xe3   :  { %12 = sbr.rel (!%p10_p4) target bundleno = 1 (0x1), region = 62 }

</bundles_post_ra>
